<compile_context>
chip_gen: v5e
topology: v5e:2x2
jax: 0.10.0
libtpu: 0.0.40
codegen_flags: <defaults>
</compile_context>

<pallas_src>
import numpy as np
import jax
import jax.numpy as jnp
from jax.experimental import pallas as pl
from jax.experimental.pallas import tpu as pltpu

EPS = 1e-5                       # nn.LayerNorm default
COMPUTE_DTYPE = jnp.bfloat16     # matmul operand dtype (accumulation is always f32)
OUT_PAD = 128                    # lane-dense padded width of the final projection
N_POSITION = 200                 # PositionalEncoding table length
RESIDENT_BUDGET = 24 << 20       # bytes: below this, keep all weights resident (1 grid step)


# ----------------------------- shared math helpers ----------------------------

def _layernorm(x, w, b):
    x = x.astype(jnp.float32)
    mu = jnp.mean(x, axis=-1, keepdims=True)
    var = jnp.mean((x - mu) ** 2, axis=-1, keepdims=True)
    return (x - mu) * jax.lax.rsqrt(var + EPS) * w + b


def _gelu(x):
    # exact (erf) GELU, matching torch.nn.GELU default
    # TODO(synk): if bundle dumps show VALU-bound on v5e, switch to tanh-approx GELU (EUP).
    return 0.5 * x * (1.0 + jax.lax.erf(x * np.float32(1.0 / np.sqrt(2.0))))


def _mm(x, w):
    # mixed-precision matmul: bf16 operands, f32 accumulation
    return jnp.dot(x.astype(w.dtype), w, preferred_element_type=jnp.float32)


# --------------------------- per-layer compute (shared) -------------------------

def make_layer_fn(B, T, S, D, H):
    Dh = D // H
    scale = np.float32(1.0 / np.sqrt(Dh))
    M = B * T

    def attention(q, k, v, kv_len):
        # q: (M, D) f32 (already scaled); k, v: (B*kv_len, D) f32
        q3 = q.reshape(B, T, D)
        k3 = k.reshape(B, kv_len, D)
        v3 = v.reshape(B, kv_len, D)
        outs = []
        for hh in range(H):                     # unrolled over heads; batched over B
            sl = slice(hh * Dh, (hh + 1) * Dh)
            qh = q3[:, :, sl].astype(COMPUTE_DTYPE)
            kh = k3[:, :, sl].astype(COMPUTE_DTYPE)
            vh = v3[:, :, sl].astype(COMPUTE_DTYPE)
            s = jnp.einsum('btd,bsd->bts', qh, kh,
                           preferred_element_type=jnp.float32)
            m = jnp.max(s, axis=-1, keepdims=True)
            e = jnp.exp(s - m)
            p = e * pl.reciprocal(jnp.sum(e, axis=-1, keepdims=True), approx=True)
            outs.append(jnp.einsum('bts,bsd->btd', p.astype(COMPUTE_DTYPE), vh,
                                   preferred_element_type=jnp.float32))
        # Single value-level assembly of all heads (no per-head masked VMEM stores).
        return jnp.concatenate(outs, axis=-1).reshape(M, D)

    def run_layer(x, enc, w):
        (ln1w, ln1b, wqkv, wo1, bo1,
         ln2w, ln2b, wq, wk, wv, wo2, bo2,
         ln3w, ln3b, wf1, bf1, wf2, bf2) = w

        # ---- self attention (pre-norm) ----
        h = _layernorm(x, ln1w, ln1b)
        qkv = _mm(h, wqkv)                                       # (M, 3D) f32
        a = attention(qkv[:, :D] * scale, qkv[:, D:2 * D], qkv[:, 2 * D:], T)
        x = x + _mm(a, wo1) + bo1

        # ---- cross attention with encoder output ----
        h = _layernorm(x, ln2w, ln2b)
        a = attention(_mm(h, wq) * scale, _mm(enc, wk), _mm(enc, wv), S)
        x = x + _mm(a, wo2) + bo2

        # ---- MLP ----
        h = _layernorm(x, ln3w, ln3b)
        h = _gelu(_mm(h, wf1) + bf1)
        x = x + _mm(h, wf2) + bf2
        return x

    return run_layer


# --------------------------------- fused kernels --------------------------------

def make_grid_kernel(B, T, S, D, H, depth):
    """grid=(depth,): per-layer weights double-buffer pipelined; activations in VMEM scratch."""
    run_layer = make_layer_fn(B, T, S, D, H)
    M = B * T

    def kernel(pos_ref, dec_ref, enc_ref, w_in_ref, b_in_ref, *rest):
        layer_refs = rest[:18]
        lnfw, lnfb, w_out_ref, b_out_ref, out_ref, x_ref = rest[18:]
        layer = pl.program_id(0)

        # ---- prologue: linear_in_emb + positional encoding (pos_drop = identity) ----
        @pl.when(layer == 0)
        def _():
            x0 = jnp.dot(dec_ref[...], w_in_ref[...],
                         preferred_element_type=jnp.float32) + b_in_ref[...]
            x_ref[...] = (x0.reshape(B, T, D) + pos_ref[...]).reshape(M, D)

        x = run_layer(x_ref[...], enc_ref[...], tuple(r[0] for r in layer_refs))
        x_ref[...] = x

        # ---- epilogue: final norm + linear_out_emb (lane-dense padded store) ----
        @pl.when(layer == depth - 1)
        def _():
            hf = _layernorm(x, lnfw[...], lnfb[...])
            out_ref[...] = jnp.dot(hf, w_out_ref[...],
                                   preferred_element_type=jnp.float32) + b_out_ref[...]

    return kernel


def make_resident_kernel(B, T, S, D, H, depth):
    """Single grid step: all layers' weights resident in VMEM, in-kernel unrolled layer loop."""
    run_layer = make_layer_fn(B, T, S, D, H)
    M = B * T

    def kernel(pos_ref, dec_ref, enc_ref, w_in_ref, b_in_ref, *rest):
        layer_refs = rest[:18]
        lnfw, lnfb, w_out_ref, b_out_ref, out_ref = rest[18:]

        x0 = jnp.dot(dec_ref[...], w_in_ref[...],
                     preferred_element_type=jnp.float32) + b_in_ref[...]
        x = (x0.reshape(B, T, D) + pos_ref[...]).reshape(M, D)
        enc = enc_ref[...]

        for l in range(depth):                # small depth: unrolled, weights already in VMEM
            x = run_layer(x, enc, tuple(r[l] for r in layer_refs))

        hf = _layernorm(x, lnfw[...], lnfb[...])
        out_ref[...] = jnp.dot(hf, w_out_ref[...],
                               preferred_element_type=jnp.float32) + b_out_ref[...]

    return kernel


# ----------------------------------- wrapper ------------------------------------

def transformer_decoder_forward(enc_output, dec_input, params, num_heads,
                                use_layer_grid=None):
    B, T, _ = dec_input.shape
    S = enc_output.shape[1]
    D = params["w_in"].shape[1]
    depth = len(params["blocks"])
    hidden = params["blocks"][0][14].shape[1]
    assert D % num_heads == 0
    assert T <= params["pos"].shape[1], "positional table too short for this sequence length"
    M = B * T
    cdt = COMPUTE_DTYPE

    # host-side (XLA) prep: flatten batch, stack per-layer weights, pad out-proj
    dec_flat = dec_input.reshape(M, 2)
    pos_td = params["pos"][0, :T, :]                              # (T, D) f32; broadcast in-kernel
    enc_flat = enc_output.reshape(B * S, D).astype(cdt)

    stacked = [jnp.stack([blk[i] for blk in params["blocks"]]) for i in range(18)]
    matmul_idx = {2, 3, 7, 8, 9, 10, 14, 16}                      # wqkv,wo1,wq,wk,wv,wo2,wf1,wf2
    # TODO(synk): on v7x quantize these to fp8 (int8+scales on v5e/v6e) at production sizes.
    stacked = [s.astype(cdt) if i in matmul_idx else s for i, s in enumerate(stacked)]

    w_out_pad = jnp.zeros((D, OUT_PAD), jnp.float32).at[:, :2].set(params["w_out"])
    b_out_pad = jnp.zeros((1, OUT_PAD), jnp.float32).at[:, :2].set(params["b_out"])

    in_arrays = ([pos_td, dec_flat, enc_flat, params["w_in"], params["b_in"]]
                 + stacked
                 + [params["ln_f_w"], params["ln_f_b"], w_out_pad, b_out_pad])

    weight_bytes = sum(int(s.size) * s.dtype.itemsize for s in stacked)
    fixed_bytes = sum(int(a.size) * a.dtype.itemsize for a in in_arrays) - weight_bytes
    out_bytes = M * OUT_PAD * 4
    act_bytes = M * D * 4

    if use_layer_grid is None:
        use_layer_grid = (weight_bytes + fixed_bytes + out_bytes + act_bytes) > RESIDENT_BUDGET

    def full_spec(a):
        nd = a.ndim
        return pl.BlockSpec(a.shape, lambda l, _n=nd: (0,) * _n)

    if use_layer_grid:
        def layer_spec(a):
            return pl.BlockSpec((1,) + a.shape[1:], lambda l: (l, 0, 0))
        grid = (depth,)
        kernel = make_grid_kernel(B, T, S, D, num_heads, depth)
        weight_specs = [layer_spec(s) for s in stacked]
        scratch_shapes = [pltpu.VMEM((M, D), jnp.float32)]        # resident activations
        live_weight_bytes = 2 * (weight_bytes // depth)           # double-buffered single layer
        scratch_bytes = act_bytes
    else:
        grid = (1,)
        kernel = make_resident_kernel(B, T, S, D, num_heads, depth)
        weight_specs = [full_spec(s) for s in stacked]
        scratch_shapes = []
        live_weight_bytes = 2 * weight_bytes                      # conservative (buffered once)
        scratch_bytes = 0

    # explicit scoped-VMEM limit from the actual resident footprint (+headroom, chip-safe cap)
    needed = 2 * (fixed_bytes + out_bytes) + live_weight_bytes + scratch_bytes
    vmem_limit = int(min(max(2 * needed + (4 << 20), 16 << 20), 64 << 20))

    in_specs = ([full_spec(pos_td), full_spec(dec_flat), full_spec(enc_flat),
                 full_spec(params["w_in"]), full_spec(params["b_in"])]
                + weight_specs
                + [full_spec(params["ln_f_w"]), full_spec(params["ln_f_b"]),
                   full_spec(w_out_pad), full_spec(b_out_pad)])

    # advisory cost estimate for XLA's scheduler
    flops_layer = (2 * M * D * 3 * D + 4 * B * T * T * D + 2 * M * D * D
                   + 2 * M * D * D + 4 * B * S * D * D + 4 * B * T * S * D
                   + 2 * M * D * D + 4 * M * D * hidden)
    flops = int(depth * flops_layer + 2 * M * 2 * D + 2 * M * D * OUT_PAD)
    transcendentals = int(depth * (B * num_heads * T * (T + S) + M * hidden + 3 * M))
    bytes_accessed = int(sum(int(a.size) * a.dtype.itemsize for a in in_arrays)
                         + M * OUT_PAD * 4)

    out_pad = pl.pallas_call(
        kernel,
        out_shape=jax.ShapeDtypeStruct((M, OUT_PAD), jnp.float32),
        grid=grid,
        in_specs=in_specs,
        out_specs=pl.BlockSpec((M, OUT_PAD), lambda l: (0, 0)),
        scratch_shapes=scratch_shapes,
        compiler_params=pltpu.CompilerParams(
            dimension_semantics=("arbitrary",),
            vmem_limit_bytes=vmem_limit),
        cost_estimate=pl.CostEstimate(flops=flops, transcendentals=transcendentals,
                                      bytes_accessed=bytes_accessed),
    )(*in_arrays)

    return out_pad[:, :2].reshape(B, T, 2)


# ------------------------------ parameter setup ---------------------------------

def sinusoid_table(n_position, d_hid):
    def angle_vec(pos):
        return [pos / np.power(10000, 2 * (j // 2) / d_hid) for j in range(d_hid)]
    table = np.array([angle_vec(p) for p in range(n_position)], dtype=np.float64)
    table[:, 0::2] = np.sin(table[:, 0::2])
    table[:, 1::2] = np.cos(table[:, 1::2])
    return jnp.asarray(table, dtype=jnp.float32)[None]            # (1, n_position, d_hid)


def init_params(key, D, depth, mlp_ratio):
    hidden = int(D * mlp_ratio)
    keys = iter(jax.random.split(key, 4 + 8 * depth))

    def lin(fan_in, fan_out):
        # deterministic stand-in for trunc_normal_(std=0.02)
        return jax.random.normal(next(keys), (fan_in, fan_out), jnp.float32) * 0.02

    params = {
        "w_in": lin(2, D),
        "b_in": jnp.zeros((1, D), jnp.float32),
        "pos": sinusoid_table(N_POSITION, D),
        "blocks": [],
        "ln_f_w": jnp.ones((1, D), jnp.float32),
        "ln_f_b": jnp.zeros((1, D), jnp.float32),
        "w_out": lin(D, 2),
        "b_out": jnp.zeros((1, 2), jnp.float32),
    }
    for _ in range(depth):
        blk = [
            jnp.ones((1, D), jnp.float32), jnp.zeros((1, D), jnp.float32),   # ln1
            lin(D, 3 * D),                                                   # qkv (no bias)
            lin(D, D), jnp.zeros((1, D), jnp.float32),                       # self proj
            jnp.ones((1, D), jnp.float32), jnp.zeros((1, D), jnp.float32),   # ln2
            lin(D, D), lin(D, D), lin(D, D),                                 # wq, wk, wv
            lin(D, D), jnp.zeros((1, D), jnp.float32),                       # cross proj
            jnp.ones((1, D), jnp.float32), jnp.zeros((1, D), jnp.float32),   # ln3
            lin(D, hidden), jnp.zeros((1, hidden), jnp.float32),             # fc1
            lin(hidden, D), jnp.zeros((1, D), jnp.float32),                  # fc2
        ]
        params["blocks"].append(blk)
    return params


# ---------------------------- pure-JAX reference --------------------------------
# Mirrors the kernel's mixed precision (bf16 matmul operands, f32 accumulation) so
# the comparison is tight; softmax uses an exact divide (kernel uses approx recip).

def ref_forward(enc_output, dec_input, params, num_heads):
    cdt = COMPUTE_DTYPE
    B, T, _ = dec_input.shape
    D = params["w_in"].shape[1]
    H = num_heads
    Dh = D // H
    scale = np.float32(1.0 / np.sqrt(Dh))

    def mm(x, w):
        return jnp.dot(x.astype(cdt), w.astype(cdt), preferred_element_type=jnp.float32)

    def mha(q, k, v):
        outs = []
        for hh in range(H):
            sl = slice(hh * Dh, (hh + 1) * Dh)
            s = jnp.einsum('btd,bsd->bts', q[:, :, sl].astype(cdt),
                           k[:, :, sl].astype(cdt), preferred_element_type=jnp.float32)
            p = jax.nn.softmax(s, axis=-1)
            outs.append(jnp.einsum('bts,bsd->btd', p.astype(cdt),
                                   v[:, :, sl].astype(cdt),
                                   preferred_element_type=jnp.float32))
        return jnp.concatenate(outs, axis=-1)

    x = jnp.dot(dec_input, params["w_in"],
                preferred_element_type=jnp.float32) + params["b_in"][0]
    x = x + params["pos"][:, :T, :]
    for blk in params["blocks"]:
        (ln1w, ln1b, wqkv, wo1, bo1,
         ln2w, ln2b, wq, wk, wv, wo2, bo2,
         ln3w, ln3b, wf1, bf1, wf2, bf2) = blk
        h = _layernorm(x, ln1w[0], ln1b[0])
        qkv = mm(h, wqkv)
        a = mha(qkv[..., :D] * scale, qkv[..., D:2 * D], qkv[..., 2 * D:])
        x = x + mm(a, wo1) + bo1[0]
        h = _layernorm(x, ln2w[0], ln2b[0])
        a = mha(mm(h, wq) * scale, mm(enc_output, wk), mm(enc_output, wv))
        x = x + mm(a, wo2) + bo2[0]
        h = _layernorm(x, ln3w[0], ln3b[0])
        x = x + mm(_gelu(mm(h, wf1) + bf1[0]), wf2) + bf2[0]
    x = _layernorm(x, params["ln_f_w"][0], params["ln_f_b"][0])
    return jnp.dot(x, params["w_out"],
                   preferred_element_type=jnp.float32) + params["b_out"][0]


# ----------------------------------- main ----------------------------------------

if __name__ == "__main__":
    B, T, S = 2, 8, 8        # batch, decoder seq len, encoder seq len
    D, H = 32, 4             # embed_dim, num_heads
    DEPTH, MLP_RATIO = 2, 4.0

    key = jax.random.PRNGKey(0)
    k_enc, k_dec, k_par = jax.random.split(key, 3)

    enc_output = jax.random.normal(k_enc, (B, S, D), jnp.float32)
    dec_input = jax.random.normal(k_dec, (B, T, 2), jnp.float32)
    params = init_params(k_par, D, DEPTH, MLP_RATIO)

    fwd = jax.jit(transformer_decoder_forward, static_argnums=(3, 4))

    # resident (single-grid-step) path -- auto-selected at these small shapes
    out_res = jax.block_until_ready(fwd(enc_output, dec_input, params, H, False))
    # layer-grid (pipelined per-layer weights) path -- forced, to validate both paths
    out_grid = jax.block_until_ready(fwd(enc_output, dec_input, params, H, True))

    assert out_res.shape == (B, T, 2) and out_res.dtype == jnp.float32
    assert out_grid.shape == (B, T, 2) and out_grid.dtype == jnp.float32

    ref = jax.block_until_ready(ref_forward(enc_output, dec_input, params, H))
    np.testing.assert_allclose(np.asarray(out_res), np.asarray(ref), rtol=2e-2, atol=5e-3)
    np.testing.assert_allclose(np.asarray(out_grid), np.asarray(ref), rtol=2e-2, atol=5e-3)

    print("KERNEL_OK")
</pallas_src>

<mosaic_0001>
module attributes {stable_mosaic.version = 11 : i64} {
  func.func @kernel(%arg0: i32, %arg1: memref<8x32xf32, #tpu.memory_space<vmem>>, %arg2: memref<16x2xf32, #tpu.memory_space<vmem>>, %arg3: memref<16x32xbf16, #tpu.memory_space<vmem>>, %arg4: memref<2x32xf32, #tpu.memory_space<vmem>>, %arg5: memref<1x32xf32, #tpu.memory_space<vmem>>, %arg6: memref<2x1x32xf32, #tpu.memory_space<vmem>>, %arg7: memref<2x1x32xf32, #tpu.memory_space<vmem>>, %arg8: memref<2x32x96xbf16, #tpu.memory_space<vmem>>, %arg9: memref<2x32x32xbf16, #tpu.memory_space<vmem>>, %arg10: memref<2x1x32xf32, #tpu.memory_space<vmem>>, %arg11: memref<2x1x32xf32, #tpu.memory_space<vmem>>, %arg12: memref<2x1x32xf32, #tpu.memory_space<vmem>>, %arg13: memref<2x32x32xbf16, #tpu.memory_space<vmem>>, %arg14: memref<2x32x32xbf16, #tpu.memory_space<vmem>>, %arg15: memref<2x32x32xbf16, #tpu.memory_space<vmem>>, %arg16: memref<2x32x32xbf16, #tpu.memory_space<vmem>>, %arg17: memref<2x1x32xf32, #tpu.memory_space<vmem>>, %arg18: memref<2x1x32xf32, #tpu.memory_space<vmem>>, %arg19: memref<2x1x32xf32, #tpu.memory_space<vmem>>, %arg20: memref<2x32x128xbf16, #tpu.memory_space<vmem>>, %arg21: memref<2x1x128xf32, #tpu.memory_space<vmem>>, %arg22: memref<2x128x32xbf16, #tpu.memory_space<vmem>>, %arg23: memref<2x1x32xf32, #tpu.memory_space<vmem>>, %arg24: memref<1x32xf32, #tpu.memory_space<vmem>>, %arg25: memref<1x32xf32, #tpu.memory_space<vmem>>, %arg26: memref<32x128xf32, #tpu.memory_space<vmem>>, %arg27: memref<1x128xf32, #tpu.memory_space<vmem>>, %arg28: memref<16x128xf32, #tpu.memory_space<vmem>>) attributes {dimension_semantics = [#tpu.dimension_semantics<arbitrary>], iteration_bounds = array<i64: 1>, scalar_prefetch = 0 : i64, scratch_operands = 0 : i64, tpu.core_type = #tpu.core_type<tc>, window_params = [{pipeline_mode = #tpu.pipeline_mode<synchronous>, transform_indices = @transform_0, window_bounds = array<i64: 8, 32>}, {pipeline_mode = #tpu.pipeline_mode<synchronous>, transform_indices = @transform_1, window_bounds = array<i64: 16, 2>}, {pipeline_mode = #tpu.pipeline_mode<synchronous>, transform_indices = @transform_2, window_bounds = array<i64: 16, 32>}, {pipeline_mode = #tpu.pipeline_mode<synchronous>, transform_indices = @transform_3, window_bounds = array<i64: 2, 32>}, {pipeline_mode = #tpu.pipeline_mode<synchronous>, transform_indices = @transform_4, window_bounds = array<i64: 1, 32>}, {pipeline_mode = #tpu.pipeline_mode<synchronous>, transform_indices = @transform_5, window_bounds = array<i64: 2, 1, 32>}, {pipeline_mode = #tpu.pipeline_mode<synchronous>, transform_indices = @transform_6, window_bounds = array<i64: 2, 1, 32>}, {pipeline_mode = #tpu.pipeline_mode<synchronous>, transform_indices = @transform_7, window_bounds = array<i64: 2, 32, 96>}, {pipeline_mode = #tpu.pipeline_mode<synchronous>, transform_indices = @transform_8, window_bounds = array<i64: 2, 32, 32>}, {pipeline_mode = #tpu.pipeline_mode<synchronous>, transform_indices = @transform_9, window_bounds = array<i64: 2, 1, 32>}, {pipeline_mode = #tpu.pipeline_mode<synchronous>, transform_indices = @transform_10, window_bounds = array<i64: 2, 1, 32>}, {pipeline_mode = #tpu.pipeline_mode<synchronous>, transform_indices = @transform_11, window_bounds = array<i64: 2, 1, 32>}, {pipeline_mode = #tpu.pipeline_mode<synchronous>, transform_indices = @transform_12, window_bounds = array<i64: 2, 32, 32>}, {pipeline_mode = #tpu.pipeline_mode<synchronous>, transform_indices = @transform_13, window_bounds = array<i64: 2, 32, 32>}, {pipeline_mode = #tpu.pipeline_mode<synchronous>, transform_indices = @transform_14, window_bounds = array<i64: 2, 32, 32>}, {pipeline_mode = #tpu.pipeline_mode<synchronous>, transform_indices = @transform_15, window_bounds = array<i64: 2, 32, 32>}, {pipeline_mode = #tpu.pipeline_mode<synchronous>, transform_indices = @transform_16, window_bounds = array<i64: 2, 1, 32>}, {pipeline_mode = #tpu.pipeline_mode<synchronous>, transform_indices = @transform_17, window_bounds = array<i64: 2, 1, 32>}, {pipeline_mode = #tpu.pipeline_mode<synchronous>, transform_indices = @transform_18, window_bounds = array<i64: 2, 1, 32>}, {pipeline_mode = #tpu.pipeline_mode<synchronous>, transform_indices = @transform_19, window_bounds = array<i64: 2, 32, 128>}, {pipeline_mode = #tpu.pipeline_mode<synchronous>, transform_indices = @transform_20, window_bounds = array<i64: 2, 1, 128>}, {pipeline_mode = #tpu.pipeline_mode<synchronous>, transform_indices = @transform_21, window_bounds = array<i64: 2, 128, 32>}, {pipeline_mode = #tpu.pipeline_mode<synchronous>, transform_indices = @transform_22, window_bounds = array<i64: 2, 1, 32>}, {pipeline_mode = #tpu.pipeline_mode<synchronous>, transform_indices = @transform_23, window_bounds = array<i64: 1, 32>}, {pipeline_mode = #tpu.pipeline_mode<synchronous>, transform_indices = @transform_24, window_bounds = array<i64: 1, 32>}, {pipeline_mode = #tpu.pipeline_mode<synchronous>, transform_indices = @transform_25, window_bounds = array<i64: 32, 128>}, {pipeline_mode = #tpu.pipeline_mode<synchronous>, transform_indices = @transform_26, window_bounds = array<i64: 1, 128>}, {pipeline_mode = #tpu.pipeline_mode<synchronous>, transform_indices = @transform_27, window_bounds = array<i64: 16, 128>}]} {
    %c0 = arith.constant 0 : index
    %c0_0 = arith.constant 0 : index
    %0 = vector.load %arg2[%c0, %c0_0] : memref<16x2xf32, #tpu.memory_space<vmem>>, vector<16x2xf32>
    %c0_1 = arith.constant 0 : index
    %c0_2 = arith.constant 0 : index
    %1 = vector.load %arg4[%c0_1, %c0_2] : memref<2x32xf32, #tpu.memory_space<vmem>>, vector<2x32xf32>
    %cst = arith.constant dense<0.000000e+00> : vector<16x32xf32>
    %2 = tpu.matmul %0, %1, %cst {dimension_numbers = #tpu.dot_dimension_numbers<[1], [0], [0], [1], [0, 0, 1, 1], [], []>} : vector<16x2xf32>, vector<2x32xf32>, vector<16x32xf32> -> vector<16x32xf32>
    %c0_3 = arith.constant 0 : index
    %c0_4 = arith.constant 0 : index
    %3 = vector.load %arg5[%c0_3, %c0_4] : memref<1x32xf32, #tpu.memory_space<vmem>>, vector<1x32xf32>
    %4 = vector.broadcast %3 : vector<1x32xf32> to vector<16x32xf32>
    %5 = arith.addf %2, %4 : vector<16x32xf32>
    %6 = vector.shape_cast %5 : vector<16x32xf32> to vector<2x8x32xf32>
    %c0_5 = arith.constant 0 : index
    %c0_6 = arith.constant 0 : index
    %7 = vector.load %arg1[%c0_5, %c0_6] : memref<8x32xf32, #tpu.memory_space<vmem>>, vector<8x32xf32>
    %8 = vector.shape_cast %7 : vector<8x32xf32> to vector<1x8x32xf32>
    %9 = vector.broadcast %8 : vector<1x8x32xf32> to vector<2x8x32xf32>
    %10 = arith.addf %6, %9 : vector<2x8x32xf32>
    %11 = vector.shape_cast %10 : vector<2x8x32xf32> to vector<16x32xf32>
    %c0_7 = arith.constant 0 : index
    %c0_8 = arith.constant 0 : index
    %12 = vector.load %arg3[%c0_7, %c0_8] : memref<16x32xbf16, #tpu.memory_space<vmem>>, vector<16x32xbf16>
    %c0_9 = arith.constant 0 : index
    %c0_10 = arith.constant 0 : index
    %c0_11 = arith.constant 0 : index
    %13 = vector.load %arg6[%c0_9, %c0_10, %c0_11] : memref<2x1x32xf32, #tpu.memory_space<vmem>>, vector<1x1x32xf32>
    %14 = vector.shape_cast %13 : vector<1x1x32xf32> to vector<1x32xf32>
    %c0_12 = arith.constant 0 : index
    %c0_13 = arith.constant 0 : index
    %c0_14 = arith.constant 0 : index
    %15 = vector.load %arg7[%c0_12, %c0_13, %c0_14] : memref<2x1x32xf32, #tpu.memory_space<vmem>>, vector<1x1x32xf32>
    %16 = vector.shape_cast %15 : vector<1x1x32xf32> to vector<1x32xf32>
    %c0_15 = arith.constant 0 : index
    %c0_16 = arith.constant 0 : index
    %c0_17 = arith.constant 0 : index
    %17 = vector.load %arg8[%c0_15, %c0_16, %c0_17] : memref<2x32x96xbf16, #tpu.memory_space<vmem>>, vector<1x32x96xbf16>
    %18 = vector.shape_cast %17 : vector<1x32x96xbf16> to vector<32x96xbf16>
    %c0_18 = arith.constant 0 : index
    %c0_19 = arith.constant 0 : index
    %c0_20 = arith.constant 0 : index
    %19 = vector.load %arg9[%c0_18, %c0_19, %c0_20] : memref<2x32x32xbf16, #tpu.memory_space<vmem>>, vector<1x32x32xbf16>
    %20 = vector.shape_cast %19 : vector<1x32x32xbf16> to vector<32x32xbf16>
    %c0_21 = arith.constant 0 : index
    %c0_22 = arith.constant 0 : index
    %c0_23 = arith.constant 0 : index
    %21 = vector.load %arg10[%c0_21, %c0_22, %c0_23] : memref<2x1x32xf32, #tpu.memory_space<vmem>>, vector<1x1x32xf32>
    %22 = vector.shape_cast %21 : vector<1x1x32xf32> to vector<1x32xf32>
    %c0_24 = arith.constant 0 : index
    %c0_25 = arith.constant 0 : index
    %c0_26 = arith.constant 0 : index
    %23 = vector.load %arg11[%c0_24, %c0_25, %c0_26] : memref<2x1x32xf32, #tpu.memory_space<vmem>>, vector<1x1x32xf32>
    %24 = vector.shape_cast %23 : vector<1x1x32xf32> to vector<1x32xf32>
    %c0_27 = arith.constant 0 : index
    %c0_28 = arith.constant 0 : index
    %c0_29 = arith.constant 0 : index
    %25 = vector.load %arg12[%c0_27, %c0_28, %c0_29] : memref<2x1x32xf32, #tpu.memory_space<vmem>>, vector<1x1x32xf32>
    %26 = vector.shape_cast %25 : vector<1x1x32xf32> to vector<1x32xf32>
    %c0_30 = arith.constant 0 : index
    %c0_31 = arith.constant 0 : index
    %c0_32 = arith.constant 0 : index
    %27 = vector.load %arg13[%c0_30, %c0_31, %c0_32] : memref<2x32x32xbf16, #tpu.memory_space<vmem>>, vector<1x32x32xbf16>
    %28 = vector.shape_cast %27 : vector<1x32x32xbf16> to vector<32x32xbf16>
    %c0_33 = arith.constant 0 : index
    %c0_34 = arith.constant 0 : index
    %c0_35 = arith.constant 0 : index
    %29 = vector.load %arg14[%c0_33, %c0_34, %c0_35] : memref<2x32x32xbf16, #tpu.memory_space<vmem>>, vector<1x32x32xbf16>
    %30 = vector.shape_cast %29 : vector<1x32x32xbf16> to vector<32x32xbf16>
    %c0_36 = arith.constant 0 : index
    %c0_37 = arith.constant 0 : index
    %c0_38 = arith.constant 0 : index
    %31 = vector.load %arg15[%c0_36, %c0_37, %c0_38] : memref<2x32x32xbf16, #tpu.memory_space<vmem>>, vector<1x32x32xbf16>
    %32 = vector.shape_cast %31 : vector<1x32x32xbf16> to vector<32x32xbf16>
    %c0_39 = arith.constant 0 : index
    %c0_40 = arith.constant 0 : index
    %c0_41 = arith.constant 0 : index
    %33 = vector.load %arg16[%c0_39, %c0_40, %c0_41] : memref<2x32x32xbf16, #tpu.memory_space<vmem>>, vector<1x32x32xbf16>
    %34 = vector.shape_cast %33 : vector<1x32x32xbf16> to vector<32x32xbf16>
    %c0_42 = arith.constant 0 : index
    %c0_43 = arith.constant 0 : index
    %c0_44 = arith.constant 0 : index
    %35 = vector.load %arg17[%c0_42, %c0_43, %c0_44] : memref<2x1x32xf32, #tpu.memory_space<vmem>>, vector<1x1x32xf32>
    %36 = vector.shape_cast %35 : vector<1x1x32xf32> to vector<1x32xf32>
    %c0_45 = arith.constant 0 : index
    %c0_46 = arith.constant 0 : index
    %c0_47 = arith.constant 0 : index
    %37 = vector.load %arg18[%c0_45, %c0_46, %c0_47] : memref<2x1x32xf32, #tpu.memory_space<vmem>>, vector<1x1x32xf32>
    %38 = vector.shape_cast %37 : vector<1x1x32xf32> to vector<1x32xf32>
    %c0_48 = arith.constant 0 : index
    %c0_49 = arith.constant 0 : index
    %c0_50 = arith.constant 0 : index
    %39 = vector.load %arg19[%c0_48, %c0_49, %c0_50] : memref<2x1x32xf32, #tpu.memory_space<vmem>>, vector<1x1x32xf32>
    %40 = vector.shape_cast %39 : vector<1x1x32xf32> to vector<1x32xf32>
    %c0_51 = arith.constant 0 : index
    %c0_52 = arith.constant 0 : index
    %c0_53 = arith.constant 0 : index
    %41 = vector.load %arg20[%c0_51, %c0_52, %c0_53] : memref<2x32x128xbf16, #tpu.memory_space<vmem>>, vector<1x32x128xbf16>
    %42 = vector.shape_cast %41 : vector<1x32x128xbf16> to vector<32x128xbf16>
    %c0_54 = arith.constant 0 : index
    %c0_55 = arith.constant 0 : index
    %c0_56 = arith.constant 0 : index
    %43 = vector.load %arg21[%c0_54, %c0_55, %c0_56] : memref<2x1x128xf32, #tpu.memory_space<vmem>>, vector<1x1x128xf32>
    %44 = vector.shape_cast %43 : vector<1x1x128xf32> to vector<1x128xf32>
    %c0_57 = arith.constant 0 : index
    %c0_58 = arith.constant 0 : index
    %c0_59 = arith.constant 0 : index
    %45 = vector.load %arg22[%c0_57, %c0_58, %c0_59] : memref<2x128x32xbf16, #tpu.memory_space<vmem>>, vector<1x128x32xbf16>
    %46 = vector.shape_cast %45 : vector<1x128x32xbf16> to vector<128x32xbf16>
    %c0_60 = arith.constant 0 : index
    %c0_61 = arith.constant 0 : index
    %c0_62 = arith.constant 0 : index
    %47 = vector.load %arg23[%c0_60, %c0_61, %c0_62] : memref<2x1x32xf32, #tpu.memory_space<vmem>>, vector<1x1x32xf32>
    %48 = vector.shape_cast %47 : vector<1x1x32xf32> to vector<1x32xf32>
    %cst_63 = arith.constant dense<0.000000e+00> : vector<16xf32>
    %49 = vector.multi_reduction <add>, %11, %cst_63 [1] : vector<16x32xf32> to vector<16xf32>
    %50 = vector.shape_cast %49 : vector<16xf32> to vector<16x1xf32>
    %cst_64 = arith.constant 3.200000e+01 : f32
    %51 = vector.broadcast %cst_64 : f32 to vector<16x1xf32>
    %52 = arith.divf %50, %51 : vector<16x1xf32>
    %53 = vector.broadcast %52 : vector<16x1xf32> to vector<16x32xf32>
    %54 = arith.subf %11, %53 : vector<16x32xf32>
    %55 = arith.mulf %54, %54 : vector<16x32xf32>
    %cst_65 = arith.constant dense<0.000000e+00> : vector<16xf32>
    %56 = vector.multi_reduction <add>, %55, %cst_65 [1] : vector<16x32xf32> to vector<16xf32>
    %57 = vector.shape_cast %56 : vector<16xf32> to vector<16x1xf32>
    %cst_66 = arith.constant 3.200000e+01 : f32
    %58 = vector.broadcast %cst_66 : f32 to vector<16x1xf32>
    %59 = arith.divf %57, %58 : vector<16x1xf32>
    %60 = vector.broadcast %52 : vector<16x1xf32> to vector<16x32xf32>
    %61 = arith.subf %11, %60 : vector<16x32xf32>
    %cst_67 = arith.constant 9.99999974E-6 : f32
    %62 = vector.broadcast %cst_67 : f32 to vector<16x1xf32>
    %63 = arith.addf %59, %62 : vector<16x1xf32>
    %64 = math.rsqrt %63 : vector<16x1xf32>
    %65 = vector.broadcast %64 : vector<16x1xf32> to vector<16x32xf32>
    %66 = arith.mulf %61, %65 : vector<16x32xf32>
    %67 = vector.broadcast %14 : vector<1x32xf32> to vector<16x32xf32>
    %68 = arith.mulf %66, %67 : vector<16x32xf32>
    %69 = vector.broadcast %16 : vector<1x32xf32> to vector<16x32xf32>
    %70 = arith.addf %68, %69 : vector<16x32xf32>
    %71 = arith.truncf %70 : vector<16x32xf32> to vector<16x32xbf16>
    %cst_68 = arith.constant dense<0.000000e+00> : vector<16x96xf32>
    %72 = tpu.matmul %71, %18, %cst_68 {dimension_numbers = #tpu.dot_dimension_numbers<[1], [0], [0], [1], [0, 0, 1, 1], [], []>} : vector<16x32xbf16>, vector<32x96xbf16>, vector<16x96xf32> -> vector<16x96xf32>
    %73 = vector.extract_strided_slice %72 {offsets = [0, 0], sizes = [16, 32], strides = [1, 1]} : vector<16x96xf32> to vector<16x32xf32>
    %cst_69 = arith.constant 0.353553385 : f32
    %74 = vector.broadcast %cst_69 : f32 to vector<16x32xf32>
    %75 = arith.mulf %73, %74 : vector<16x32xf32>
    %76 = vector.extract_strided_slice %72 {offsets = [0, 32], sizes = [16, 32], strides = [1, 1]} : vector<16x96xf32> to vector<16x32xf32>
    %77 = vector.extract_strided_slice %72 {offsets = [0, 64], sizes = [16, 32], strides = [1, 1]} : vector<16x96xf32> to vector<16x32xf32>
    %78 = vector.shape_cast %75 : vector<16x32xf32> to vector<2x8x32xf32>
    %79 = vector.shape_cast %76 : vector<16x32xf32> to vector<2x8x32xf32>
    %80 = vector.shape_cast %77 : vector<16x32xf32> to vector<2x8x32xf32>
    %81 = vector.extract_strided_slice %78 {offsets = [0, 0, 0], sizes = [2, 8, 8], strides = [1, 1, 1]} : vector<2x8x32xf32> to vector<2x8x8xf32>
    %82 = arith.truncf %81 : vector<2x8x8xf32> to vector<2x8x8xbf16>
    %83 = vector.extract_strided_slice %79 {offsets = [0, 0, 0], sizes = [2, 8, 8], strides = [1, 1, 1]} : vector<2x8x32xf32> to vector<2x8x8xf32>
    %84 = arith.truncf %83 : vector<2x8x8xf32> to vector<2x8x8xbf16>
    %85 = vector.extract_strided_slice %80 {offsets = [0, 0, 0], sizes = [2, 8, 8], strides = [1, 1, 1]} : vector<2x8x32xf32> to vector<2x8x8xf32>
    %86 = arith.truncf %85 : vector<2x8x8xf32> to vector<2x8x8xbf16>
    "tpu.trace_start"() <{level = 10 : i32, message = "btd,bsd->bts"}> : () -> ()
    %cst_70 = arith.constant dense<0.000000e+00> : vector<2x8x8xf32>
    %87 = tpu.matmul %82, %84, %cst_70 {dimension_numbers = #tpu.dot_dimension_numbers<[2], [2], [1], [1], [0, 0, 0, 1, 1, 1], [0], [0]>} : vector<2x8x8xbf16>, vector<2x8x8xbf16>, vector<2x8x8xf32> -> vector<2x8x8xf32>
    "tpu.trace_stop"() : () -> ()
    %cst_71 = arith.constant dense<0xFF800000> : vector<2x8xf32>
    %88 = vector.multi_reduction <maximumf>, %87, %cst_71 [2] : vector<2x8x8xf32> to vector<2x8xf32>
    %89 = vector.shape_cast %88 : vector<2x8xf32> to vector<2x8x1xf32>
    %90 = vector.broadcast %89 : vector<2x8x1xf32> to vector<2x8x8xf32>
    %91 = arith.subf %87, %90 : vector<2x8x8xf32>
    %92 = math.exp %91 : vector<2x8x8xf32>
    %cst_72 = arith.constant dense<0.000000e+00> : vector<2x8xf32>
    %93 = vector.multi_reduction <add>, %92, %cst_72 [2] : vector<2x8x8xf32> to vector<2x8xf32>
    %94 = vector.shape_cast %93 : vector<2x8xf32> to vector<2x8x1xf32>
    %95 = tpu.reciprocal %94 {approx = true} : vector<2x8x1xf32> -> vector<2x8x1xf32>
    %96 = vector.broadcast %95 : vector<2x8x1xf32> to vector<2x8x8xf32>
    %97 = arith.mulf %92, %96 : vector<2x8x8xf32>
    %98 = arith.truncf %97 : vector<2x8x8xf32> to vector<2x8x8xbf16>
    "tpu.trace_start"() <{level = 10 : i32, message = "bts,bsd->btd"}> : () -> ()
    %cst_73 = arith.constant dense<0.000000e+00> : vector<2x8x8xf32>
    %99 = tpu.matmul %98, %86, %cst_73 {dimension_numbers = #tpu.dot_dimension_numbers<[2], [1], [1], [2], [0, 0, 0, 1, 1, 2], [0], [0]>} : vector<2x8x8xbf16>, vector<2x8x8xbf16>, vector<2x8x8xf32> -> vector<2x8x8xf32>
    "tpu.trace_stop"() : () -> ()
    %100 = vector.extract_strided_slice %78 {offsets = [0, 0, 8], sizes = [2, 8, 8], strides = [1, 1, 1]} : vector<2x8x32xf32> to vector<2x8x8xf32>
    %101 = arith.truncf %100 : vector<2x8x8xf32> to vector<2x8x8xbf16>
    %102 = vector.extract_strided_slice %79 {offsets = [0, 0, 8], sizes = [2, 8, 8], strides = [1, 1, 1]} : vector<2x8x32xf32> to vector<2x8x8xf32>
    %103 = arith.truncf %102 : vector<2x8x8xf32> to vector<2x8x8xbf16>
    %104 = vector.extract_strided_slice %80 {offsets = [0, 0, 8], sizes = [2, 8, 8], strides = [1, 1, 1]} : vector<2x8x32xf32> to vector<2x8x8xf32>
    %105 = arith.truncf %104 : vector<2x8x8xf32> to vector<2x8x8xbf16>
    "tpu.trace_start"() <{level = 10 : i32, message = "btd,bsd->bts"}> : () -> ()
    %cst_74 = arith.constant dense<0.000000e+00> : vector<2x8x8xf32>
    %106 = tpu.matmul %101, %103, %cst_74 {dimension_numbers = #tpu.dot_dimension_numbers<[2], [2], [1], [1], [0, 0, 0, 1, 1, 1], [0], [0]>} : vector<2x8x8xbf16>, vector<2x8x8xbf16>, vector<2x8x8xf32> -> vector<2x8x8xf32>
    "tpu.trace_stop"() : () -> ()
    %cst_75 = arith.constant dense<0xFF800000> : vector<2x8xf32>
    %107 = vector.multi_reduction <maximumf>, %106, %cst_75 [2] : vector<2x8x8xf32> to vector<2x8xf32>
    %108 = vector.shape_cast %107 : vector<2x8xf32> to vector<2x8x1xf32>
    %109 = vector.broadcast %108 : vector<2x8x1xf32> to vector<2x8x8xf32>
    %110 = arith.subf %106, %109 : vector<2x8x8xf32>
    %111 = math.exp %110 : vector<2x8x8xf32>
    %cst_76 = arith.constant dense<0.000000e+00> : vector<2x8xf32>
    %112 = vector.multi_reduction <add>, %111, %cst_76 [2] : vector<2x8x8xf32> to vector<2x8xf32>
    %113 = vector.shape_cast %112 : vector<2x8xf32> to vector<2x8x1xf32>
    %114 = tpu.reciprocal %113 {approx = true} : vector<2x8x1xf32> -> vector<2x8x1xf32>
    %115 = vector.broadcast %114 : vector<2x8x1xf32> to vector<2x8x8xf32>
    %116 = arith.mulf %111, %115 : vector<2x8x8xf32>
    %117 = arith.truncf %116 : vector<2x8x8xf32> to vector<2x8x8xbf16>
    "tpu.trace_start"() <{level = 10 : i32, message = "bts,bsd->btd"}> : () -> ()
    %cst_77 = arith.constant dense<0.000000e+00> : vector<2x8x8xf32>
    %118 = tpu.matmul %117, %105, %cst_77 {dimension_numbers = #tpu.dot_dimension_numbers<[2], [1], [1], [2], [0, 0, 0, 1, 1, 2], [0], [0]>} : vector<2x8x8xbf16>, vector<2x8x8xbf16>, vector<2x8x8xf32> -> vector<2x8x8xf32>
    "tpu.trace_stop"() : () -> ()
    %119 = vector.extract_strided_slice %78 {offsets = [0, 0, 16], sizes = [2, 8, 8], strides = [1, 1, 1]} : vector<2x8x32xf32> to vector<2x8x8xf32>
    %120 = arith.truncf %119 : vector<2x8x8xf32> to vector<2x8x8xbf16>
    %121 = vector.extract_strided_slice %79 {offsets = [0, 0, 16], sizes = [2, 8, 8], strides = [1, 1, 1]} : vector<2x8x32xf32> to vector<2x8x8xf32>
    %122 = arith.truncf %121 : vector<2x8x8xf32> to vector<2x8x8xbf16>
    %123 = vector.extract_strided_slice %80 {offsets = [0, 0, 16], sizes = [2, 8, 8], strides = [1, 1, 1]} : vector<2x8x32xf32> to vector<2x8x8xf32>
    %124 = arith.truncf %123 : vector<2x8x8xf32> to vector<2x8x8xbf16>
    "tpu.trace_start"() <{level = 10 : i32, message = "btd,bsd->bts"}> : () -> ()
    %cst_78 = arith.constant dense<0.000000e+00> : vector<2x8x8xf32>
    %125 = tpu.matmul %120, %122, %cst_78 {dimension_numbers = #tpu.dot_dimension_numbers<[2], [2], [1], [1], [0, 0, 0, 1, 1, 1], [0], [0]>} : vector<2x8x8xbf16>, vector<2x8x8xbf16>, vector<2x8x8xf32> -> vector<2x8x8xf32>
    "tpu.trace_stop"() : () -> ()
    %cst_79 = arith.constant dense<0xFF800000> : vector<2x8xf32>
    %126 = vector.multi_reduction <maximumf>, %125, %cst_79 [2] : vector<2x8x8xf32> to vector<2x8xf32>
    %127 = vector.shape_cast %126 : vector<2x8xf32> to vector<2x8x1xf32>
    %128 = vector.broadcast %127 : vector<2x8x1xf32> to vector<2x8x8xf32>
    %129 = arith.subf %125, %128 : vector<2x8x8xf32>
    %130 = math.exp %129 : vector<2x8x8xf32>
    %cst_80 = arith.constant dense<0.000000e+00> : vector<2x8xf32>
    %131 = vector.multi_reduction <add>, %130, %cst_80 [2] : vector<2x8x8xf32> to vector<2x8xf32>
    %132 = vector.shape_cast %131 : vector<2x8xf32> to vector<2x8x1xf32>
    %133 = tpu.reciprocal %132 {approx = true} : vector<2x8x1xf32> -> vector<2x8x1xf32>
    %134 = vector.broadcast %133 : vector<2x8x1xf32> to vector<2x8x8xf32>
    %135 = arith.mulf %130, %134 : vector<2x8x8xf32>
    %136 = arith.truncf %135 : vector<2x8x8xf32> to vector<2x8x8xbf16>
    "tpu.trace_start"() <{level = 10 : i32, message = "bts,bsd->btd"}> : () -> ()
    %cst_81 = arith.constant dense<0.000000e+00> : vector<2x8x8xf32>
    %137 = tpu.matmul %136, %124, %cst_81 {dimension_numbers = #tpu.dot_dimension_numbers<[2], [1], [1], [2], [0, 0, 0, 1, 1, 2], [0], [0]>} : vector<2x8x8xbf16>, vector<2x8x8xbf16>, vector<2x8x8xf32> -> vector<2x8x8xf32>
    "tpu.trace_stop"() : () -> ()
    %138 = vector.extract_strided_slice %78 {offsets = [0, 0, 24], sizes = [2, 8, 8], strides = [1, 1, 1]} : vector<2x8x32xf32> to vector<2x8x8xf32>
    %139 = arith.truncf %138 : vector<2x8x8xf32> to vector<2x8x8xbf16>
    %140 = vector.extract_strided_slice %79 {offsets = [0, 0, 24], sizes = [2, 8, 8], strides = [1, 1, 1]} : vector<2x8x32xf32> to vector<2x8x8xf32>
    %141 = arith.truncf %140 : vector<2x8x8xf32> to vector<2x8x8xbf16>
    %142 = vector.extract_strided_slice %80 {offsets = [0, 0, 24], sizes = [2, 8, 8], strides = [1, 1, 1]} : vector<2x8x32xf32> to vector<2x8x8xf32>
    %143 = arith.truncf %142 : vector<2x8x8xf32> to vector<2x8x8xbf16>
    "tpu.trace_start"() <{level = 10 : i32, message = "btd,bsd->bts"}> : () -> ()
    %cst_82 = arith.constant dense<0.000000e+00> : vector<2x8x8xf32>
    %144 = tpu.matmul %139, %141, %cst_82 {dimension_numbers = #tpu.dot_dimension_numbers<[2], [2], [1], [1], [0, 0, 0, 1, 1, 1], [0], [0]>} : vector<2x8x8xbf16>, vector<2x8x8xbf16>, vector<2x8x8xf32> -> vector<2x8x8xf32>
    "tpu.trace_stop"() : () -> ()
    %cst_83 = arith.constant dense<0xFF800000> : vector<2x8xf32>
    %145 = vector.multi_reduction <maximumf>, %144, %cst_83 [2] : vector<2x8x8xf32> to vector<2x8xf32>
    %146 = vector.shape_cast %145 : vector<2x8xf32> to vector<2x8x1xf32>
    %147 = vector.broadcast %146 : vector<2x8x1xf32> to vector<2x8x8xf32>
    %148 = arith.subf %144, %147 : vector<2x8x8xf32>
    %149 = math.exp %148 : vector<2x8x8xf32>
    %cst_84 = arith.constant dense<0.000000e+00> : vector<2x8xf32>
    %150 = vector.multi_reduction <add>, %149, %cst_84 [2] : vector<2x8x8xf32> to vector<2x8xf32>
    %151 = vector.shape_cast %150 : vector<2x8xf32> to vector<2x8x1xf32>
    %152 = tpu.reciprocal %151 {approx = true} : vector<2x8x1xf32> -> vector<2x8x1xf32>
    %153 = vector.broadcast %152 : vector<2x8x1xf32> to vector<2x8x8xf32>
    %154 = arith.mulf %149, %153 : vector<2x8x8xf32>
    %155 = arith.truncf %154 : vector<2x8x8xf32> to vector<2x8x8xbf16>
    "tpu.trace_start"() <{level = 10 : i32, message = "bts,bsd->btd"}> : () -> ()
    %cst_85 = arith.constant dense<0.000000e+00> : vector<2x8x8xf32>
    %156 = tpu.matmul %155, %143, %cst_85 {dimension_numbers = #tpu.dot_dimension_numbers<[2], [1], [1], [2], [0, 0, 0, 1, 1, 2], [0], [0]>} : vector<2x8x8xbf16>, vector<2x8x8xbf16>, vector<2x8x8xf32> -> vector<2x8x8xf32>
    "tpu.trace_stop"() : () -> ()
    %157 = tpu.concatenate %99, %118, %137, %156 in 2 : vector<2x8x8xf32>, vector<2x8x8xf32>, vector<2x8x8xf32>, vector<2x8x8xf32> -> vector<2x8x32xf32>
    %158 = vector.shape_cast %157 : vector<2x8x32xf32> to vector<16x32xf32>
    %159 = arith.truncf %158 : vector<16x32xf32> to vector<16x32xbf16>
    %cst_86 = arith.constant dense<0.000000e+00> : vector<16x32xf32>
    %160 = tpu.matmul %159, %20, %cst_86 {dimension_numbers = #tpu.dot_dimension_numbers<[1], [0], [0], [1], [0, 0, 1, 1], [], []>} : vector<16x32xbf16>, vector<32x32xbf16>, vector<16x32xf32> -> vector<16x32xf32>
    %161 = arith.addf %11, %160 : vector<16x32xf32>
    %162 = vector.broadcast %22 : vector<1x32xf32> to vector<16x32xf32>
    %163 = arith.addf %161, %162 : vector<16x32xf32>
    %cst_87 = arith.constant dense<0.000000e+00> : vector<16xf32>
    %164 = vector.multi_reduction <add>, %163, %cst_87 [1] : vector<16x32xf32> to vector<16xf32>
    %165 = vector.shape_cast %164 : vector<16xf32> to vector<16x1xf32>
    %cst_88 = arith.constant 3.200000e+01 : f32
    %166 = vector.broadcast %cst_88 : f32 to vector<16x1xf32>
    %167 = arith.divf %165, %166 : vector<16x1xf32>
    %168 = vector.broadcast %167 : vector<16x1xf32> to vector<16x32xf32>
    %169 = arith.subf %163, %168 : vector<16x32xf32>
    %170 = arith.mulf %169, %169 : vector<16x32xf32>
    %cst_89 = arith.constant dense<0.000000e+00> : vector<16xf32>
    %171 = vector.multi_reduction <add>, %170, %cst_89 [1] : vector<16x32xf32> to vector<16xf32>
    %172 = vector.shape_cast %171 : vector<16xf32> to vector<16x1xf32>
    %cst_90 = arith.constant 3.200000e+01 : f32
    %173 = vector.broadcast %cst_90 : f32 to vector<16x1xf32>
    %174 = arith.divf %172, %173 : vector<16x1xf32>
    %175 = vector.broadcast %167 : vector<16x1xf32> to vector<16x32xf32>
    %176 = arith.subf %163, %175 : vector<16x32xf32>
    %cst_91 = arith.constant 9.99999974E-6 : f32
    %177 = vector.broadcast %cst_91 : f32 to vector<16x1xf32>
    %178 = arith.addf %174, %177 : vector<16x1xf32>
    %179 = math.rsqrt %178 : vector<16x1xf32>
    %180 = vector.broadcast %179 : vector<16x1xf32> to vector<16x32xf32>
    %181 = arith.mulf %176, %180 : vector<16x32xf32>
    %182 = vector.broadcast %24 : vector<1x32xf32> to vector<16x32xf32>
    %183 = arith.mulf %181, %182 : vector<16x32xf32>
    %184 = vector.broadcast %26 : vector<1x32xf32> to vector<16x32xf32>
    %185 = arith.addf %183, %184 : vector<16x32xf32>
    %186 = arith.truncf %185 : vector<16x32xf32> to vector<16x32xbf16>
    %cst_92 = arith.constant dense<0.000000e+00> : vector<16x32xf32>
    %187 = tpu.matmul %186, %28, %cst_92 {dimension_numbers = #tpu.dot_dimension_numbers<[1], [0], [0], [1], [0, 0, 1, 1], [], []>} : vector<16x32xbf16>, vector<32x32xbf16>, vector<16x32xf32> -> vector<16x32xf32>
    %cst_93 = arith.constant 0.353553385 : f32
    %188 = vector.broadcast %cst_93 : f32 to vector<16x32xf32>
    %189 = arith.mulf %187, %188 : vector<16x32xf32>
    %cst_94 = arith.constant dense<0.000000e+00> : vector<16x32xf32>
    %190 = tpu.matmul %12, %30, %cst_94 {dimension_numbers = #tpu.dot_dimension_numbers<[1], [0], [0], [1], [0, 0, 1, 1], [], []>} : vector<16x32xbf16>, vector<32x32xbf16>, vector<16x32xf32> -> vector<16x32xf32>
    %cst_95 = arith.constant dense<0.000000e+00> : vector<16x32xf32>
    %191 = tpu.matmul %12, %32, %cst_95 {dimension_numbers = #tpu.dot_dimension_numbers<[1], [0], [0], [1], [0, 0, 1, 1], [], []>} : vector<16x32xbf16>, vector<32x32xbf16>, vector<16x32xf32> -> vector<16x32xf32>
    %192 = vector.shape_cast %189 : vector<16x32xf32> to vector<2x8x32xf32>
    %193 = vector.shape_cast %190 : vector<16x32xf32> to vector<2x8x32xf32>
    %194 = vector.shape_cast %191 : vector<16x32xf32> to vector<2x8x32xf32>
    %195 = vector.extract_strided_slice %192 {offsets = [0, 0, 0], sizes = [2, 8, 8], strides = [1, 1, 1]} : vector<2x8x32xf32> to vector<2x8x8xf32>
    %196 = arith.truncf %195 : vector<2x8x8xf32> to vector<2x8x8xbf16>
    %197 = vector.extract_strided_slice %193 {offsets = [0, 0, 0], sizes = [2, 8, 8], strides = [1, 1, 1]} : vector<2x8x32xf32> to vector<2x8x8xf32>
    %198 = arith.truncf %197 : vector<2x8x8xf32> to vector<2x8x8xbf16>
    %199 = vector.extract_strided_slice %194 {offsets = [0, 0, 0], sizes = [2, 8, 8], strides = [1, 1, 1]} : vector<2x8x32xf32> to vector<2x8x8xf32>
    %200 = arith.truncf %199 : vector<2x8x8xf32> to vector<2x8x8xbf16>
    "tpu.trace_start"() <{level = 10 : i32, message = "btd,bsd->bts"}> : () -> ()
    %cst_96 = arith.constant dense<0.000000e+00> : vector<2x8x8xf32>
    %201 = tpu.matmul %196, %198, %cst_96 {dimension_numbers = #tpu.dot_dimension_numbers<[2], [2], [1], [1], [0, 0, 0, 1, 1, 1], [0], [0]>} : vector<2x8x8xbf16>, vector<2x8x8xbf16>, vector<2x8x8xf32> -> vector<2x8x8xf32>
    "tpu.trace_stop"() : () -> ()
    %cst_97 = arith.constant dense<0xFF800000> : vector<2x8xf32>
    %202 = vector.multi_reduction <maximumf>, %201, %cst_97 [2] : vector<2x8x8xf32> to vector<2x8xf32>
    %203 = vector.shape_cast %202 : vector<2x8xf32> to vector<2x8x1xf32>
    %204 = vector.broadcast %203 : vector<2x8x1xf32> to vector<2x8x8xf32>
    %205 = arith.subf %201, %204 : vector<2x8x8xf32>
    %206 = math.exp %205 : vector<2x8x8xf32>
    %cst_98 = arith.constant dense<0.000000e+00> : vector<2x8xf32>
    %207 = vector.multi_reduction <add>, %206, %cst_98 [2] : vector<2x8x8xf32> to vector<2x8xf32>
    %208 = vector.shape_cast %207 : vector<2x8xf32> to vector<2x8x1xf32>
    %209 = tpu.reciprocal %208 {approx = true} : vector<2x8x1xf32> -> vector<2x8x1xf32>
    %210 = vector.broadcast %209 : vector<2x8x1xf32> to vector<2x8x8xf32>
    %211 = arith.mulf %206, %210 : vector<2x8x8xf32>
    %212 = arith.truncf %211 : vector<2x8x8xf32> to vector<2x8x8xbf16>
    "tpu.trace_start"() <{level = 10 : i32, message = "bts,bsd->btd"}> : () -> ()
    %cst_99 = arith.constant dense<0.000000e+00> : vector<2x8x8xf32>
    %213 = tpu.matmul %212, %200, %cst_99 {dimension_numbers = #tpu.dot_dimension_numbers<[2], [1], [1], [2], [0, 0, 0, 1, 1, 2], [0], [0]>} : vector<2x8x8xbf16>, vector<2x8x8xbf16>, vector<2x8x8xf32> -> vector<2x8x8xf32>
    "tpu.trace_stop"() : () -> ()
    %214 = vector.extract_strided_slice %192 {offsets = [0, 0, 8], sizes = [2, 8, 8], strides = [1, 1, 1]} : vector<2x8x32xf32> to vector<2x8x8xf32>
    %215 = arith.truncf %214 : vector<2x8x8xf32> to vector<2x8x8xbf16>
    %216 = vector.extract_strided_slice %193 {offsets = [0, 0, 8], sizes = [2, 8, 8], strides = [1, 1, 1]} : vector<2x8x32xf32> to vector<2x8x8xf32>
    %217 = arith.truncf %216 : vector<2x8x8xf32> to vector<2x8x8xbf16>
    %218 = vector.extract_strided_slice %194 {offsets = [0, 0, 8], sizes = [2, 8, 8], strides = [1, 1, 1]} : vector<2x8x32xf32> to vector<2x8x8xf32>
    %219 = arith.truncf %218 : vector<2x8x8xf32> to vector<2x8x8xbf16>
    "tpu.trace_start"() <{level = 10 : i32, message = "btd,bsd->bts"}> : () -> ()
    %cst_100 = arith.constant dense<0.000000e+00> : vector<2x8x8xf32>
    %220 = tpu.matmul %215, %217, %cst_100 {dimension_numbers = #tpu.dot_dimension_numbers<[2], [2], [1], [1], [0, 0, 0, 1, 1, 1], [0], [0]>} : vector<2x8x8xbf16>, vector<2x8x8xbf16>, vector<2x8x8xf32> -> vector<2x8x8xf32>
    "tpu.trace_stop"() : () -> ()
    %cst_101 = arith.constant dense<0xFF800000> : vector<2x8xf32>
    %221 = vector.multi_reduction <maximumf>, %220, %cst_101 [2] : vector<2x8x8xf32> to vector<2x8xf32>
    %222 = vector.shape_cast %221 : vector<2x8xf32> to vector<2x8x1xf32>
    %223 = vector.broadcast %222 : vector<2x8x1xf32> to vector<2x8x8xf32>
    %224 = arith.subf %220, %223 : vector<2x8x8xf32>
    %225 = math.exp %224 : vector<2x8x8xf32>
    %cst_102 = arith.constant dense<0.000000e+00> : vector<2x8xf32>
    %226 = vector.multi_reduction <add>, %225, %cst_102 [2] : vector<2x8x8xf32> to vector<2x8xf32>
    %227 = vector.shape_cast %226 : vector<2x8xf32> to vector<2x8x1xf32>
    %228 = tpu.reciprocal %227 {approx = true} : vector<2x8x1xf32> -> vector<2x8x1xf32>
    %229 = vector.broadcast %228 : vector<2x8x1xf32> to vector<2x8x8xf32>
    %230 = arith.mulf %225, %229 : vector<2x8x8xf32>
    %231 = arith.truncf %230 : vector<2x8x8xf32> to vector<2x8x8xbf16>
    "tpu.trace_start"() <{level = 10 : i32, message = "bts,bsd->btd"}> : () -> ()
    %cst_103 = arith.constant dense<0.000000e+00> : vector<2x8x8xf32>
    %232 = tpu.matmul %231, %219, %cst_103 {dimension_numbers = #tpu.dot_dimension_numbers<[2], [1], [1], [2], [0, 0, 0, 1, 1, 2], [0], [0]>} : vector<2x8x8xbf16>, vector<2x8x8xbf16>, vector<2x8x8xf32> -> vector<2x8x8xf32>
    "tpu.trace_stop"() : () -> ()
    %233 = vector.extract_strided_slice %192 {offsets = [0, 0, 16], sizes = [2, 8, 8], strides = [1, 1, 1]} : vector<2x8x32xf32> to vector<2x8x8xf32>
    %234 = arith.truncf %233 : vector<2x8x8xf32> to vector<2x8x8xbf16>
    %235 = vector.extract_strided_slice %193 {offsets = [0, 0, 16], sizes = [2, 8, 8], strides = [1, 1, 1]} : vector<2x8x32xf32> to vector<2x8x8xf32>
    %236 = arith.truncf %235 : vector<2x8x8xf32> to vector<2x8x8xbf16>
    %237 = vector.extract_strided_slice %194 {offsets = [0, 0, 16], sizes = [2, 8, 8], strides = [1, 1, 1]} : vector<2x8x32xf32> to vector<2x8x8xf32>
    %238 = arith.truncf %237 : vector<2x8x8xf32> to vector<2x8x8xbf16>
    "tpu.trace_start"() <{level = 10 : i32, message = "btd,bsd->bts"}> : () -> ()
    %cst_104 = arith.constant dense<0.000000e+00> : vector<2x8x8xf32>
    %239 = tpu.matmul %234, %236, %cst_104 {dimension_numbers = #tpu.dot_dimension_numbers<[2], [2], [1], [1], [0, 0, 0, 1, 1, 1], [0], [0]>} : vector<2x8x8xbf16>, vector<2x8x8xbf16>, vector<2x8x8xf32> -> vector<2x8x8xf32>
    "tpu.trace_stop"() : () -> ()
    %cst_105 = arith.constant dense<0xFF800000> : vector<2x8xf32>
    %240 = vector.multi_reduction <maximumf>, %239, %cst_105 [2] : vector<2x8x8xf32> to vector<2x8xf32>
    %241 = vector.shape_cast %240 : vector<2x8xf32> to vector<2x8x1xf32>
    %242 = vector.broadcast %241 : vector<2x8x1xf32> to vector<2x8x8xf32>
    %243 = arith.subf %239, %242 : vector<2x8x8xf32>
    %244 = math.exp %243 : vector<2x8x8xf32>
    %cst_106 = arith.constant dense<0.000000e+00> : vector<2x8xf32>
    %245 = vector.multi_reduction <add>, %244, %cst_106 [2] : vector<2x8x8xf32> to vector<2x8xf32>
    %246 = vector.shape_cast %245 : vector<2x8xf32> to vector<2x8x1xf32>
    %247 = tpu.reciprocal %246 {approx = true} : vector<2x8x1xf32> -> vector<2x8x1xf32>
    %248 = vector.broadcast %247 : vector<2x8x1xf32> to vector<2x8x8xf32>
    %249 = arith.mulf %244, %248 : vector<2x8x8xf32>
    %250 = arith.truncf %249 : vector<2x8x8xf32> to vector<2x8x8xbf16>
    "tpu.trace_start"() <{level = 10 : i32, message = "bts,bsd->btd"}> : () -> ()
    %cst_107 = arith.constant dense<0.000000e+00> : vector<2x8x8xf32>
    %251 = tpu.matmul %250, %238, %cst_107 {dimension_numbers = #tpu.dot_dimension_numbers<[2], [1], [1], [2], [0, 0, 0, 1, 1, 2], [0], [0]>} : vector<2x8x8xbf16>, vector<2x8x8xbf16>, vector<2x8x8xf32> -> vector<2x8x8xf32>
    "tpu.trace_stop"() : () -> ()
    %252 = vector.extract_strided_slice %192 {offsets = [0, 0, 24], sizes = [2, 8, 8], strides = [1, 1, 1]} : vector<2x8x32xf32> to vector<2x8x8xf32>
    %253 = arith.truncf %252 : vector<2x8x8xf32> to vector<2x8x8xbf16>
    %254 = vector.extract_strided_slice %193 {offsets = [0, 0, 24], sizes = [2, 8, 8], strides = [1, 1, 1]} : vector<2x8x32xf32> to vector<2x8x8xf32>
    %255 = arith.truncf %254 : vector<2x8x8xf32> to vector<2x8x8xbf16>
    %256 = vector.extract_strided_slice %194 {offsets = [0, 0, 24], sizes = [2, 8, 8], strides = [1, 1, 1]} : vector<2x8x32xf32> to vector<2x8x8xf32>
    %257 = arith.truncf %256 : vector<2x8x8xf32> to vector<2x8x8xbf16>
    "tpu.trace_start"() <{level = 10 : i32, message = "btd,bsd->bts"}> : () -> ()
    %cst_108 = arith.constant dense<0.000000e+00> : vector<2x8x8xf32>
    %258 = tpu.matmul %253, %255, %cst_108 {dimension_numbers = #tpu.dot_dimension_numbers<[2], [2], [1], [1], [0, 0, 0, 1, 1, 1], [0], [0]>} : vector<2x8x8xbf16>, vector<2x8x8xbf16>, vector<2x8x8xf32> -> vector<2x8x8xf32>
    "tpu.trace_stop"() : () -> ()
    %cst_109 = arith.constant dense<0xFF800000> : vector<2x8xf32>
    %259 = vector.multi_reduction <maximumf>, %258, %cst_109 [2] : vector<2x8x8xf32> to vector<2x8xf32>
    %260 = vector.shape_cast %259 : vector<2x8xf32> to vector<2x8x1xf32>
    %261 = vector.broadcast %260 : vector<2x8x1xf32> to vector<2x8x8xf32>
    %262 = arith.subf %258, %261 : vector<2x8x8xf32>
    %263 = math.exp %262 : vector<2x8x8xf32>
    %cst_110 = arith.constant dense<0.000000e+00> : vector<2x8xf32>
    %264 = vector.multi_reduction <add>, %263, %cst_110 [2] : vector<2x8x8xf32> to vector<2x8xf32>
    %265 = vector.shape_cast %264 : vector<2x8xf32> to vector<2x8x1xf32>
    %266 = tpu.reciprocal %265 {approx = true} : vector<2x8x1xf32> -> vector<2x8x1xf32>
    %267 = vector.broadcast %266 : vector<2x8x1xf32> to vector<2x8x8xf32>
    %268 = arith.mulf %263, %267 : vector<2x8x8xf32>
    %269 = arith.truncf %268 : vector<2x8x8xf32> to vector<2x8x8xbf16>
    "tpu.trace_start"() <{level = 10 : i32, message = "bts,bsd->btd"}> : () -> ()
    %cst_111 = arith.constant dense<0.000000e+00> : vector<2x8x8xf32>
    %270 = tpu.matmul %269, %257, %cst_111 {dimension_numbers = #tpu.dot_dimension_numbers<[2], [1], [1], [2], [0, 0, 0, 1, 1, 2], [0], [0]>} : vector<2x8x8xbf16>, vector<2x8x8xbf16>, vector<2x8x8xf32> -> vector<2x8x8xf32>
    "tpu.trace_stop"() : () -> ()
    %271 = tpu.concatenate %213, %232, %251, %270 in 2 : vector<2x8x8xf32>, vector<2x8x8xf32>, vector<2x8x8xf32>, vector<2x8x8xf32> -> vector<2x8x32xf32>
    %272 = vector.shape_cast %271 : vector<2x8x32xf32> to vector<16x32xf32>
    %273 = arith.truncf %272 : vector<16x32xf32> to vector<16x32xbf16>
    %cst_112 = arith.constant dense<0.000000e+00> : vector<16x32xf32>
    %274 = tpu.matmul %273, %34, %cst_112 {dimension_numbers = #tpu.dot_dimension_numbers<[1], [0], [0], [1], [0, 0, 1, 1], [], []>} : vector<16x32xbf16>, vector<32x32xbf16>, vector<16x32xf32> -> vector<16x32xf32>
    %275 = arith.addf %163, %274 : vector<16x32xf32>
    %276 = vector.broadcast %36 : vector<1x32xf32> to vector<16x32xf32>
    %277 = arith.addf %275, %276 : vector<16x32xf32>
    %cst_113 = arith.constant dense<0.000000e+00> : vector<16xf32>
    %278 = vector.multi_reduction <add>, %277, %cst_113 [1] : vector<16x32xf32> to vector<16xf32>
    %279 = vector.shape_cast %278 : vector<16xf32> to vector<16x1xf32>
    %cst_114 = arith.constant 3.200000e+01 : f32
    %280 = vector.broadcast %cst_114 : f32 to vector<16x1xf32>
    %281 = arith.divf %279, %280 : vector<16x1xf32>
    %282 = vector.broadcast %281 : vector<16x1xf32> to vector<16x32xf32>
    %283 = arith.subf %277, %282 : vector<16x32xf32>
    %284 = arith.mulf %283, %283 : vector<16x32xf32>
    %cst_115 = arith.constant dense<0.000000e+00> : vector<16xf32>
    %285 = vector.multi_reduction <add>, %284, %cst_115 [1] : vector<16x32xf32> to vector<16xf32>
    %286 = vector.shape_cast %285 : vector<16xf32> to vector<16x1xf32>
    %cst_116 = arith.constant 3.200000e+01 : f32
    %287 = vector.broadcast %cst_116 : f32 to vector<16x1xf32>
    %288 = arith.divf %286, %287 : vector<16x1xf32>
    %289 = vector.broadcast %281 : vector<16x1xf32> to vector<16x32xf32>
    %290 = arith.subf %277, %289 : vector<16x32xf32>
    %cst_117 = arith.constant 9.99999974E-6 : f32
    %291 = vector.broadcast %cst_117 : f32 to vector<16x1xf32>
    %292 = arith.addf %288, %291 : vector<16x1xf32>
    %293 = math.rsqrt %292 : vector<16x1xf32>
    %294 = vector.broadcast %293 : vector<16x1xf32> to vector<16x32xf32>
    %295 = arith.mulf %290, %294 : vector<16x32xf32>
    %296 = vector.broadcast %38 : vector<1x32xf32> to vector<16x32xf32>
    %297 = arith.mulf %295, %296 : vector<16x32xf32>
    %298 = vector.broadcast %40 : vector<1x32xf32> to vector<16x32xf32>
    %299 = arith.addf %297, %298 : vector<16x32xf32>
    %300 = arith.truncf %299 : vector<16x32xf32> to vector<16x32xbf16>
    %cst_118 = arith.constant dense<0.000000e+00> : vector<16x128xf32>
    %301 = tpu.matmul %300, %42, %cst_118 {dimension_numbers = #tpu.dot_dimension_numbers<[1], [0], [0], [1], [0, 0, 1, 1], [], []>} : vector<16x32xbf16>, vector<32x128xbf16>, vector<16x128xf32> -> vector<16x128xf32>
    %302 = vector.broadcast %44 : vector<1x128xf32> to vector<16x128xf32>
    %303 = arith.addf %301, %302 : vector<16x128xf32>
    %cst_119 = arith.constant 5.000000e-01 : f32
    %304 = vector.broadcast %cst_119 : f32 to vector<16x128xf32>
    %305 = arith.mulf %304, %303 : vector<16x128xf32>
    %cst_120 = arith.constant 0.707106769 : f32
    %306 = vector.broadcast %cst_120 : f32 to vector<16x128xf32>
    %307 = arith.mulf %303, %306 : vector<16x128xf32>
    %308 = math.erf %307 : vector<16x128xf32>
    %cst_121 = arith.constant 1.000000e+00 : f32
    %309 = vector.broadcast %cst_121 : f32 to vector<16x128xf32>
    %310 = arith.addf %309, %308 : vector<16x128xf32>
    %311 = arith.mulf %305, %310 : vector<16x128xf32>
    %312 = arith.truncf %311 : vector<16x128xf32> to vector<16x128xbf16>
    %cst_122 = arith.constant dense<0.000000e+00> : vector<16x32xf32>
    %313 = tpu.matmul %312, %46, %cst_122 {dimension_numbers = #tpu.dot_dimension_numbers<[1], [0], [0], [1], [0, 0, 1, 1], [], []>} : vector<16x128xbf16>, vector<128x32xbf16>, vector<16x32xf32> -> vector<16x32xf32>
    %314 = arith.addf %277, %313 : vector<16x32xf32>
    %315 = vector.broadcast %48 : vector<1x32xf32> to vector<16x32xf32>
    %316 = arith.addf %314, %315 : vector<16x32xf32>
    %c1 = arith.constant 1 : index
    %c0_123 = arith.constant 0 : index
    %c0_124 = arith.constant 0 : index
    %317 = vector.load %arg6[%c1, %c0_123, %c0_124] : memref<2x1x32xf32, #tpu.memory_space<vmem>>, vector<1x1x32xf32>
    %318 = vector.shape_cast %317 : vector<1x1x32xf32> to vector<1x32xf32>
    %c1_125 = arith.constant 1 : index
    %c0_126 = arith.constant 0 : index
    %c0_127 = arith.constant 0 : index
    %319 = vector.load %arg7[%c1_125, %c0_126, %c0_127] : memref<2x1x32xf32, #tpu.memory_space<vmem>>, vector<1x1x32xf32>
    %320 = vector.shape_cast %319 : vector<1x1x32xf32> to vector<1x32xf32>
    %c1_128 = arith.constant 1 : index
    %c0_129 = arith.constant 0 : index
    %c0_130 = arith.constant 0 : index
    %321 = vector.load %arg8[%c1_128, %c0_129, %c0_130] : memref<2x32x96xbf16, #tpu.memory_space<vmem>>, vector<1x32x96xbf16>
    %322 = vector.shape_cast %321 : vector<1x32x96xbf16> to vector<32x96xbf16>
    %c1_131 = arith.constant 1 : index
    %c0_132 = arith.constant 0 : index
    %c0_133 = arith.constant 0 : index
    %323 = vector.load %arg9[%c1_131, %c0_132, %c0_133] : memref<2x32x32xbf16, #tpu.memory_space<vmem>>, vector<1x32x32xbf16>
    %324 = vector.shape_cast %323 : vector<1x32x32xbf16> to vector<32x32xbf16>
    %c1_134 = arith.constant 1 : index
    %c0_135 = arith.constant 0 : index
    %c0_136 = arith.constant 0 : index
    %325 = vector.load %arg10[%c1_134, %c0_135, %c0_136] : memref<2x1x32xf32, #tpu.memory_space<vmem>>, vector<1x1x32xf32>
    %326 = vector.shape_cast %325 : vector<1x1x32xf32> to vector<1x32xf32>
    %c1_137 = arith.constant 1 : index
    %c0_138 = arith.constant 0 : index
    %c0_139 = arith.constant 0 : index
    %327 = vector.load %arg11[%c1_137, %c0_138, %c0_139] : memref<2x1x32xf32, #tpu.memory_space<vmem>>, vector<1x1x32xf32>
    %328 = vector.shape_cast %327 : vector<1x1x32xf32> to vector<1x32xf32>
    %c1_140 = arith.constant 1 : index
    %c0_141 = arith.constant 0 : index
    %c0_142 = arith.constant 0 : index
    %329 = vector.load %arg12[%c1_140, %c0_141, %c0_142] : memref<2x1x32xf32, #tpu.memory_space<vmem>>, vector<1x1x32xf32>
    %330 = vector.shape_cast %329 : vector<1x1x32xf32> to vector<1x32xf32>
    %c1_143 = arith.constant 1 : index
    %c0_144 = arith.constant 0 : index
    %c0_145 = arith.constant 0 : index
    %331 = vector.load %arg13[%c1_143, %c0_144, %c0_145] : memref<2x32x32xbf16, #tpu.memory_space<vmem>>, vector<1x32x32xbf16>
    %332 = vector.shape_cast %331 : vector<1x32x32xbf16> to vector<32x32xbf16>
    %c1_146 = arith.constant 1 : index
    %c0_147 = arith.constant 0 : index
    %c0_148 = arith.constant 0 : index
    %333 = vector.load %arg14[%c1_146, %c0_147, %c0_148] : memref<2x32x32xbf16, #tpu.memory_space<vmem>>, vector<1x32x32xbf16>
    %334 = vector.shape_cast %333 : vector<1x32x32xbf16> to vector<32x32xbf16>
    %c1_149 = arith.constant 1 : index
    %c0_150 = arith.constant 0 : index
    %c0_151 = arith.constant 0 : index
    %335 = vector.load %arg15[%c1_149, %c0_150, %c0_151] : memref<2x32x32xbf16, #tpu.memory_space<vmem>>, vector<1x32x32xbf16>
    %336 = vector.shape_cast %335 : vector<1x32x32xbf16> to vector<32x32xbf16>
    %c1_152 = arith.constant 1 : index
    %c0_153 = arith.constant 0 : index
    %c0_154 = arith.constant 0 : index
    %337 = vector.load %arg16[%c1_152, %c0_153, %c0_154] : memref<2x32x32xbf16, #tpu.memory_space<vmem>>, vector<1x32x32xbf16>
    %338 = vector.shape_cast %337 : vector<1x32x32xbf16> to vector<32x32xbf16>
    %c1_155 = arith.constant 1 : index
    %c0_156 = arith.constant 0 : index
    %c0_157 = arith.constant 0 : index
    %339 = vector.load %arg17[%c1_155, %c0_156, %c0_157] : memref<2x1x32xf32, #tpu.memory_space<vmem>>, vector<1x1x32xf32>
    %340 = vector.shape_cast %339 : vector<1x1x32xf32> to vector<1x32xf32>
    %c1_158 = arith.constant 1 : index
    %c0_159 = arith.constant 0 : index
    %c0_160 = arith.constant 0 : index
    %341 = vector.load %arg18[%c1_158, %c0_159, %c0_160] : memref<2x1x32xf32, #tpu.memory_space<vmem>>, vector<1x1x32xf32>
    %342 = vector.shape_cast %341 : vector<1x1x32xf32> to vector<1x32xf32>
    %c1_161 = arith.constant 1 : index
    %c0_162 = arith.constant 0 : index
    %c0_163 = arith.constant 0 : index
    %343 = vector.load %arg19[%c1_161, %c0_162, %c0_163] : memref<2x1x32xf32, #tpu.memory_space<vmem>>, vector<1x1x32xf32>
    %344 = vector.shape_cast %343 : vector<1x1x32xf32> to vector<1x32xf32>
    %c1_164 = arith.constant 1 : index
    %c0_165 = arith.constant 0 : index
    %c0_166 = arith.constant 0 : index
    %345 = vector.load %arg20[%c1_164, %c0_165, %c0_166] : memref<2x32x128xbf16, #tpu.memory_space<vmem>>, vector<1x32x128xbf16>
    %346 = vector.shape_cast %345 : vector<1x32x128xbf16> to vector<32x128xbf16>
    %c1_167 = arith.constant 1 : index
    %c0_168 = arith.constant 0 : index
    %c0_169 = arith.constant 0 : index
    %347 = vector.load %arg21[%c1_167, %c0_168, %c0_169] : memref<2x1x128xf32, #tpu.memory_space<vmem>>, vector<1x1x128xf32>
    %348 = vector.shape_cast %347 : vector<1x1x128xf32> to vector<1x128xf32>
    %c1_170 = arith.constant 1 : index
    %c0_171 = arith.constant 0 : index
    %c0_172 = arith.constant 0 : index
    %349 = vector.load %arg22[%c1_170, %c0_171, %c0_172] : memref<2x128x32xbf16, #tpu.memory_space<vmem>>, vector<1x128x32xbf16>
    %350 = vector.shape_cast %349 : vector<1x128x32xbf16> to vector<128x32xbf16>
    %c1_173 = arith.constant 1 : index
    %c0_174 = arith.constant 0 : index
    %c0_175 = arith.constant 0 : index
    %351 = vector.load %arg23[%c1_173, %c0_174, %c0_175] : memref<2x1x32xf32, #tpu.memory_space<vmem>>, vector<1x1x32xf32>
    %352 = vector.shape_cast %351 : vector<1x1x32xf32> to vector<1x32xf32>
    %cst_176 = arith.constant dense<0.000000e+00> : vector<16xf32>
    %353 = vector.multi_reduction <add>, %316, %cst_176 [1] : vector<16x32xf32> to vector<16xf32>
    %354 = vector.shape_cast %353 : vector<16xf32> to vector<16x1xf32>
    %cst_177 = arith.constant 3.200000e+01 : f32
    %355 = vector.broadcast %cst_177 : f32 to vector<16x1xf32>
    %356 = arith.divf %354, %355 : vector<16x1xf32>
    %357 = vector.broadcast %356 : vector<16x1xf32> to vector<16x32xf32>
    %358 = arith.subf %316, %357 : vector<16x32xf32>
    %359 = arith.mulf %358, %358 : vector<16x32xf32>
    %cst_178 = arith.constant dense<0.000000e+00> : vector<16xf32>
    %360 = vector.multi_reduction <add>, %359, %cst_178 [1] : vector<16x32xf32> to vector<16xf32>
    %361 = vector.shape_cast %360 : vector<16xf32> to vector<16x1xf32>
    %cst_179 = arith.constant 3.200000e+01 : f32
    %362 = vector.broadcast %cst_179 : f32 to vector<16x1xf32>
    %363 = arith.divf %361, %362 : vector<16x1xf32>
    %364 = vector.broadcast %356 : vector<16x1xf32> to vector<16x32xf32>
    %365 = arith.subf %316, %364 : vector<16x32xf32>
    %cst_180 = arith.constant 9.99999974E-6 : f32
    %366 = vector.broadcast %cst_180 : f32 to vector<16x1xf32>
    %367 = arith.addf %363, %366 : vector<16x1xf32>
    %368 = math.rsqrt %367 : vector<16x1xf32>
    %369 = vector.broadcast %368 : vector<16x1xf32> to vector<16x32xf32>
    %370 = arith.mulf %365, %369 : vector<16x32xf32>
    %371 = vector.broadcast %318 : vector<1x32xf32> to vector<16x32xf32>
    %372 = arith.mulf %370, %371 : vector<16x32xf32>
    %373 = vector.broadcast %320 : vector<1x32xf32> to vector<16x32xf32>
    %374 = arith.addf %372, %373 : vector<16x32xf32>
    %375 = arith.truncf %374 : vector<16x32xf32> to vector<16x32xbf16>
    %cst_181 = arith.constant dense<0.000000e+00> : vector<16x96xf32>
    %376 = tpu.matmul %375, %322, %cst_181 {dimension_numbers = #tpu.dot_dimension_numbers<[1], [0], [0], [1], [0, 0, 1, 1], [], []>} : vector<16x32xbf16>, vector<32x96xbf16>, vector<16x96xf32> -> vector<16x96xf32>
    %377 = vector.extract_strided_slice %376 {offsets = [0, 0], sizes = [16, 32], strides = [1, 1]} : vector<16x96xf32> to vector<16x32xf32>
    %cst_182 = arith.constant 0.353553385 : f32
    %378 = vector.broadcast %cst_182 : f32 to vector<16x32xf32>
    %379 = arith.mulf %377, %378 : vector<16x32xf32>
    %380 = vector.extract_strided_slice %376 {offsets = [0, 32], sizes = [16, 32], strides = [1, 1]} : vector<16x96xf32> to vector<16x32xf32>
    %381 = vector.extract_strided_slice %376 {offsets = [0, 64], sizes = [16, 32], strides = [1, 1]} : vector<16x96xf32> to vector<16x32xf32>
    %382 = vector.shape_cast %379 : vector<16x32xf32> to vector<2x8x32xf32>
    %383 = vector.shape_cast %380 : vector<16x32xf32> to vector<2x8x32xf32>
    %384 = vector.shape_cast %381 : vector<16x32xf32> to vector<2x8x32xf32>
    %385 = vector.extract_strided_slice %382 {offsets = [0, 0, 0], sizes = [2, 8, 8], strides = [1, 1, 1]} : vector<2x8x32xf32> to vector<2x8x8xf32>
    %386 = arith.truncf %385 : vector<2x8x8xf32> to vector<2x8x8xbf16>
    %387 = vector.extract_strided_slice %383 {offsets = [0, 0, 0], sizes = [2, 8, 8], strides = [1, 1, 1]} : vector<2x8x32xf32> to vector<2x8x8xf32>
    %388 = arith.truncf %387 : vector<2x8x8xf32> to vector<2x8x8xbf16>
    %389 = vector.extract_strided_slice %384 {offsets = [0, 0, 0], sizes = [2, 8, 8], strides = [1, 1, 1]} : vector<2x8x32xf32> to vector<2x8x8xf32>
    %390 = arith.truncf %389 : vector<2x8x8xf32> to vector<2x8x8xbf16>
    "tpu.trace_start"() <{level = 10 : i32, message = "btd,bsd->bts"}> : () -> ()
    %cst_183 = arith.constant dense<0.000000e+00> : vector<2x8x8xf32>
    %391 = tpu.matmul %386, %388, %cst_183 {dimension_numbers = #tpu.dot_dimension_numbers<[2], [2], [1], [1], [0, 0, 0, 1, 1, 1], [0], [0]>} : vector<2x8x8xbf16>, vector<2x8x8xbf16>, vector<2x8x8xf32> -> vector<2x8x8xf32>
    "tpu.trace_stop"() : () -> ()
    %cst_184 = arith.constant dense<0xFF800000> : vector<2x8xf32>
    %392 = vector.multi_reduction <maximumf>, %391, %cst_184 [2] : vector<2x8x8xf32> to vector<2x8xf32>
    %393 = vector.shape_cast %392 : vector<2x8xf32> to vector<2x8x1xf32>
    %394 = vector.broadcast %393 : vector<2x8x1xf32> to vector<2x8x8xf32>
    %395 = arith.subf %391, %394 : vector<2x8x8xf32>
    %396 = math.exp %395 : vector<2x8x8xf32>
    %cst_185 = arith.constant dense<0.000000e+00> : vector<2x8xf32>
    %397 = vector.multi_reduction <add>, %396, %cst_185 [2] : vector<2x8x8xf32> to vector<2x8xf32>
    %398 = vector.shape_cast %397 : vector<2x8xf32> to vector<2x8x1xf32>
    %399 = tpu.reciprocal %398 {approx = true} : vector<2x8x1xf32> -> vector<2x8x1xf32>
    %400 = vector.broadcast %399 : vector<2x8x1xf32> to vector<2x8x8xf32>
    %401 = arith.mulf %396, %400 : vector<2x8x8xf32>
    %402 = arith.truncf %401 : vector<2x8x8xf32> to vector<2x8x8xbf16>
    "tpu.trace_start"() <{level = 10 : i32, message = "bts,bsd->btd"}> : () -> ()
    %cst_186 = arith.constant dense<0.000000e+00> : vector<2x8x8xf32>
    %403 = tpu.matmul %402, %390, %cst_186 {dimension_numbers = #tpu.dot_dimension_numbers<[2], [1], [1], [2], [0, 0, 0, 1, 1, 2], [0], [0]>} : vector<2x8x8xbf16>, vector<2x8x8xbf16>, vector<2x8x8xf32> -> vector<2x8x8xf32>
    "tpu.trace_stop"() : () -> ()
    %404 = vector.extract_strided_slice %382 {offsets = [0, 0, 8], sizes = [2, 8, 8], strides = [1, 1, 1]} : vector<2x8x32xf32> to vector<2x8x8xf32>
    %405 = arith.truncf %404 : vector<2x8x8xf32> to vector<2x8x8xbf16>
    %406 = vector.extract_strided_slice %383 {offsets = [0, 0, 8], sizes = [2, 8, 8], strides = [1, 1, 1]} : vector<2x8x32xf32> to vector<2x8x8xf32>
    %407 = arith.truncf %406 : vector<2x8x8xf32> to vector<2x8x8xbf16>
    %408 = vector.extract_strided_slice %384 {offsets = [0, 0, 8], sizes = [2, 8, 8], strides = [1, 1, 1]} : vector<2x8x32xf32> to vector<2x8x8xf32>
    %409 = arith.truncf %408 : vector<2x8x8xf32> to vector<2x8x8xbf16>
    "tpu.trace_start"() <{level = 10 : i32, message = "btd,bsd->bts"}> : () -> ()
    %cst_187 = arith.constant dense<0.000000e+00> : vector<2x8x8xf32>
    %410 = tpu.matmul %405, %407, %cst_187 {dimension_numbers = #tpu.dot_dimension_numbers<[2], [2], [1], [1], [0, 0, 0, 1, 1, 1], [0], [0]>} : vector<2x8x8xbf16>, vector<2x8x8xbf16>, vector<2x8x8xf32> -> vector<2x8x8xf32>
    "tpu.trace_stop"() : () -> ()
    %cst_188 = arith.constant dense<0xFF800000> : vector<2x8xf32>
    %411 = vector.multi_reduction <maximumf>, %410, %cst_188 [2] : vector<2x8x8xf32> to vector<2x8xf32>
    %412 = vector.shape_cast %411 : vector<2x8xf32> to vector<2x8x1xf32>
    %413 = vector.broadcast %412 : vector<2x8x1xf32> to vector<2x8x8xf32>
    %414 = arith.subf %410, %413 : vector<2x8x8xf32>
    %415 = math.exp %414 : vector<2x8x8xf32>
    %cst_189 = arith.constant dense<0.000000e+00> : vector<2x8xf32>
    %416 = vector.multi_reduction <add>, %415, %cst_189 [2] : vector<2x8x8xf32> to vector<2x8xf32>
    %417 = vector.shape_cast %416 : vector<2x8xf32> to vector<2x8x1xf32>
    %418 = tpu.reciprocal %417 {approx = true} : vector<2x8x1xf32> -> vector<2x8x1xf32>
    %419 = vector.broadcast %418 : vector<2x8x1xf32> to vector<2x8x8xf32>
    %420 = arith.mulf %415, %419 : vector<2x8x8xf32>
    %421 = arith.truncf %420 : vector<2x8x8xf32> to vector<2x8x8xbf16>
    "tpu.trace_start"() <{level = 10 : i32, message = "bts,bsd->btd"}> : () -> ()
    %cst_190 = arith.constant dense<0.000000e+00> : vector<2x8x8xf32>
    %422 = tpu.matmul %421, %409, %cst_190 {dimension_numbers = #tpu.dot_dimension_numbers<[2], [1], [1], [2], [0, 0, 0, 1, 1, 2], [0], [0]>} : vector<2x8x8xbf16>, vector<2x8x8xbf16>, vector<2x8x8xf32> -> vector<2x8x8xf32>
    "tpu.trace_stop"() : () -> ()
    %423 = vector.extract_strided_slice %382 {offsets = [0, 0, 16], sizes = [2, 8, 8], strides = [1, 1, 1]} : vector<2x8x32xf32> to vector<2x8x8xf32>
    %424 = arith.truncf %423 : vector<2x8x8xf32> to vector<2x8x8xbf16>
    %425 = vector.extract_strided_slice %383 {offsets = [0, 0, 16], sizes = [2, 8, 8], strides = [1, 1, 1]} : vector<2x8x32xf32> to vector<2x8x8xf32>
    %426 = arith.truncf %425 : vector<2x8x8xf32> to vector<2x8x8xbf16>
    %427 = vector.extract_strided_slice %384 {offsets = [0, 0, 16], sizes = [2, 8, 8], strides = [1, 1, 1]} : vector<2x8x32xf32> to vector<2x8x8xf32>
    %428 = arith.truncf %427 : vector<2x8x8xf32> to vector<2x8x8xbf16>
    "tpu.trace_start"() <{level = 10 : i32, message = "btd,bsd->bts"}> : () -> ()
    %cst_191 = arith.constant dense<0.000000e+00> : vector<2x8x8xf32>
    %429 = tpu.matmul %424, %426, %cst_191 {dimension_numbers = #tpu.dot_dimension_numbers<[2], [2], [1], [1], [0, 0, 0, 1, 1, 1], [0], [0]>} : vector<2x8x8xbf16>, vector<2x8x8xbf16>, vector<2x8x8xf32> -> vector<2x8x8xf32>
    "tpu.trace_stop"() : () -> ()
    %cst_192 = arith.constant dense<0xFF800000> : vector<2x8xf32>
    %430 = vector.multi_reduction <maximumf>, %429, %cst_192 [2] : vector<2x8x8xf32> to vector<2x8xf32>
    %431 = vector.shape_cast %430 : vector<2x8xf32> to vector<2x8x1xf32>
    %432 = vector.broadcast %431 : vector<2x8x1xf32> to vector<2x8x8xf32>
    %433 = arith.subf %429, %432 : vector<2x8x8xf32>
    %434 = math.exp %433 : vector<2x8x8xf32>
    %cst_193 = arith.constant dense<0.000000e+00> : vector<2x8xf32>
    %435 = vector.multi_reduction <add>, %434, %cst_193 [2] : vector<2x8x8xf32> to vector<2x8xf32>
    %436 = vector.shape_cast %435 : vector<2x8xf32> to vector<2x8x1xf32>
    %437 = tpu.reciprocal %436 {approx = true} : vector<2x8x1xf32> -> vector<2x8x1xf32>
    %438 = vector.broadcast %437 : vector<2x8x1xf32> to vector<2x8x8xf32>
    %439 = arith.mulf %434, %438 : vector<2x8x8xf32>
    %440 = arith.truncf %439 : vector<2x8x8xf32> to vector<2x8x8xbf16>
    "tpu.trace_start"() <{level = 10 : i32, message = "bts,bsd->btd"}> : () -> ()
    %cst_194 = arith.constant dense<0.000000e+00> : vector<2x8x8xf32>
    %441 = tpu.matmul %440, %428, %cst_194 {dimension_numbers = #tpu.dot_dimension_numbers<[2], [1], [1], [2], [0, 0, 0, 1, 1, 2], [0], [0]>} : vector<2x8x8xbf16>, vector<2x8x8xbf16>, vector<2x8x8xf32> -> vector<2x8x8xf32>
    "tpu.trace_stop"() : () -> ()
    %442 = vector.extract_strided_slice %382 {offsets = [0, 0, 24], sizes = [2, 8, 8], strides = [1, 1, 1]} : vector<2x8x32xf32> to vector<2x8x8xf32>
    %443 = arith.truncf %442 : vector<2x8x8xf32> to vector<2x8x8xbf16>
    %444 = vector.extract_strided_slice %383 {offsets = [0, 0, 24], sizes = [2, 8, 8], strides = [1, 1, 1]} : vector<2x8x32xf32> to vector<2x8x8xf32>
    %445 = arith.truncf %444 : vector<2x8x8xf32> to vector<2x8x8xbf16>
    %446 = vector.extract_strided_slice %384 {offsets = [0, 0, 24], sizes = [2, 8, 8], strides = [1, 1, 1]} : vector<2x8x32xf32> to vector<2x8x8xf32>
    %447 = arith.truncf %446 : vector<2x8x8xf32> to vector<2x8x8xbf16>
    "tpu.trace_start"() <{level = 10 : i32, message = "btd,bsd->bts"}> : () -> ()
    %cst_195 = arith.constant dense<0.000000e+00> : vector<2x8x8xf32>
    %448 = tpu.matmul %443, %445, %cst_195 {dimension_numbers = #tpu.dot_dimension_numbers<[2], [2], [1], [1], [0, 0, 0, 1, 1, 1], [0], [0]>} : vector<2x8x8xbf16>, vector<2x8x8xbf16>, vector<2x8x8xf32> -> vector<2x8x8xf32>
    "tpu.trace_stop"() : () -> ()
    %cst_196 = arith.constant dense<0xFF800000> : vector<2x8xf32>
    %449 = vector.multi_reduction <maximumf>, %448, %cst_196 [2] : vector<2x8x8xf32> to vector<2x8xf32>
    %450 = vector.shape_cast %449 : vector<2x8xf32> to vector<2x8x1xf32>
    %451 = vector.broadcast %450 : vector<2x8x1xf32> to vector<2x8x8xf32>
    %452 = arith.subf %448, %451 : vector<2x8x8xf32>
    %453 = math.exp %452 : vector<2x8x8xf32>
    %cst_197 = arith.constant dense<0.000000e+00> : vector<2x8xf32>
    %454 = vector.multi_reduction <add>, %453, %cst_197 [2] : vector<2x8x8xf32> to vector<2x8xf32>
    %455 = vector.shape_cast %454 : vector<2x8xf32> to vector<2x8x1xf32>
    %456 = tpu.reciprocal %455 {approx = true} : vector<2x8x1xf32> -> vector<2x8x1xf32>
    %457 = vector.broadcast %456 : vector<2x8x1xf32> to vector<2x8x8xf32>
    %458 = arith.mulf %453, %457 : vector<2x8x8xf32>
    %459 = arith.truncf %458 : vector<2x8x8xf32> to vector<2x8x8xbf16>
    "tpu.trace_start"() <{level = 10 : i32, message = "bts,bsd->btd"}> : () -> ()
    %cst_198 = arith.constant dense<0.000000e+00> : vector<2x8x8xf32>
    %460 = tpu.matmul %459, %447, %cst_198 {dimension_numbers = #tpu.dot_dimension_numbers<[2], [1], [1], [2], [0, 0, 0, 1, 1, 2], [0], [0]>} : vector<2x8x8xbf16>, vector<2x8x8xbf16>, vector<2x8x8xf32> -> vector<2x8x8xf32>
    "tpu.trace_stop"() : () -> ()
    %461 = tpu.concatenate %403, %422, %441, %460 in 2 : vector<2x8x8xf32>, vector<2x8x8xf32>, vector<2x8x8xf32>, vector<2x8x8xf32> -> vector<2x8x32xf32>
    %462 = vector.shape_cast %461 : vector<2x8x32xf32> to vector<16x32xf32>
    %463 = arith.truncf %462 : vector<16x32xf32> to vector<16x32xbf16>
    %cst_199 = arith.constant dense<0.000000e+00> : vector<16x32xf32>
    %464 = tpu.matmul %463, %324, %cst_199 {dimension_numbers = #tpu.dot_dimension_numbers<[1], [0], [0], [1], [0, 0, 1, 1], [], []>} : vector<16x32xbf16>, vector<32x32xbf16>, vector<16x32xf32> -> vector<16x32xf32>
    %465 = arith.addf %316, %464 : vector<16x32xf32>
    %466 = vector.broadcast %326 : vector<1x32xf32> to vector<16x32xf32>
    %467 = arith.addf %465, %466 : vector<16x32xf32>
    %cst_200 = arith.constant dense<0.000000e+00> : vector<16xf32>
    %468 = vector.multi_reduction <add>, %467, %cst_200 [1] : vector<16x32xf32> to vector<16xf32>
    %469 = vector.shape_cast %468 : vector<16xf32> to vector<16x1xf32>
    %cst_201 = arith.constant 3.200000e+01 : f32
    %470 = vector.broadcast %cst_201 : f32 to vector<16x1xf32>
    %471 = arith.divf %469, %470 : vector<16x1xf32>
    %472 = vector.broadcast %471 : vector<16x1xf32> to vector<16x32xf32>
    %473 = arith.subf %467, %472 : vector<16x32xf32>
    %474 = arith.mulf %473, %473 : vector<16x32xf32>
    %cst_202 = arith.constant dense<0.000000e+00> : vector<16xf32>
    %475 = vector.multi_reduction <add>, %474, %cst_202 [1] : vector<16x32xf32> to vector<16xf32>
    %476 = vector.shape_cast %475 : vector<16xf32> to vector<16x1xf32>
    %cst_203 = arith.constant 3.200000e+01 : f32
    %477 = vector.broadcast %cst_203 : f32 to vector<16x1xf32>
    %478 = arith.divf %476, %477 : vector<16x1xf32>
    %479 = vector.broadcast %471 : vector<16x1xf32> to vector<16x32xf32>
    %480 = arith.subf %467, %479 : vector<16x32xf32>
    %cst_204 = arith.constant 9.99999974E-6 : f32
    %481 = vector.broadcast %cst_204 : f32 to vector<16x1xf32>
    %482 = arith.addf %478, %481 : vector<16x1xf32>
    %483 = math.rsqrt %482 : vector<16x1xf32>
    %484 = vector.broadcast %483 : vector<16x1xf32> to vector<16x32xf32>
    %485 = arith.mulf %480, %484 : vector<16x32xf32>
    %486 = vector.broadcast %328 : vector<1x32xf32> to vector<16x32xf32>
    %487 = arith.mulf %485, %486 : vector<16x32xf32>
    %488 = vector.broadcast %330 : vector<1x32xf32> to vector<16x32xf32>
    %489 = arith.addf %487, %488 : vector<16x32xf32>
    %490 = arith.truncf %489 : vector<16x32xf32> to vector<16x32xbf16>
    %cst_205 = arith.constant dense<0.000000e+00> : vector<16x32xf32>
    %491 = tpu.matmul %490, %332, %cst_205 {dimension_numbers = #tpu.dot_dimension_numbers<[1], [0], [0], [1], [0, 0, 1, 1], [], []>} : vector<16x32xbf16>, vector<32x32xbf16>, vector<16x32xf32> -> vector<16x32xf32>
    %cst_206 = arith.constant 0.353553385 : f32
    %492 = vector.broadcast %cst_206 : f32 to vector<16x32xf32>
    %493 = arith.mulf %491, %492 : vector<16x32xf32>
    %cst_207 = arith.constant dense<0.000000e+00> : vector<16x32xf32>
    %494 = tpu.matmul %12, %334, %cst_207 {dimension_numbers = #tpu.dot_dimension_numbers<[1], [0], [0], [1], [0, 0, 1, 1], [], []>} : vector<16x32xbf16>, vector<32x32xbf16>, vector<16x32xf32> -> vector<16x32xf32>
    %cst_208 = arith.constant dense<0.000000e+00> : vector<16x32xf32>
    %495 = tpu.matmul %12, %336, %cst_208 {dimension_numbers = #tpu.dot_dimension_numbers<[1], [0], [0], [1], [0, 0, 1, 1], [], []>} : vector<16x32xbf16>, vector<32x32xbf16>, vector<16x32xf32> -> vector<16x32xf32>
    %496 = vector.shape_cast %493 : vector<16x32xf32> to vector<2x8x32xf32>
    %497 = vector.shape_cast %494 : vector<16x32xf32> to vector<2x8x32xf32>
    %498 = vector.shape_cast %495 : vector<16x32xf32> to vector<2x8x32xf32>
    %499 = vector.extract_strided_slice %496 {offsets = [0, 0, 0], sizes = [2, 8, 8], strides = [1, 1, 1]} : vector<2x8x32xf32> to vector<2x8x8xf32>
    %500 = arith.truncf %499 : vector<2x8x8xf32> to vector<2x8x8xbf16>
    %501 = vector.extract_strided_slice %497 {offsets = [0, 0, 0], sizes = [2, 8, 8], strides = [1, 1, 1]} : vector<2x8x32xf32> to vector<2x8x8xf32>
    %502 = arith.truncf %501 : vector<2x8x8xf32> to vector<2x8x8xbf16>
    %503 = vector.extract_strided_slice %498 {offsets = [0, 0, 0], sizes = [2, 8, 8], strides = [1, 1, 1]} : vector<2x8x32xf32> to vector<2x8x8xf32>
    %504 = arith.truncf %503 : vector<2x8x8xf32> to vector<2x8x8xbf16>
    "tpu.trace_start"() <{level = 10 : i32, message = "btd,bsd->bts"}> : () -> ()
    %cst_209 = arith.constant dense<0.000000e+00> : vector<2x8x8xf32>
    %505 = tpu.matmul %500, %502, %cst_209 {dimension_numbers = #tpu.dot_dimension_numbers<[2], [2], [1], [1], [0, 0, 0, 1, 1, 1], [0], [0]>} : vector<2x8x8xbf16>, vector<2x8x8xbf16>, vector<2x8x8xf32> -> vector<2x8x8xf32>
    "tpu.trace_stop"() : () -> ()
    %cst_210 = arith.constant dense<0xFF800000> : vector<2x8xf32>
    %506 = vector.multi_reduction <maximumf>, %505, %cst_210 [2] : vector<2x8x8xf32> to vector<2x8xf32>
    %507 = vector.shape_cast %506 : vector<2x8xf32> to vector<2x8x1xf32>
    %508 = vector.broadcast %507 : vector<2x8x1xf32> to vector<2x8x8xf32>
    %509 = arith.subf %505, %508 : vector<2x8x8xf32>
    %510 = math.exp %509 : vector<2x8x8xf32>
    %cst_211 = arith.constant dense<0.000000e+00> : vector<2x8xf32>
    %511 = vector.multi_reduction <add>, %510, %cst_211 [2] : vector<2x8x8xf32> to vector<2x8xf32>
    %512 = vector.shape_cast %511 : vector<2x8xf32> to vector<2x8x1xf32>
    %513 = tpu.reciprocal %512 {approx = true} : vector<2x8x1xf32> -> vector<2x8x1xf32>
    %514 = vector.broadcast %513 : vector<2x8x1xf32> to vector<2x8x8xf32>
    %515 = arith.mulf %510, %514 : vector<2x8x8xf32>
    %516 = arith.truncf %515 : vector<2x8x8xf32> to vector<2x8x8xbf16>
    "tpu.trace_start"() <{level = 10 : i32, message = "bts,bsd->btd"}> : () -> ()
    %cst_212 = arith.constant dense<0.000000e+00> : vector<2x8x8xf32>
    %517 = tpu.matmul %516, %504, %cst_212 {dimension_numbers = #tpu.dot_dimension_numbers<[2], [1], [1], [2], [0, 0, 0, 1, 1, 2], [0], [0]>} : vector<2x8x8xbf16>, vector<2x8x8xbf16>, vector<2x8x8xf32> -> vector<2x8x8xf32>
    "tpu.trace_stop"() : () -> ()
    %518 = vector.extract_strided_slice %496 {offsets = [0, 0, 8], sizes = [2, 8, 8], strides = [1, 1, 1]} : vector<2x8x32xf32> to vector<2x8x8xf32>
    %519 = arith.truncf %518 : vector<2x8x8xf32> to vector<2x8x8xbf16>
    %520 = vector.extract_strided_slice %497 {offsets = [0, 0, 8], sizes = [2, 8, 8], strides = [1, 1, 1]} : vector<2x8x32xf32> to vector<2x8x8xf32>
    %521 = arith.truncf %520 : vector<2x8x8xf32> to vector<2x8x8xbf16>
    %522 = vector.extract_strided_slice %498 {offsets = [0, 0, 8], sizes = [2, 8, 8], strides = [1, 1, 1]} : vector<2x8x32xf32> to vector<2x8x8xf32>
    %523 = arith.truncf %522 : vector<2x8x8xf32> to vector<2x8x8xbf16>
    "tpu.trace_start"() <{level = 10 : i32, message = "btd,bsd->bts"}> : () -> ()
    %cst_213 = arith.constant dense<0.000000e+00> : vector<2x8x8xf32>
    %524 = tpu.matmul %519, %521, %cst_213 {dimension_numbers = #tpu.dot_dimension_numbers<[2], [2], [1], [1], [0, 0, 0, 1, 1, 1], [0], [0]>} : vector<2x8x8xbf16>, vector<2x8x8xbf16>, vector<2x8x8xf32> -> vector<2x8x8xf32>
    "tpu.trace_stop"() : () -> ()
    %cst_214 = arith.constant dense<0xFF800000> : vector<2x8xf32>
    %525 = vector.multi_reduction <maximumf>, %524, %cst_214 [2] : vector<2x8x8xf32> to vector<2x8xf32>
    %526 = vector.shape_cast %525 : vector<2x8xf32> to vector<2x8x1xf32>
    %527 = vector.broadcast %526 : vector<2x8x1xf32> to vector<2x8x8xf32>
    %528 = arith.subf %524, %527 : vector<2x8x8xf32>
    %529 = math.exp %528 : vector<2x8x8xf32>
    %cst_215 = arith.constant dense<0.000000e+00> : vector<2x8xf32>
    %530 = vector.multi_reduction <add>, %529, %cst_215 [2] : vector<2x8x8xf32> to vector<2x8xf32>
    %531 = vector.shape_cast %530 : vector<2x8xf32> to vector<2x8x1xf32>
    %532 = tpu.reciprocal %531 {approx = true} : vector<2x8x1xf32> -> vector<2x8x1xf32>
    %533 = vector.broadcast %532 : vector<2x8x1xf32> to vector<2x8x8xf32>
    %534 = arith.mulf %529, %533 : vector<2x8x8xf32>
    %535 = arith.truncf %534 : vector<2x8x8xf32> to vector<2x8x8xbf16>
    "tpu.trace_start"() <{level = 10 : i32, message = "bts,bsd->btd"}> : () -> ()
    %cst_216 = arith.constant dense<0.000000e+00> : vector<2x8x8xf32>
    %536 = tpu.matmul %535, %523, %cst_216 {dimension_numbers = #tpu.dot_dimension_numbers<[2], [1], [1], [2], [0, 0, 0, 1, 1, 2], [0], [0]>} : vector<2x8x8xbf16>, vector<2x8x8xbf16>, vector<2x8x8xf32> -> vector<2x8x8xf32>
    "tpu.trace_stop"() : () -> ()
    %537 = vector.extract_strided_slice %496 {offsets = [0, 0, 16], sizes = [2, 8, 8], strides = [1, 1, 1]} : vector<2x8x32xf32> to vector<2x8x8xf32>
    %538 = arith.truncf %537 : vector<2x8x8xf32> to vector<2x8x8xbf16>
    %539 = vector.extract_strided_slice %497 {offsets = [0, 0, 16], sizes = [2, 8, 8], strides = [1, 1, 1]} : vector<2x8x32xf32> to vector<2x8x8xf32>
    %540 = arith.truncf %539 : vector<2x8x8xf32> to vector<2x8x8xbf16>
    %541 = vector.extract_strided_slice %498 {offsets = [0, 0, 16], sizes = [2, 8, 8], strides = [1, 1, 1]} : vector<2x8x32xf32> to vector<2x8x8xf32>
    %542 = arith.truncf %541 : vector<2x8x8xf32> to vector<2x8x8xbf16>
    "tpu.trace_start"() <{level = 10 : i32, message = "btd,bsd->bts"}> : () -> ()
    %cst_217 = arith.constant dense<0.000000e+00> : vector<2x8x8xf32>
    %543 = tpu.matmul %538, %540, %cst_217 {dimension_numbers = #tpu.dot_dimension_numbers<[2], [2], [1], [1], [0, 0, 0, 1, 1, 1], [0], [0]>} : vector<2x8x8xbf16>, vector<2x8x8xbf16>, vector<2x8x8xf32> -> vector<2x8x8xf32>
    "tpu.trace_stop"() : () -> ()
    %cst_218 = arith.constant dense<0xFF800000> : vector<2x8xf32>
    %544 = vector.multi_reduction <maximumf>, %543, %cst_218 [2] : vector<2x8x8xf32> to vector<2x8xf32>
    %545 = vector.shape_cast %544 : vector<2x8xf32> to vector<2x8x1xf32>
    %546 = vector.broadcast %545 : vector<2x8x1xf32> to vector<2x8x8xf32>
    %547 = arith.subf %543, %546 : vector<2x8x8xf32>
    %548 = math.exp %547 : vector<2x8x8xf32>
    %cst_219 = arith.constant dense<0.000000e+00> : vector<2x8xf32>
    %549 = vector.multi_reduction <add>, %548, %cst_219 [2] : vector<2x8x8xf32> to vector<2x8xf32>
    %550 = vector.shape_cast %549 : vector<2x8xf32> to vector<2x8x1xf32>
    %551 = tpu.reciprocal %550 {approx = true} : vector<2x8x1xf32> -> vector<2x8x1xf32>
    %552 = vector.broadcast %551 : vector<2x8x1xf32> to vector<2x8x8xf32>
    %553 = arith.mulf %548, %552 : vector<2x8x8xf32>
    %554 = arith.truncf %553 : vector<2x8x8xf32> to vector<2x8x8xbf16>
    "tpu.trace_start"() <{level = 10 : i32, message = "bts,bsd->btd"}> : () -> ()
    %cst_220 = arith.constant dense<0.000000e+00> : vector<2x8x8xf32>
    %555 = tpu.matmul %554, %542, %cst_220 {dimension_numbers = #tpu.dot_dimension_numbers<[2], [1], [1], [2], [0, 0, 0, 1, 1, 2], [0], [0]>} : vector<2x8x8xbf16>, vector<2x8x8xbf16>, vector<2x8x8xf32> -> vector<2x8x8xf32>
    "tpu.trace_stop"() : () -> ()
    %556 = vector.extract_strided_slice %496 {offsets = [0, 0, 24], sizes = [2, 8, 8], strides = [1, 1, 1]} : vector<2x8x32xf32> to vector<2x8x8xf32>
    %557 = arith.truncf %556 : vector<2x8x8xf32> to vector<2x8x8xbf16>
    %558 = vector.extract_strided_slice %497 {offsets = [0, 0, 24], sizes = [2, 8, 8], strides = [1, 1, 1]} : vector<2x8x32xf32> to vector<2x8x8xf32>
    %559 = arith.truncf %558 : vector<2x8x8xf32> to vector<2x8x8xbf16>
    %560 = vector.extract_strided_slice %498 {offsets = [0, 0, 24], sizes = [2, 8, 8], strides = [1, 1, 1]} : vector<2x8x32xf32> to vector<2x8x8xf32>
    %561 = arith.truncf %560 : vector<2x8x8xf32> to vector<2x8x8xbf16>
    "tpu.trace_start"() <{level = 10 : i32, message = "btd,bsd->bts"}> : () -> ()
    %cst_221 = arith.constant dense<0.000000e+00> : vector<2x8x8xf32>
    %562 = tpu.matmul %557, %559, %cst_221 {dimension_numbers = #tpu.dot_dimension_numbers<[2], [2], [1], [1], [0, 0, 0, 1, 1, 1], [0], [0]>} : vector<2x8x8xbf16>, vector<2x8x8xbf16>, vector<2x8x8xf32> -> vector<2x8x8xf32>
    "tpu.trace_stop"() : () -> ()
    %cst_222 = arith.constant dense<0xFF800000> : vector<2x8xf32>
    %563 = vector.multi_reduction <maximumf>, %562, %cst_222 [2] : vector<2x8x8xf32> to vector<2x8xf32>
    %564 = vector.shape_cast %563 : vector<2x8xf32> to vector<2x8x1xf32>
    %565 = vector.broadcast %564 : vector<2x8x1xf32> to vector<2x8x8xf32>
    %566 = arith.subf %562, %565 : vector<2x8x8xf32>
    %567 = math.exp %566 : vector<2x8x8xf32>
    %cst_223 = arith.constant dense<0.000000e+00> : vector<2x8xf32>
    %568 = vector.multi_reduction <add>, %567, %cst_223 [2] : vector<2x8x8xf32> to vector<2x8xf32>
    %569 = vector.shape_cast %568 : vector<2x8xf32> to vector<2x8x1xf32>
    %570 = tpu.reciprocal %569 {approx = true} : vector<2x8x1xf32> -> vector<2x8x1xf32>
    %571 = vector.broadcast %570 : vector<2x8x1xf32> to vector<2x8x8xf32>
    %572 = arith.mulf %567, %571 : vector<2x8x8xf32>
    %573 = arith.truncf %572 : vector<2x8x8xf32> to vector<2x8x8xbf16>
    "tpu.trace_start"() <{level = 10 : i32, message = "bts,bsd->btd"}> : () -> ()
    %cst_224 = arith.constant dense<0.000000e+00> : vector<2x8x8xf32>
    %574 = tpu.matmul %573, %561, %cst_224 {dimension_numbers = #tpu.dot_dimension_numbers<[2], [1], [1], [2], [0, 0, 0, 1, 1, 2], [0], [0]>} : vector<2x8x8xbf16>, vector<2x8x8xbf16>, vector<2x8x8xf32> -> vector<2x8x8xf32>
    "tpu.trace_stop"() : () -> ()
    %575 = tpu.concatenate %517, %536, %555, %574 in 2 : vector<2x8x8xf32>, vector<2x8x8xf32>, vector<2x8x8xf32>, vector<2x8x8xf32> -> vector<2x8x32xf32>
    %576 = vector.shape_cast %575 : vector<2x8x32xf32> to vector<16x32xf32>
    %577 = arith.truncf %576 : vector<16x32xf32> to vector<16x32xbf16>
    %cst_225 = arith.constant dense<0.000000e+00> : vector<16x32xf32>
    %578 = tpu.matmul %577, %338, %cst_225 {dimension_numbers = #tpu.dot_dimension_numbers<[1], [0], [0], [1], [0, 0, 1, 1], [], []>} : vector<16x32xbf16>, vector<32x32xbf16>, vector<16x32xf32> -> vector<16x32xf32>
    %579 = arith.addf %467, %578 : vector<16x32xf32>
    %580 = vector.broadcast %340 : vector<1x32xf32> to vector<16x32xf32>
    %581 = arith.addf %579, %580 : vector<16x32xf32>
    %cst_226 = arith.constant dense<0.000000e+00> : vector<16xf32>
    %582 = vector.multi_reduction <add>, %581, %cst_226 [1] : vector<16x32xf32> to vector<16xf32>
    %583 = vector.shape_cast %582 : vector<16xf32> to vector<16x1xf32>
    %cst_227 = arith.constant 3.200000e+01 : f32
    %584 = vector.broadcast %cst_227 : f32 to vector<16x1xf32>
    %585 = arith.divf %583, %584 : vector<16x1xf32>
    %586 = vector.broadcast %585 : vector<16x1xf32> to vector<16x32xf32>
    %587 = arith.subf %581, %586 : vector<16x32xf32>
    %588 = arith.mulf %587, %587 : vector<16x32xf32>
    %cst_228 = arith.constant dense<0.000000e+00> : vector<16xf32>
    %589 = vector.multi_reduction <add>, %588, %cst_228 [1] : vector<16x32xf32> to vector<16xf32>
    %590 = vector.shape_cast %589 : vector<16xf32> to vector<16x1xf32>
    %cst_229 = arith.constant 3.200000e+01 : f32
    %591 = vector.broadcast %cst_229 : f32 to vector<16x1xf32>
    %592 = arith.divf %590, %591 : vector<16x1xf32>
    %593 = vector.broadcast %585 : vector<16x1xf32> to vector<16x32xf32>
    %594 = arith.subf %581, %593 : vector<16x32xf32>
    %cst_230 = arith.constant 9.99999974E-6 : f32
    %595 = vector.broadcast %cst_230 : f32 to vector<16x1xf32>
    %596 = arith.addf %592, %595 : vector<16x1xf32>
    %597 = math.rsqrt %596 : vector<16x1xf32>
    %598 = vector.broadcast %597 : vector<16x1xf32> to vector<16x32xf32>
    %599 = arith.mulf %594, %598 : vector<16x32xf32>
    %600 = vector.broadcast %342 : vector<1x32xf32> to vector<16x32xf32>
    %601 = arith.mulf %599, %600 : vector<16x32xf32>
    %602 = vector.broadcast %344 : vector<1x32xf32> to vector<16x32xf32>
    %603 = arith.addf %601, %602 : vector<16x32xf32>
    %604 = arith.truncf %603 : vector<16x32xf32> to vector<16x32xbf16>
    %cst_231 = arith.constant dense<0.000000e+00> : vector<16x128xf32>
    %605 = tpu.matmul %604, %346, %cst_231 {dimension_numbers = #tpu.dot_dimension_numbers<[1], [0], [0], [1], [0, 0, 1, 1], [], []>} : vector<16x32xbf16>, vector<32x128xbf16>, vector<16x128xf32> -> vector<16x128xf32>
    %606 = vector.broadcast %348 : vector<1x128xf32> to vector<16x128xf32>
    %607 = arith.addf %605, %606 : vector<16x128xf32>
    %cst_232 = arith.constant 5.000000e-01 : f32
    %608 = vector.broadcast %cst_232 : f32 to vector<16x128xf32>
    %609 = arith.mulf %608, %607 : vector<16x128xf32>
    %cst_233 = arith.constant 0.707106769 : f32
    %610 = vector.broadcast %cst_233 : f32 to vector<16x128xf32>
    %611 = arith.mulf %607, %610 : vector<16x128xf32>
    %612 = math.erf %611 : vector<16x128xf32>
    %cst_234 = arith.constant 1.000000e+00 : f32
    %613 = vector.broadcast %cst_234 : f32 to vector<16x128xf32>
    %614 = arith.addf %613, %612 : vector<16x128xf32>
    %615 = arith.mulf %609, %614 : vector<16x128xf32>
    %616 = arith.truncf %615 : vector<16x128xf32> to vector<16x128xbf16>
    %cst_235 = arith.constant dense<0.000000e+00> : vector<16x32xf32>
    %617 = tpu.matmul %616, %350, %cst_235 {dimension_numbers = #tpu.dot_dimension_numbers<[1], [0], [0], [1], [0, 0, 1, 1], [], []>} : vector<16x128xbf16>, vector<128x32xbf16>, vector<16x32xf32> -> vector<16x32xf32>
    %618 = arith.addf %581, %617 : vector<16x32xf32>
    %619 = vector.broadcast %352 : vector<1x32xf32> to vector<16x32xf32>
    %620 = arith.addf %618, %619 : vector<16x32xf32>
    %c0_236 = arith.constant 0 : index
    %c0_237 = arith.constant 0 : index
    %621 = vector.load %arg24[%c0_236, %c0_237] : memref<1x32xf32, #tpu.memory_space<vmem>>, vector<1x32xf32>
    %c0_238 = arith.constant 0 : index
    %c0_239 = arith.constant 0 : index
    %622 = vector.load %arg25[%c0_238, %c0_239] : memref<1x32xf32, #tpu.memory_space<vmem>>, vector<1x32xf32>
    %cst_240 = arith.constant dense<0.000000e+00> : vector<16xf32>
    %623 = vector.multi_reduction <add>, %620, %cst_240 [1] : vector<16x32xf32> to vector<16xf32>
    %624 = vector.shape_cast %623 : vector<16xf32> to vector<16x1xf32>
    %cst_241 = arith.constant 3.200000e+01 : f32
    %625 = vector.broadcast %cst_241 : f32 to vector<16x1xf32>
    %626 = arith.divf %624, %625 : vector<16x1xf32>
    %627 = vector.broadcast %626 : vector<16x1xf32> to vector<16x32xf32>
    %628 = arith.subf %620, %627 : vector<16x32xf32>
    %629 = arith.mulf %628, %628 : vector<16x32xf32>
    %cst_242 = arith.constant dense<0.000000e+00> : vector<16xf32>
    %630 = vector.multi_reduction <add>, %629, %cst_242 [1] : vector<16x32xf32> to vector<16xf32>
    %631 = vector.shape_cast %630 : vector<16xf32> to vector<16x1xf32>
    %cst_243 = arith.constant 3.200000e+01 : f32
    %632 = vector.broadcast %cst_243 : f32 to vector<16x1xf32>
    %633 = arith.divf %631, %632 : vector<16x1xf32>
    %634 = vector.broadcast %626 : vector<16x1xf32> to vector<16x32xf32>
    %635 = arith.subf %620, %634 : vector<16x32xf32>
    %cst_244 = arith.constant 9.99999974E-6 : f32
    %636 = vector.broadcast %cst_244 : f32 to vector<16x1xf32>
    %637 = arith.addf %633, %636 : vector<16x1xf32>
    %638 = math.rsqrt %637 : vector<16x1xf32>
    %639 = vector.broadcast %638 : vector<16x1xf32> to vector<16x32xf32>
    %640 = arith.mulf %635, %639 : vector<16x32xf32>
    %641 = vector.broadcast %621 : vector<1x32xf32> to vector<16x32xf32>
    %642 = arith.mulf %640, %641 : vector<16x32xf32>
    %643 = vector.broadcast %622 : vector<1x32xf32> to vector<16x32xf32>
    %644 = arith.addf %642, %643 : vector<16x32xf32>
    %c0_245 = arith.constant 0 : index
    %c0_246 = arith.constant 0 : index
    %645 = vector.load %arg26[%c0_245, %c0_246] : memref<32x128xf32, #tpu.memory_space<vmem>>, vector<32x128xf32>
    %cst_247 = arith.constant dense<0.000000e+00> : vector<16x128xf32>
    %646 = tpu.matmul %644, %645, %cst_247 {dimension_numbers = #tpu.dot_dimension_numbers<[1], [0], [0], [1], [0, 0, 1, 1], [], []>} : vector<16x32xf32>, vector<32x128xf32>, vector<16x128xf32> -> vector<16x128xf32>
    %c0_248 = arith.constant 0 : index
    %c0_249 = arith.constant 0 : index
    %647 = vector.load %arg27[%c0_248, %c0_249] : memref<1x128xf32, #tpu.memory_space<vmem>>, vector<1x128xf32>
    %648 = vector.broadcast %647 : vector<1x128xf32> to vector<16x128xf32>
    %649 = arith.addf %646, %648 : vector<16x128xf32>
    %c0_250 = arith.constant 0 : index
    %c0_251 = arith.constant 0 : index
    %650 = vector.load %arg28[%c0_250, %c0_251] : memref<16x128xf32, #tpu.memory_space<vmem>>, vector<16x128xf32>
    tpu.vector_store %arg28[%c0_250, %c0_251], %649 {strides = array<i32>} : memref<16x128xf32, #tpu.memory_space<vmem>>, vector<16x128xf32>,
    return
  }
  func.func @transform_0(%arg0: i32) -> (i32, i32) {
    %c0_i32 = arith.constant 0 : i32
    %c0_i32_0 = arith.constant 0 : i32
    %c0_i32_1 = arith.constant 0 : i32
    return %c0_i32, %c0_i32_0 : i32, i32
  }
  func.func @transform_1(%arg0: i32) -> (i32, i32) {
    %c0_i32 = arith.constant 0 : i32
    %c0_i32_0 = arith.constant 0 : i32
    %c0_i32_1 = arith.constant 0 : i32
    return %c0_i32, %c0_i32_0 : i32, i32
  }
  func.func @transform_2(%arg0: i32) -> (i32, i32) {
    %c0_i32 = arith.constant 0 : i32
    %c0_i32_0 = arith.constant 0 : i32
    %c0_i32_1 = arith.constant 0 : i32
    return %c0_i32, %c0_i32_0 : i32, i32
  }
  func.func @transform_3(%arg0: i32) -> (i32, i32) {
    %c0_i32 = arith.constant 0 : i32
    %c0_i32_0 = arith.constant 0 : i32
    %c0_i32_1 = arith.constant 0 : i32
    return %c0_i32, %c0_i32_0 : i32, i32
  }
  func.func @transform_4(%arg0: i32) -> (i32, i32) {
    %c0_i32 = arith.constant 0 : i32
    %c0_i32_0 = arith.constant 0 : i32
    %c0_i32_1 = arith.constant 0 : i32
    return %c0_i32, %c0_i32_0 : i32, i32
  }
  func.func @transform_5(%arg0: i32) -> (i32, i32, i32) {
    %c0_i32 = arith.constant 0 : i32
    %c0_i32_0 = arith.constant 0 : i32
    %c0_i32_1 = arith.constant 0 : i32
    %c0_i32_2 = arith.constant 0 : i32
    return %c0_i32, %c0_i32_0, %c0_i32_1 : i32, i32, i32
  }
  func.func @transform_6(%arg0: i32) -> (i32, i32, i32) {
    %c0_i32 = arith.constant 0 : i32
    %c0_i32_0 = arith.constant 0 : i32
    %c0_i32_1 = arith.constant 0 : i32
    %c0_i32_2 = arith.constant 0 : i32
    return %c0_i32, %c0_i32_0, %c0_i32_1 : i32, i32, i32
  }
  func.func @transform_7(%arg0: i32) -> (i32, i32, i32) {
    %c0_i32 = arith.constant 0 : i32
    %c0_i32_0 = arith.constant 0 : i32
    %c0_i32_1 = arith.constant 0 : i32
    %c0_i32_2 = arith.constant 0 : i32
    return %c0_i32, %c0_i32_0, %c0_i32_1 : i32, i32, i32
  }
  func.func @transform_8(%arg0: i32) -> (i32, i32, i32) {
    %c0_i32 = arith.constant 0 : i32
    %c0_i32_0 = arith.constant 0 : i32
    %c0_i32_1 = arith.constant 0 : i32
    %c0_i32_2 = arith.constant 0 : i32
    return %c0_i32, %c0_i32_0, %c0_i32_1 : i32, i32, i32
  }
  func.func @transform_9(%arg0: i32) -> (i32, i32, i32) {
    %c0_i32 = arith.constant 0 : i32
    %c0_i32_0 = arith.constant 0 : i32
    %c0_i32_1 = arith.constant 0 : i32
    %c0_i32_2 = arith.constant 0 : i32
    return %c0_i32, %c0_i32_0, %c0_i32_1 : i32, i32, i32
  }
  func.func @transform_10(%arg0: i32) -> (i32, i32, i32) {
    %c0_i32 = arith.constant 0 : i32
    %c0_i32_0 = arith.constant 0 : i32
    %c0_i32_1 = arith.constant 0 : i32
    %c0_i32_2 = arith.constant 0 : i32
    return %c0_i32, %c0_i32_0, %c0_i32_1 : i32, i32, i32
  }
  func.func @transform_11(%arg0: i32) -> (i32, i32, i32) {
    %c0_i32 = arith.constant 0 : i32
    %c0_i32_0 = arith.constant 0 : i32
    %c0_i32_1 = arith.constant 0 : i32
    %c0_i32_2 = arith.constant 0 : i32
    return %c0_i32, %c0_i32_0, %c0_i32_1 : i32, i32, i32
  }
  func.func @transform_12(%arg0: i32) -> (i32, i32, i32) {
    %c0_i32 = arith.constant 0 : i32
    %c0_i32_0 = arith.constant 0 : i32
    %c0_i32_1 = arith.constant 0 : i32
    %c0_i32_2 = arith.constant 0 : i32
    return %c0_i32, %c0_i32_0, %c0_i32_1 : i32, i32, i32
  }
  func.func @transform_13(%arg0: i32) -> (i32, i32, i32) {
    %c0_i32 = arith.constant 0 : i32
    %c0_i32_0 = arith.constant 0 : i32
    %c0_i32_1 = arith.constant 0 : i32
    %c0_i32_2 = arith.constant 0 : i32
    return %c0_i32, %c0_i32_0, %c0_i32_1 : i32, i32, i32
  }
  func.func @transform_14(%arg0: i32) -> (i32, i32, i32) {
    %c0_i32 = arith.constant 0 : i32
    %c0_i32_0 = arith.constant 0 : i32
    %c0_i32_1 = arith.constant 0 : i32
    %c0_i32_2 = arith.constant 0 : i32
    return %c0_i32, %c0_i32_0, %c0_i32_1 : i32, i32, i32
  }
  func.func @transform_15(%arg0: i32) -> (i32, i32, i32) {
    %c0_i32 = arith.constant 0 : i32
    %c0_i32_0 = arith.constant 0 : i32
    %c0_i32_1 = arith.constant 0 : i32
    %c0_i32_2 = arith.constant 0 : i32
    return %c0_i32, %c0_i32_0, %c0_i32_1 : i32, i32, i32
  }
  func.func @transform_16(%arg0: i32) -> (i32, i32, i32) {
    %c0_i32 = arith.constant 0 : i32
    %c0_i32_0 = arith.constant 0 : i32
    %c0_i32_1 = arith.constant 0 : i32
    %c0_i32_2 = arith.constant 0 : i32
    return %c0_i32, %c0_i32_0, %c0_i32_1 : i32, i32, i32
  }
  func.func @transform_17(%arg0: i32) -> (i32, i32, i32) {
    %c0_i32 = arith.constant 0 : i32
    %c0_i32_0 = arith.constant 0 : i32
    %c0_i32_1 = arith.constant 0 : i32
    %c0_i32_2 = arith.constant 0 : i32
    return %c0_i32, %c0_i32_0, %c0_i32_1 : i32, i32, i32
  }
  func.func @transform_18(%arg0: i32) -> (i32, i32, i32) {
    %c0_i32 = arith.constant 0 : i32
    %c0_i32_0 = arith.constant 0 : i32
    %c0_i32_1 = arith.constant 0 : i32
    %c0_i32_2 = arith.constant 0 : i32
    return %c0_i32, %c0_i32_0, %c0_i32_1 : i32, i32, i32
  }
  func.func @transform_19(%arg0: i32) -> (i32, i32, i32) {
    %c0_i32 = arith.constant 0 : i32
    %c0_i32_0 = arith.constant 0 : i32
    %c0_i32_1 = arith.constant 0 : i32
    %c0_i32_2 = arith.constant 0 : i32
    return %c0_i32, %c0_i32_0, %c0_i32_1 : i32, i32, i32
  }
  func.func @transform_20(%arg0: i32) -> (i32, i32, i32) {
    %c0_i32 = arith.constant 0 : i32
    %c0_i32_0 = arith.constant 0 : i32
    %c0_i32_1 = arith.constant 0 : i32
    %c0_i32_2 = arith.constant 0 : i32
    return %c0_i32, %c0_i32_0, %c0_i32_1 : i32, i32, i32
  }
  func.func @transform_21(%arg0: i32) -> (i32, i32, i32) {
    %c0_i32 = arith.constant 0 : i32
    %c0_i32_0 = arith.constant 0 : i32
    %c0_i32_1 = arith.constant 0 : i32
    %c0_i32_2 = arith.constant 0 : i32
    return %c0_i32, %c0_i32_0, %c0_i32_1 : i32, i32, i32
  }
  func.func @transform_22(%arg0: i32) -> (i32, i32, i32) {
    %c0_i32 = arith.constant 0 : i32
    %c0_i32_0 = arith.constant 0 : i32
    %c0_i32_1 = arith.constant 0 : i32
    %c0_i32_2 = arith.constant 0 : i32
    return %c0_i32, %c0_i32_0, %c0_i32_1 : i32, i32, i32
  }
  func.func @transform_23(%arg0: i32) -> (i32, i32) {
    %c0_i32 = arith.constant 0 : i32
    %c0_i32_0 = arith.constant 0 : i32
    %c0_i32_1 = arith.constant 0 : i32
    return %c0_i32, %c0_i32_0 : i32, i32
  }
  func.func @transform_24(%arg0: i32) -> (i32, i32) {
    %c0_i32 = arith.constant 0 : i32
    %c0_i32_0 = arith.constant 0 : i32
    %c0_i32_1 = arith.constant 0 : i32
    return %c0_i32, %c0_i32_0 : i32, i32
  }
  func.func @transform_25(%arg0: i32) -> (i32, i32) {
    %c0_i32 = arith.constant 0 : i32
    %c0_i32_0 = arith.constant 0 : i32
    %c0_i32_1 = arith.constant 0 : i32
    return %c0_i32, %c0_i32_0 : i32, i32
  }
  func.func @transform_26(%arg0: i32) -> (i32, i32) {
    %c0_i32 = arith.constant 0 : i32
    %c0_i32_0 = arith.constant 0 : i32
    %c0_i32_1 = arith.constant 0 : i32
    return %c0_i32, %c0_i32_0 : i32, i32
  }
  func.func @transform_27(%arg0: i32) -> (i32, i32) {
    %c0_i32 = arith.constant 0 : i32
    %c0_i32_0 = arith.constant 0 : i32
    %c0_i32_1 = arith.constant 0 : i32
    return %c0_i32, %c0_i32_0 : i32, i32
  }
}

</mosaic_0001>

<bundles_post_ra>
// kernel: transformer_decoder_forward.1
= control target key start
LH: loop header
LB: loop body
LE: loop exit
PB: predicated region body
PF: predicated region fallthrough
CT: control target
= control target key end

     0   :  { %vm101_vm0 = vcmask 1041408   ;;  %vm94_vm1 = vcmask 15360   ;;  %vm187_vm2 = vcmask 261120   ;;  %v4056_v13 = vmov 32.0   ;;  %s5125_s30 = smov 64   ;;  %s5082_s3 = inlined_call_operand.vmem [shape: f32[2,32], index: 3, kind: input, shape index: {}]   ;;  %s5083_s1 = inlined_call_operand.vmem [shape: f32[16,2], index: 1, kind: input, shape index: {}]   ;;  %s5084_s4 = inlined_call_operand.vmem [shape: f32[1,32], index: 4, kind: input, shape index: {}]   ;;  %s5085_s0 = inlined_call_operand.vmem [shape: f32[8,32], index: 0, kind: input, shape index: {}]   ;;  %s5086_s5 = inlined_call_operand.vmem [shape: f32[2,1,32], index: 5, kind: input, shape index: {}]   ;;  %s5087_s6 = inlined_call_operand.vmem [shape: f32[2,1,32], index: 6, kind: input, shape index: {}]   ;;  %s5088_s7 = inlined_call_operand.vmem [shape: bf16[2,32,96], index: 7, kind: input, shape index: {}]   ;;  %s5089_s9 = inlined_call_operand.vmem [shape: f32[2,1,32], index: 9, kind: input, shape index: {}]   ;;  %s5090_s8 = inlined_call_operand.vmem [shape: bf16[2,32,32], index: 8, kind: input, shape index: {}]   ;;  %s5091_s10 = inlined_call_operand.vmem [shape: f32[2,1,32], index: 10, kind: input, shape index: {}]   ;;  %s5092_s11 = inlined_call_operand.vmem [shape: f32[2,1,32], index: 11, kind: input, shape index: {}]   ;;  %s5093_s13 = inlined_call_operand.vmem [shape: bf16[2,32,32], index: 13, kind: input, shape index: {}]   ;;  %s5094_s2 = inlined_call_operand.vmem [shape: bf16[16,32], index: 2, kind: input, shape index: {}]   ;;  %s5095_s12 = inlined_call_operand.vmem [shape: bf16[2,32,32], index: 12, kind: input, shape index: {}]   ;;  %s5096_s14 = inlined_call_operand.vmem [shape: bf16[2,32,32], index: 14, kind: input, shape index: {}]   ;;  %s5097_s16 = inlined_call_operand.vmem [shape: f32[2,1,32], index: 16, kind: input, shape index: {}]   ;;  %s5098_s15 = inlined_call_operand.vmem [shape: bf16[2,32,32], index: 15, kind: input, shape index: {}]   ;;  %s5099_s17 = inlined_call_operand.vmem [shape: f32[2,1,32], index: 17, kind: input, shape index: {}]   ;;  %s5100_s18 = inlined_call_operand.vmem [shape: f32[2,1,32], index: 18, kind: input, shape index: {}]   ;;  %s5101_s20 = inlined_call_operand.vmem [shape: f32[2,1,128], index: 20, kind: input, shape index: {}]   ;;  %s5102_s19 = inlined_call_operand.vmem [shape: bf16[2,32,128], index: 19, kind: input, shape index: {}]   ;;  %s5103_s22 = inlined_call_operand.vmem [shape: f32[2,1,32], index: 22, kind: input, shape index: {}]   ;;  %s5104_s21 = inlined_call_operand.vmem [shape: bf16[2,128,32], index: 21, kind: input, shape index: {}]   ;;  %s5105_s23 = inlined_call_operand.vmem [shape: f32[1,32], index: 23, kind: input, shape index: {}]   ;;  %s5106_s24 = inlined_call_operand.vmem [shape: f32[1,32], index: 24, kind: input, shape index: {}]   ;;  %s5107_s26 = inlined_call_operand.vmem [shape: f32[1,128], index: 26, kind: input, shape index: {}]   ;;  %s5108_s25 = inlined_call_operand.vmem [shape: f32[32,128], index: 25, kind: input, shape index: {}]   ;;  %s5109_s27 = inlined_call_operand.vmem [shape: f32[16,128], index: 27, kind: output, shape index: {}]  }
   0x1   :  { %5148 = sst [smem:[#allocation2_spill]] %s5082_s3  ;;  %3889 = vrcp.f32 %v4056_v13  ;;  %vm290_vm10 = vcmask 64512   ;;  %vm363_vm11 = vcmask 1043456   ;;  %vm769_vm12 = vcmask 130048  }
   0x2   :  { %5149 = sst [smem:[#allocation3_spill]] %s5083_s1  ;;  %vm772_vm13 = vcmask 195584  }
   0x3   :  { %5150 = sst [smem:[#allocation4_spill]] %s5084_s4  ;;  %s5143_s4 = smov 112  }
   0x4   :  { %5151 = sst [smem:[#allocation5_spill]] %s5085_s0  ;;  %s5119_s0 = smov 40  }
   0x5   :  { %5152 = sst [smem:[#allocation6_spill]] %s5086_s5 }
   0x6   :  { %5153 = sst [smem:[#allocation7_spill]] %s5087_s6 }
   0x7   :  { %5154 = sst [smem:[#allocation8_spill]] %s5088_s7  ;;  %v3890_v14 = vpop.eup %3889  ;;  %s5131_s7 = smov 96  }
   0x8   :  { %5155 = sst [smem:[#allocation9_spill]] %s5089_s9  ;;  %v195_v15 = vmul.f32 32.0, %v3890_v14  ;;  %vm199_vm3 = vweird.f32 %v3890_v14  ;;  %s5145_s9 = smov 120  }
   0x9   :  { %5156 = sst [smem:[#allocation10_spill]] %s5090_s8 }
   0xa   :  { %5157 = sst [smem:[#allocation11_spill]] %s5091_s10  ;;  %v196_v16 = vsub.f32 1.0, %v195_v15  ;;  %s5123_s10 = smov 56  }
   0xb   :  { %5158 = sst [smem:[#allocation12_spill]] %s5092_s11  ;;  %s5139_s11 = smov 8  }
   0xc   :  { %5159 = sst [smem:[#allocation13_spill]] %s5093_s13  ;;  %v197_v17 = vmul.f32 %v3890_v14, %v196_v16  ;;  %s5127_s13 = smov 80  }
   0xd   :  { %5160 = sst [smem:[#allocation14_spill]] %s5105_s23  ;;  %s5187_s23 = smov 56  }
   0xe   :  { %5161 = sst [smem:[#allocation15_spill]] %s5106_s24  ;;  %v198_v18 = vadd.f32 %v3890_v14, %v197_v17  ;;  %s5188_s24 = smov 48  }
   0xf   :  { %5162 = sst [smem:[#allocation16_spill]] %s5107_s26  ;;  %s5184_s26 = smov 120  }
  0x10   :  { %5163 = sst [smem:[#allocation17_spill]] %s5109_s27  ;;  %v4234_v19 = vsel %vm199_vm3, %v3890_v14, %v198_v18  ;;  %s5185_s27 = smov 80  }
  0x11   :  { %s5164_s8 = sld [smem:[#allocation2_spill]] }
  0x12   :  { %s5165_s6 = sld [smem:[#allocation3_spill]] }
  0x13   :  { %s5166_s1 = sld [smem:[#allocation4_spill]] }
  0x14   :  { %s5167_s3 = sld [smem:[#allocation5_spill]] }
  0x15   :  { %s5168_s5 = sld [smem:[#allocation8_spill]] }
  0x16   :  { %s5169_s28 = sld [smem:[#allocation6_spill]] }
  0x17   :  { %v89_v0 = vld [vmem:[%s5164_s8] sm:$0x3]  ;;  %s5170_s29 = sld [smem:[#allocation7_spill]]  ;;  %s5141_s8 = smov 104  }
  0x18   :  { %v87_v1 = vld [vmem:[%s5165_s6] sm:$0xff]  ;;  %3424 = vmatpush.msk.msra.mxu0 %vm101_vm0, %v89_v0  ;;  %v88_v2 = vld [vmem:[%s5165_s6 + $0x8] sm:$0xff]  ;;  %s5121_s6 = smov 48  }
  0x19   :  { %3425 = vmatmul.msk.f32.vlgmr.msra.gmra.mxu0 %vm94_vm1, %v87_v1  ;;  %v3865_v3 = vld [vmem:[%s5166_s1] ss:$0 sm:$0xff]  ;;  %s5133_s1 = smov 88  }
  0x1a   :  { %v128_v5 = vld [vmem:[%s5167_s3] sm:$0xff]  ;;  %s5129_s3 = smov 72  }
  0x1b   :  { %v3747_v30 = vld [vmem:[%s5168_s5 + $0x8] sm:$0xff]  ;;  %v3746_v32 = vld [vmem:[%s5168_s5] sm:$0xff] }
  0x1c   :  { %271 = vmatpush.bf16.msra.mxu3 %v3747_v30  ;;  %v3866_v51 = vld [vmem:[%s5169_s28] ss:$0 sm:$0xff] }
  0x1d   :  { %v3867_v56 = vld [vmem:[%s5170_s29] ss:$0 sm:$0xff] }
  0x20   :  { %272 = vmatpush.bf16.msra.mxu3 %v3746_v32 }
  0x21   :  { %3426 = vmatmul.msk.f32.gmra.mxu0 %vm94_vm1, %v88_v2 }
  0x96   :  { %v122_v4 = vpop.f32.mrf.mxu0 }
  0x97   :  { %v123_v6 = vadd.f32 %v3865_v3, %v122_v4 }
  0x99   :  { %v4226_v7 = vadd.f32 %v128_v5, %v123_v6 }
  0x9b   :  { %v188_v8 = vsel %vm187_vm2, %v4226_v7, 0.0 }
  0x9c   :  { %189 = vadd.xlane.f32.xlu0 %v188_v8 }
  0x9e   :  { %v125_v9 = vpop.f32.mrf.mxu0 }
  0x9f   :  { %v126_v10 = vadd.f32 %v3865_v3, %v125_v9 }
  0xa1   :  { %v4230_v11 = vadd.f32 %v128_v5, %v126_v10 }
  0xa3   :  { %v191_v12 = vsel %vm187_vm2, %v4230_v11, 0.0 }
  0xa4   :  { %192 = vadd.xlane.f32.xlu0 %v191_v12 }
 0x10f   :  { %v190_v20 = vpop.xlane.xlu0 %189 }
 0x110   :  { %v201_v21 = vmul.f32 %v4234_v19, %v190_v20 }
 0x112   :  { %v203_v22 = vsub.f32 %v4226_v7, %v201_v21 }
 0x114   :  { %v205_v23 = vmul.f32 %v203_v22, %v203_v22 }
 0x116   :  { %v207_v24 = vsel %vm187_vm2, %v205_v23, 0.0 }
 0x117   :  { %208 = vadd.xlane.f32.xlu1 %v207_v24  ;;  %v193_v25 = vpop.xlane.xlu0 %192 }
 0x118   :  { %v202_v26 = vmul.f32 %v4234_v19, %v193_v25 }
 0x11a   :  { %v204_v27 = vsub.f32 %v4230_v11, %v202_v26 }
 0x11c   :  { %v206_v28 = vmul.f32 %v204_v27, %v204_v27 }
 0x11e   :  { %v210_v29 = vsel %vm187_vm2, %v206_v28, 0.0 }
 0x11f   :  { %211 = vadd.xlane.f32.xlu1 %v210_v29 }
 0x18a   :  { %v209_v31 = vpop.xlane.xlu1 %208 }
 0x18b   :  { %v213_v33 = vmul.f32 %v209_v31, %v4234_v19 }
 0x18d   :  { %v215_v34 = vadd.f32 1e-05, %v213_v33 }
 0x18f   :  { %3891 = vrsqrt.f32 %v215_v34  ;;  %vm223_vm5 = vweird.f32 %v215_v34 }
 0x192   :  { %v212_v35 = vpop.xlane.xlu1 %211 }
 0x193   :  { %v214_v36 = vmul.f32 %v212_v35, %v4234_v19 }
 0x195   :  { %v3892_v37 = vpop.eup %3891  ;;  %v216_v38 = vadd.f32 1e-05, %v214_v36 }
 0x196   :  { %v218_v39 = vmul.f32 %v3892_v37, %v215_v34  ;;  %vm224_vm4 = vweird.f32 %v3892_v37 }
 0x197   :  { %3893 = vrsqrt.f32 %v216_v38  ;;  %vm225_vm6 = vmor %vm223_vm5, %vm224_vm4  ;;  %vm233_vm8 = vweird.f32 %v216_v38 }
 0x198   :  { %v219_v40 = vmul.f32 %v3892_v37, %v218_v39 }
 0x19a   :  { %v220_v41 = vmul.f32 0.5, %v219_v40 }
 0x19c   :  { %v221_v42 = vsub.f32 1.5, %v220_v41 }
 0x19d   :  { %v3894_v43 = vpop.eup %3893 }
 0x19e   :  { %v222_v44 = vmul.f32 %v3892_v37, %v221_v42  ;;  %v228_v45 = vmul.f32 %v3894_v43, %v216_v38  ;;  %vm234_vm7 = vweird.f32 %v3894_v43 }
 0x19f   :  { %vm235_vm9 = vmor %vm233_vm8, %vm234_vm7 }
 0x1a0   :  { %v229_v46 = vmul.f32 %v3894_v43, %v228_v45  ;;  %v226_v47 = vsel %vm225_vm6, %v3892_v37, %v222_v44 }
 0x1a1   :  { %v237_v50 = vmul.f32 %v226_v47, %v203_v22 }
 0x1a2   :  { %v230_v48 = vmul.f32 0.5, %v229_v46 }
 0x1a3   :  { %v242_v55 = vmul.f32 %v3866_v51, %v237_v50 }
 0x1a4   :  { %v231_v49 = vsub.f32 1.5, %v230_v48 }
 0x1a5   :  { %v247_v58 = vadd.f32 %v3867_v56, %v242_v55 }
 0x1a6   :  { %v232_v52 = vmul.f32 %v3894_v43, %v231_v49 }
 0x1a8   :  { %v236_v53 = vsel %vm235_vm9, %v3894_v43, %v232_v52 }
 0x1a9   :  { %v238_v54 = vmul.f32 %v236_v53, %v204_v27 }
 0x1ab   :  { %v243_v57 = vmul.f32 %v3866_v51, %v238_v54 }
 0x1ad   :  { %v248_v59 = vadd.f32 %v3867_v56, %v243_v57 }
 0x1af   :  { %v249_v60 = vpack.c.bf16 %v248_v59, %v247_v58 }
 0x1b1   :  { %3435 = vmatmul.msk.bf16.vlgmr.msra.gmra.mxu3 %vm187_vm2, %v249_v60 }
 0x234   :  { %v274_v61 = vpop.f32.mrf.mxu3 }
 0x235   :  { %v283_v62 = vpack.c.bf16 %v274_v61, %v274_v61  ;;  %v279_v4 = vmul.f32 0.35355338, %v274_v61 }
 0x237   :  { %v286_v63 = vunpack.c.l.b16 %v283_v62  ;;  %v281_v9 = vpack.c.bf16 %v279_v4, %v279_v4 }
 0x239   :  { %v4257_v0 = vpack.c.b16 %v286_v63, %v286_v63  ;;  %v402_v12 = vunpack.c.l.b16 %v281_v9 }
 0x23b   :  { %406 = vrot.lane.b32.xlu0 %v4257_v0, %s5133_s1  ;;  %288 = vrot.lane.b32.xlu2 %v4257_v0, %s5131_s7  ;;  %v403_v14 = vpack.c.b16 %v402_v12, %v402_v12 }
 0x23c   :  { %v276_v1 = vpop.f32.mrf.mxu3 }
 0x23d   :  { %v280_v2 = vmul.f32 0.35355338, %v276_v1  ;;  %v284_v3 = vpack.c.bf16 %v276_v1, %v276_v1 }
 0x23f   :  { %v311_v5 = vunpack.c.l.b16 %v284_v3  ;;  %v282_v6 = vpack.c.bf16 %v280_v2, %v280_v2 }
 0x241   :  { %v4263_v8 = vpack.c.b16 %v311_v5, %v311_v5  ;;  %v428_v10 = vunpack.c.l.b16 %v282_v6 }
 0x243   :  { %544 = vrot.lane.b32.xlu0 %v4263_v8, %s5127_s13  ;;  %432 = vrot.lane.b32.xlu1 %v4263_v8, %s5133_s1  ;;  %v429_v13 = vpack.c.b16 %v428_v10, %v428_v10  ;;  %s5177_s1 = smov 104  }
 0x244   :  { %313 = vrot.lane.b32.xlu2 %v4263_v8, %s5131_s7  ;;  %s5175_s7 = sld [smem:[#allocation12_spill]] }
 0x24b   :  { %633 = vrot.lane.b32.xlu0 %v4257_v0, %s5129_s3  ;;  %542 = vrot.lane.b32.xlu1 %v429_v13, %s5143_s4 }
 0x24c   :  { %404 = vrot.lane.b32.xlu2 %v403_v14, %s5145_s9 }
 0x253   :  { %654 = vrot.lane.b32.xlu0 %v429_v13, %s5141_s8  ;;  %631 = vrot.lane.b32.xlu1 %v403_v14, %s5141_s8  ;;  %s5179_s8 = smov 16  }
 0x254   :  { %430 = vrot.lane.b32.xlu2 %v429_v13, %s5145_s9 }
 0x25c   :  { %521 = vrot.lane.b32.xlu2 %v4257_v0, %s5127_s13  ;;  %s5171_s13 = sld [smem:[#allocation10_spill]] }
 0x264   :  { %519 = vrot.lane.b32.xlu2 %v403_v14, %s5143_s4  ;;  %s5178_s4 = smov 8  }
 0x26c   :  { %656 = vrot.lane.b32.xlu2 %v4263_v8, %s5129_s3  ;;  %s5173_s3 = sld [smem:[#allocation13_spill]] }
 0x295   :  { %v289_v15 = vpop.permute.xlu2 %288 }
 0x296   :  { %v295_v16 = vsel %vm290_vm10, %v289_v15, 0 }
 0x297   :  { %304 = vmatpush.bf16.xpose.msra.mxu2 %v295_v16 }
 0x29e   :  { %v314_v17 = vpop.permute.xlu2 %313  ;;  %3436 = vmatmul.msk.bf16.vlgmr.msra.gmra.mxu2 %vm290_vm10, %v281_v9 }
 0x29f   :  { %v319_v18 = vsel %vm290_vm10, %v314_v17, 0 }
 0x2a0   :  { %328 = vmatpush.bf16.xpose.msrb.mxu3 %v319_v18 }
 0x2a6   :  { %v405_v20 = vpop.permute.xlu2 %404 }
 0x2a7   :  { %3437 = vmatmul.msk.bf16.vlgmr.msrb.gmra.mxu3 %vm290_vm10, %v282_v6 }
 0x2ad   :  { %v407_v21 = vpop.permute.xlu0 %406 }
 0x2ae   :  { %v431_v22 = vpop.permute.xlu2 %430  ;;  %v412_v23 = vsel %vm290_vm10, %v407_v21, 0 }
 0x2af   :  { %421 = vmatpush.bf16.xpose.msrb.mxu2 %v412_v23 }
 0x2b5   :  { %v545_v24 = vpop.permute.xlu0 %544  ;;  %v433_v25 = vpop.permute.xlu1 %432 }
 0x2b6   :  { %v550_v26 = vsel %vm290_vm10, %v545_v24, 0  ;;  %v438_v27 = vsel %vm290_vm10, %v433_v25, 0  ;;  %v522_v28 = vpop.permute.xlu2 %521  ;;  %3440 = vmatmul.msk.bf16.vlgmr.msrb.gmra.mxu2 %vm290_vm10, %v405_v20 }
 0x2b7   :  { %v527_v29 = vsel %vm290_vm10, %v522_v28, 0  ;;  %447 = vmatpush.bf16.xpose.msra.mxu3 %v438_v27 }
 0x2b8   :  { %536 = vmatpush.bf16.xpose.msra.mxu2 %v527_v29 }
 0x2bd   :  { %v634_v30 = vpop.permute.xlu0 %633  ;;  %v543_v35 = vpop.permute.xlu1 %542 }
 0x2be   :  { %v639_v31 = vsel %vm290_vm10, %v634_v30, 0  ;;  %v520_v32 = vpop.permute.xlu2 %519  ;;  %3441 = vmatmul.msk.bf16.vlgmr.msra.gmra.mxu3 %vm290_vm10, %v431_v22 }
 0x2bf   :  { %559 = vmatpush.bf16.xpose.msrb.mxu3 %v550_v26 }
 0x2c0   :  { %648 = vmatpush.bf16.xpose.msrb.mxu2 %v639_v31 }
 0x2c5   :  { %v632_v36 = vpop.permute.xlu1 %631  ;;  %v655_v37 = vpop.permute.xlu0 %654 }
 0x2c6   :  { %v657_v33 = vpop.permute.xlu2 %656  ;;  %3444 = vmatmul.msk.bf16.vlgmr.msra.gmra.mxu2 %vm290_vm10, %v520_v32 }
 0x2c7   :  { %v662_v34 = vsel %vm290_vm10, %v657_v33, 0 }
 0x2c8   :  { %671 = vmatpush.bf16.xpose.msra.mxu3 %v662_v34 }
 0x2ce   :  { %3445 = vmatmul.msk.bf16.vlgmr.msrb.gmra.mxu3 %vm290_vm10, %v543_v35 }
 0x2d6   :  { %3448 = vmatmul.msk.bf16.vlgmr.msrb.gmra.mxu2 %vm290_vm10, %v632_v36 }
 0x2de   :  { %3449 = vmatmul.msk.bf16.vlgmr.msra.gmra.mxu3 %vm290_vm10, %v655_v37 }
 0x321   :  { %v306_v38 = vpop.f32.mrf.mxu2 }
 0x322   :  { %v334_v39 = vsel %vm290_vm10, %v306_v38, -inf }
 0x323   :  { %335 = vmax.xlane.f32.xlu2 %v334_v39 }
 0x329   :  { %v308_v40 = vpop.f32.mrf.mxu2 }
 0x32a   :  { %v330_v41 = vpop.f32.mrf.mxu3 }
 0x32b   :  { %v337_v42 = vsel %vm290_vm10, %v330_v41, -inf }
 0x32c   :  { %338 = vmax.xlane.f32.xlu1 %v337_v42 }
 0x332   :  { %v332_v43 = vpop.f32.mrf.mxu3 }
 0x339   :  { %v423_v44 = vpop.f32.mrf.mxu2 }
 0x33a   :  { %v453_v45 = vsel %vm290_vm10, %v423_v44, -inf }
 0x33b   :  { %454 = vmax.xlane.f32.xlu0 %v453_v45 }
 0x341   :  { %v425_v46 = vpop.f32.mrf.mxu2  ;;  %v449_v47 = vpop.f32.mrf.mxu3 }
 0x342   :  { %v456_v48 = vsel %vm290_vm10, %v449_v47, -inf }
 0x343   :  { %457 = vmax.xlane.f32.xlu2 %v456_v48 }
 0x349   :  { %v451_v49 = vpop.f32.mrf.mxu3  ;;  %v538_v50 = vpop.f32.mrf.mxu2 }
 0x34a   :  { %v565_v51 = vsel %vm290_vm10, %v538_v50, -inf }
 0x34b   :  { %566 = vmax.xlane.f32.xlu1 %v565_v51 }
 0x351   :  { %v540_v52 = vpop.f32.mrf.mxu2  ;;  %v561_v53 = vpop.f32.mrf.mxu3 }
 0x352   :  { %v568_v54 = vsel %vm290_vm10, %v561_v53, -inf }
 0x353   :  { %569 = vmax.xlane.f32.xlu0 %v568_v54 }
 0x359   :  { %v563_v55 = vpop.f32.mrf.mxu3  ;;  %v4305_v56 = vpop.f32.mrf.mxu2 }
 0x35a   :  { %v677_v57 = vsel %vm290_vm10, %v4305_v56, -inf }
 0x35b   :  { %678 = vmax.xlane.f32.xlu2 %v677_v57 }
 0x361   :  { %v652_v58 = vpop.f32.mrf.mxu2  ;;  %v673_v59 = vpop.f32.mrf.mxu3 }
 0x362   :  { %v680_v60 = vsel %vm290_vm10, %v673_v59, -inf }
 0x363   :  { %681 = vmax.xlane.f32.xlu1 %v680_v60 }
 0x367   :  { %380 = vrot.lane.b32.xlu0 %v4263_v8, %s5125_s30 }
 0x369   :  { %v675_v61 = vpop.f32.mrf.mxu3 }
 0x373   :  { %477 = vrot.lane.b32.xlu2 %v4257_v0, %s5123_s10 }
 0x37b   :  { %589 = vrot.lane.b32.xlu2 %v4257_v0, %s5121_s6 }
 0x37c   :  { %358 = vrot.lane.b32.xlu1 %v4257_v0, %s5125_s30  ;;  %s5172_s30 = sld [smem:[#allocation9_spill]] }
 0x396   :  { %v336_v62 = vpop.xlane.xlu2 %335 }
 0x397   :  { %v340_v63 = vsub.f32 %v306_v38, %v336_v62 }
 0x399   :  { %v342_v1 = vmul.f32 1.442695, %v340_v63 }
 0x39b   :  { %3895 = vpow2.f32 %v342_v1 }
 0x39f   :  { %v339_v2 = vpop.xlane.xlu1 %338 }
 0x3a0   :  { %v341_v3 = vsub.f32 %v330_v41, %v339_v2 }
 0x3a1   :  { %v4318_v4 = vpop.eup %3895 }
 0x3a2   :  { %v344_v5 = vmul.f32 1.442695, %v341_v3  ;;  %v346_v6 = vsel %vm290_vm10, %v4318_v4, 0.0 }
 0x3a3   :  { %347 = vadd.xlane.f32.xlu0 %v346_v6 }
 0x3a4   :  { %3897 = vpow2.f32 %v344_v5 }
 0x3aa   :  { %v4322_v9 = vpop.eup %3897 }
 0x3ab   :  { %v349_v10 = vsel %vm290_vm10, %v4322_v9, 0.0 }
 0x3ac   :  { %350 = vadd.xlane.f32.xlu2 %v349_v10 }
 0x3ae   :  { %v455_v12 = vpop.xlane.xlu0 %454 }
 0x3af   :  { %v459_v13 = vsub.f32 %v423_v44, %v455_v12 }
 0x3b1   :  { %v461_v14 = vmul.f32 1.442695, %v459_v13 }
 0x3b3   :  { %3899 = vpow2.f32 %v461_v14 }
 0x3b6   :  { %v458_v15 = vpop.xlane.xlu2 %457 }
 0x3b7   :  { %v460_v16 = vsub.f32 %v449_v47, %v458_v15  ;;  %498 = vrot.lane.b32.xlu0 %v4263_v8, %s5123_s10  ;;  %s5176_s10 = smov 112  }
 0x3b9   :  { %v4328_v17 = vpop.eup %3899  ;;  %v463_v18 = vmul.f32 1.442695, %v460_v16 }
 0x3ba   :  { %v465_v20 = vsel %vm290_vm10, %v4328_v17, 0.0 }
 0x3bb   :  { %3901 = vpow2.f32 %v463_v18  ;;  %466 = vadd.xlane.f32.xlu2 %v465_v20 }
 0x3be   :  { %v567_v21 = vpop.xlane.xlu1 %566 }
 0x3bf   :  { %v571_v22 = vsub.f32 %v538_v50, %v567_v21 }
 0x3c1   :  { %v4332_v23 = vpop.eup %3901  ;;  %v573_v24 = vmul.f32 1.442695, %v571_v22 }
 0x3c2   :  { %v468_v25 = vsel %vm290_vm10, %v4332_v23, 0.0 }
 0x3c3   :  { %3903 = vpow2.f32 %v573_v24  ;;  %469 = vadd.xlane.f32.xlu2 %v468_v25 }
 0x3c6   :  { %v570_v28 = vpop.xlane.xlu0 %569 }
 0x3c7   :  { %v572_v29 = vsub.f32 %v561_v53, %v570_v28 }
 0x3c9   :  { %v4336_v26 = vpop.eup %3903  ;;  %v575_v30 = vmul.f32 1.442695, %v572_v29 }
 0x3ca   :  { %v577_v27 = vsel %vm290_vm10, %v4336_v26, 0.0 }
 0x3cb   :  { %578 = vadd.xlane.f32.xlu1 %v577_v27  ;;  %3905 = vpow2.f32 %v575_v30 }
 0x3ce   :  { %v679_v40 = vpop.xlane.xlu2 %678 }
 0x3cf   :  { %v683_v45 = vsub.f32 %v4305_v56, %v679_v40 }
 0x3d1   :  { %v4343_v36 = vpop.eup %3905  ;;  %v685_v46 = vmul.f32 1.442695, %v683_v45 }
 0x3d2   :  { %v580_v37 = vsel %vm290_vm10, %v4343_v36, 0.0 }
 0x3d6   :  { %v682_v31 = vpop.xlane.xlu1 %681  ;;  %v478_v41 = vpop.permute.xlu2 %477 }
 0x3d7   :  { %v684_v32 = vsub.f32 %v673_v59, %v682_v31  ;;  %v483_v44 = vsel %vm363_vm11, %v478_v41, 0 }
 0x3d9   :  { %v687_v33 = vmul.f32 1.442695, %v684_v32  ;;  %v381_v34 = vpop.permute.xlu0 %380 }
 0x3da   :  { %v386_v35 = vsel %vm363_vm11, %v381_v34, 0 }
 0x3db   :  { %3907 = vpow2.f32 %v687_v33  ;;  %610 = vrot.lane.b32.xlu2 %v4263_v8, %s5121_s6  ;;  %395 = vmatpush.bf16.msra.mxu1 %v386_v35  ;;  %s5135_s6 = smov 24  }
 0x3dc   :  { %3909 = vpow2.f32 %v685_v46 }
 0x3de   :  { %v590_v50 = vpop.permute.xlu2 %589 }
 0x3df   :  { %v595_v54 = vsel %vm363_vm11, %v590_v50, 0  ;;  %v3748_v50 = vld [vmem:[%s5171_s13] sm:$0xff] }
 0x3e1   :  { %v4347_v38 = vpop.eup %3907  ;;  %581 = vadd.xlane.f32.xlu0 %v580_v37 }
 0x3e2   :  { %v692_v39 = vsel %vm290_vm10, %v4347_v38, 0.0  ;;  %v4358_v47 = vpop.eup %3909 }
 0x3e3   :  { %693 = vadd.xlane.f32.xlu1 %v692_v39  ;;  %v689_v48 = vsel %vm290_vm10, %v4358_v47, 0.0 }
 0x3ee   :  { %v359_v42 = vpop.permute.xlu1 %358 }
 0x3ef   :  { %v365_v43 = vsel %vm363_vm11, %v359_v42, 0 }
 0x3f0   :  { %374 = vmatpush.bf16.msrb.mxu0 %v365_v43 }
 0x3f4   :  { %492 = vmatpush.bf16.msra.mxu0 %v483_v44 }
 0x3f5   :  { %701 = vrot.lane.b32.xlu0 %v4257_v0, %s5119_s0 }
 0x3fc   :  { %722 = vrot.lane.b32.xlu1 %v4263_v8, %s5119_s0  ;;  %s5137_s0 = smov 16  }
 0x404   :  { %690 = vadd.xlane.f32.xlu2 %v689_v48 }
 0x416   :  { %v348_v49 = vpop.xlane.xlu0 %347 }
 0x417   :  { %3911 = vrcp.f32 %v348_v49  ;;  %v3749_v49 = vld [vmem:[%s5171_s13 + $0x8] sm:$0xff] }
 0x418   :  { %797 = vmatpush.bf16.msra.mxu2 %v3749_v49 }
 0x41c   :  { %798 = vmatpush.bf16.msra.mxu2 %v3748_v50  ;;  %v3872_v50 = vld [vmem:[%s5175_s7] ss:$0 sm:$0xff] }
 0x41d   :  { %v3912_v51 = vpop.eup %3911 }
 0x41e   :  { %v354_v52 = vmul.f32 %v3912_v51, %v4318_v4 }
 0x41f   :  { %v351_v53 = vpop.xlane.xlu2 %350 }
 0x420   :  { %3913 = vrcp.f32 %v351_v53  ;;  %v356_v0 = vpack.c.bf16 %v354_v52, %v354_v52 }
 0x422   :  { %3438 = vmatmul.msk.bf16.vlgmr.msrb.gmra.mxu0 %vm290_vm10, %v356_v0 }
 0x423   :  { %604 = vmatpush.bf16.msrb.mxu0 %v595_v54 }
 0x426   :  { %v3914_v8 = vpop.eup %3913 }
 0x427   :  { %v355_v55 = vmul.f32 %v3914_v8, %v4322_v9 }
 0x429   :  { %v499_v56 = vpop.permute.xlu0 %498  ;;  %v357_v57 = vpack.c.bf16 %v355_v55, %v355_v55 }
 0x42a   :  { %v504_v58 = vsel %vm363_vm11, %v499_v56, 0 }
 0x42b   :  { %3439 = vmatmul.msk.bf16.vlgmr.msra.gmra.mxu1 %vm290_vm10, %v357_v57 }
 0x42c   :  { %513 = vmatpush.bf16.msrb.mxu1 %v504_v58 }
 0x42e   :  { %v467_v59 = vpop.xlane.xlu2 %466 }
 0x42f   :  { %3915 = vrcp.f32 %v467_v59 }
 0x435   :  { %v3916_v60 = vpop.eup %3915 }
 0x436   :  { %v473_v61 = vmul.f32 %v3916_v60, %v4328_v17  ;;  %v470_v62 = vpop.xlane.xlu2 %469 }
 0x437   :  { %3917 = vrcp.f32 %v470_v62 }
 0x438   :  { %v475_v63 = vpack.c.bf16 %v473_v61, %v473_v61 }
 0x43a   :  { %3442 = vmatmul.msk.bf16.vlgmr.msra.gmra.mxu0 %vm290_vm10, %v475_v63 }
 0x43d   :  { %v3918_v1 = vpop.eup %3917 }
 0x43e   :  { %v611_v2 = vpop.permute.xlu2 %610  ;;  %v579_v3 = vpop.xlane.xlu1 %578  ;;  %v474_v4 = vmul.f32 %v3918_v1, %v4332_v23 }
 0x43f   :  { %v616_v5 = vsel %vm363_vm11, %v611_v2, 0  ;;  %3919 = vrcp.f32 %v579_v3  ;;  %v3870_v2 = vld [vmem:[%s5172_s30] ss:$0 sm:$0xff] }
 0x440   :  { %625 = vmatpush.bf16.msra.mxu1 %v616_v5  ;;  %v476_v6 = vpack.c.bf16 %v474_v4, %v474_v4 }
 0x442   :  { %3443 = vmatmul.msk.bf16.vlgmr.msrb.gmra.mxu1 %vm290_vm10, %v476_v6 }
 0x445   :  { %v3920_v9 = vpop.eup %3919 }
 0x446   :  { %v585_v10 = vmul.f32 %v3920_v9, %v4336_v26 }
 0x448   :  { %v587_v12 = vpack.c.bf16 %v585_v10, %v585_v10 }
 0x44a   :  { %3446 = vmatmul.msk.bf16.vlgmr.msrb.gmra.mxu0 %vm290_vm10, %v587_v12 }
 0x454   :  { %v582_v13 = vpop.xlane.xlu0 %581 }
 0x455   :  { %3921 = vrcp.f32 %v582_v13 }
 0x456   :  { %v694_v17 = vpop.xlane.xlu1 %693 }
 0x457   :  { %3923 = vrcp.f32 %v694_v17 }
 0x45b   :  { %v3922_v14 = vpop.eup %3921 }
 0x45c   :  { %v586_v15 = vmul.f32 %v3922_v14, %v4343_v36 }
 0x45d   :  { %v3924_v21 = vpop.eup %3923 }
 0x45e   :  { %v588_v16 = vpack.c.bf16 %v586_v15, %v586_v15  ;;  %v698_v22 = vmul.f32 %v3924_v21, %v4347_v38 }
 0x460   :  { %3447 = vmatmul.msk.bf16.vlgmr.msra.gmra.mxu1 %vm290_vm10, %v588_v16  ;;  %v700_v25 = vpack.c.bf16 %v698_v22, %v698_v22 }
 0x467   :  { %v702_v18 = vpop.permute.xlu0 %701 }
 0x468   :  { %v707_v20 = vsel %vm363_vm11, %v702_v18, 0 }
 0x469   :  { %716 = vmatpush.bf16.msra.mxu0 %v707_v20 }
 0x46e   :  { %v723_v23 = vpop.permute.xlu1 %722 }
 0x46f   :  { %v728_v24 = vsel %vm363_vm11, %v723_v23, 0  ;;  %v3753_v23 = vld [vmem:[%s5173_s3 + $0x8] sm:$0xff] }
 0x470   :  { %737 = vmatpush.bf16.msrb.mxu1 %v728_v24  ;;  %924 = vmatpush.bf16.msrb.mxu0 %v3753_v23  ;;  %v3752_v24 = vld [vmem:[%s5173_s3] sm:$0xff] }
 0x473   :  { %3451 = vmatmul.msk.bf16.vlgmr.msrb.gmra.mxu1 %vm290_vm10, %v700_v25  ;;  %v4427_v25 = vld [vmem:[%s5094_s2] sm:$0xff] }
 0x474   :  { %925 = vmatpush.bf16.msrb.mxu0 %v3752_v24  ;;  %v3755_v24 = vld [vmem:[%s5096_s14 + $0x8] sm:$0xff] }
 0x475   :  { %950 = vmatpush.bf16.msra.mxu1 %v3755_v24 }
 0x477   :  { %v691_v26 = vpop.xlane.xlu2 %690 }
 0x478   :  { %3925 = vrcp.f32 %v691_v26  ;;  %v3751_v26 = vld [vmem:[%s5095_s12 + $0x8] sm:$0xff] }
 0x479   :  { %888 = vmatpush.bf16.msrb.mxu3 %v3751_v26  ;;  %v3754_v26 = vld [vmem:[%s5096_s14] sm:$0xff] }
 0x47a   :  { %951 = vmatpush.bf16.msra.mxu1 %v3754_v26 }
 0x47e   :  { %v3926_v27 = vpop.eup %3925 }
 0x47f   :  { %v697_v28 = vmul.f32 %v3926_v27, %v4358_v47 }
 0x481   :  { %v699_v29 = vpack.c.bf16 %v697_v28, %v697_v28 }
 0x483   :  { %3450 = vmatmul.msk.bf16.vlgmr.msra.gmra.mxu0 %vm290_vm10, %v699_v29  ;;  %v3750_v29 = vld [vmem:[%s5095_s12] sm:$0xff]  ;;  %3491 = vmatmul.msk.bf16.vlgmr.msra.gmra.mxu1 %vm187_vm2, %v4427_v25 }
 0x484   :  { %889 = vmatpush.bf16.msrb.mxu3 %v3750_v29 }
 0x493   :  { %3482 = vmatmul.msk.bf16.vlgmr.msrb.gmra.mxu0 %vm187_vm2, %v4427_v25 }
 0x49f   :  { %v376_v30 = vpop.f32.mrf.mxu0 }
 0x4a7   :  { %v378_v31 = vpop.f32.mrf.mxu0 }
 0x4a8   :  { %v397_v32 = vpop.f32.mrf.mxu1 }
 0x4b0   :  { %v399_v33 = vpop.f32.mrf.mxu1 }
 0x4b7   :  { %v494_v34 = vpop.f32.mrf.mxu0 }
 0x4bf   :  { %v496_v35 = vpop.f32.mrf.mxu0  ;;  %v515_v36 = vpop.f32.mrf.mxu1 }
 0x4c0   :  { %v3805_v37 = vpack.i.bf16 %v515_v36, %v494_v34 }
 0x4c2   :  { %3806 = vrot.lane.b32.xlu0 %v3805_v37, %s5139_s11  ;;  %s5182_s11 = smov 96  }
 0x4c7   :  { %v517_v38 = vpop.f32.mrf.mxu1  ;;  %v606_v39 = vpop.f32.mrf.mxu0 }
 0x4cf   :  { %v608_v40 = vpop.f32.mrf.mxu0 }
 0x4dd   :  { %v627_v41 = vpop.f32.mrf.mxu1 }
 0x4de   :  { %v3810_v42 = vpack.i.bf16 %v627_v41, %v606_v39 }
 0x4e0   :  { %3811 = vrot.lane.b32.xlu1 %v3810_v42, %s5137_s0  ;;  %s5180_s0 = smov 24  }
 0x4e5   :  { %v629_v43 = vpop.f32.mrf.mxu1 }
 0x4f0   :  { %v739_v44 = vpop.f32.mrf.mxu1 }
 0x4f8   :  { %v741_v45 = vpop.f32.mrf.mxu1 }
 0x500   :  { %v718_v46 = vpop.f32.mrf.mxu0 }
 0x501   :  { %v3815_v47 = vpack.i.bf16 %v739_v44, %v718_v46 }
 0x503   :  { %3816 = vrot.lane.b32.xlu0 %v3815_v47, %s5135_s6  ;;  %s5174_s6 = sld [smem:[#allocation11_spill]] }
 0x508   :  { %v720_v48 = vpop.f32.mrf.mxu0 }
 0x509   :  { %v3871_v46 = vld [vmem:[%s5174_s6] ss:$0 sm:$0xff] }
 0x534   :  { %v3807_v51 = vpop.permute.xlu0 %3806 }
 0x535   :  { %v3809_v53 = vunpack.i.h.bf16 %v3807_v51  ;;  %v3808_v0 = vunpack.i.l.bf16 %v3807_v51 }
 0x537   :  { %v768_v56 = vsel %vm290_vm10, %v397_v32, %v3809_v53  ;;  %v767_v57 = vsel %vm290_vm10, %v376_v30, %v3808_v0 }
 0x552   :  { %v3812_v52 = vpop.permute.xlu1 %3811 }
 0x553   :  { %v3814_v54 = vunpack.i.h.bf16 %v3812_v52  ;;  %v3813_v8 = vunpack.i.l.bf16 %v3812_v52 }
 0x555   :  { %v771_v60 = vsel %vm769_vm12, %v768_v56, %v3814_v54  ;;  %v770_v61 = vsel %vm769_vm12, %v767_v57, %v3813_v8 }
 0x575   :  { %v3817_v55 = vpop.permute.xlu0 %3816 }
 0x576   :  { %v3819_v58 = vunpack.i.h.bf16 %v3817_v55  ;;  %v3818_v59 = vunpack.i.l.bf16 %v3817_v55  ;;  %v927_v55 = vpop.f32.mrf.mxu0 }
 0x577   :  { %v960_v56 = vpack.c.bf16 %v927_v55, %v927_v55 }
 0x578   :  { %v773_v62 = vsel %vm772_vm13, %v770_v61, %v3818_v59  ;;  %v774_v63 = vsel %vm772_vm13, %v771_v60, %v3819_v58 }
 0x579   :  { %v775_v1 = vpack.c.bf16 %v774_v63, %v773_v62  ;;  %v968_v57 = vsel %vm290_vm10, %v960_v56, 0  ;;  %v1070_v58 = vunpack.c.l.b16 %v960_v56 }
 0x57a   :  { %977 = vmatpush.bf16.xpose.msrb.mxu2 %v968_v57 }
 0x57b   :  { %3460 = vmatmul.msk.bf16.vlgmr.msra.gmra.mxu2 %vm187_vm2, %v775_v1  ;;  %v1071_v59 = vpack.c.b16 %v1070_v58, %v1070_v58 }
 0x57e   :  { %v929_v60 = vpop.f32.mrf.mxu0 }
 0x57f   :  { %v961_v61 = vpack.c.bf16 %v929_v60, %v929_v60 }
 0x581   :  { %v1099_v62 = vunpack.c.l.b16 %v961_v61  ;;  %v987_v1 = vsel %vm290_vm10, %v961_v61, 0 }
 0x582   :  { %996 = vmatpush.bf16.xpose.msra.mxu3 %v987_v1 }
 0x583   :  { %v1100_v63 = vpack.c.b16 %v1099_v62, %v1099_v62 }
 0x5fe   :  { %v800_v3 = vpop.f32.mrf.mxu2 }
 0x5ff   :  { %v805_v4 = vadd.f32 %v800_v3, %v4226_v7 }
 0x601   :  { %v4403_v5 = vadd.f32 %v3870_v2, %v805_v4 }
 0x603   :  { %v812_v6 = vsel %vm187_vm2, %v4403_v5, 0.0 }
 0x604   :  { %813 = vadd.xlane.f32.xlu2 %v812_v6 }
 0x606   :  { %v802_v9 = vpop.f32.mrf.mxu2 }
 0x607   :  { %v806_v10 = vadd.f32 %v802_v9, %v4230_v11 }
 0x609   :  { %v4408_v12 = vadd.f32 %v3870_v2, %v806_v10 }
 0x60b   :  { %v815_v13 = vsel %vm187_vm2, %v4408_v12, 0.0 }
 0x60c   :  { %816 = vadd.xlane.f32.xlu1 %v815_v13 }
 0x677   :  { %v814_v14 = vpop.xlane.xlu2 %813 }
 0x678   :  { %v818_v15 = vmul.f32 %v814_v14, %v4234_v19 }
 0x67a   :  { %v820_v7 = vsub.f32 %v4403_v5, %v818_v15 }
 0x67c   :  { %v822_v16 = vmul.f32 %v820_v7, %v820_v7 }
 0x67e   :  { %v824_v17 = vsel %vm187_vm2, %v822_v16, 0.0 }
 0x67f   :  { %825 = vadd.xlane.f32.xlu0 %v824_v17  ;;  %v817_v18 = vpop.xlane.xlu1 %816 }
 0x680   :  { %v819_v20 = vmul.f32 %v817_v18, %v4234_v19 }
 0x682   :  { %v821_v11 = vsub.f32 %v4408_v12, %v819_v20 }
 0x684   :  { %v823_v21 = vmul.f32 %v821_v11, %v821_v11 }
 0x686   :  { %v827_v22 = vsel %vm187_vm2, %v823_v21, 0.0 }
 0x687   :  { %828 = vadd.xlane.f32.xlu2 %v827_v22 }
 0x69f   :  { %1072 = vrot.lane.b32.xlu2 %v1071_v59, %s5145_s9 }
 0x6a7   :  { %1101 = vrot.lane.b32.xlu2 %v1100_v63, %s5145_s9 }
 0x6af   :  { %1196 = vrot.lane.b32.xlu2 %v1071_v59, %s5176_s10 }
 0x6b7   :  { %1219 = vrot.lane.b32.xlu2 %v1100_v63, %s5176_s10 }
 0x6f2   :  { %v826_v27 = vpop.xlane.xlu0 %825 }
 0x6f3   :  { %v830_v28 = vmul.f32 %v826_v27, %v4234_v19 }
 0x6f5   :  { %v832_v30 = vadd.f32 1e-05, %v830_v28 }
 0x6f7   :  { %3927 = vrsqrt.f32 %v832_v30  ;;  %vm840_vm15 = vweird.f32 %v832_v30 }
 0x6fa   :  { %v829_v31 = vpop.xlane.xlu2 %828 }
 0x6fb   :  { %v831_v32 = vmul.f32 %v829_v31, %v4234_v19 }
 0x6fd   :  { %v3928_v33 = vpop.eup %3927  ;;  %v833_v34 = vadd.f32 1e-05, %v831_v32 }
 0x6fe   :  { %v835_v35 = vmul.f32 %v3928_v33, %v832_v30  ;;  %vm841_vm14 = vweird.f32 %v3928_v33 }
 0x6ff   :  { %3929 = vrsqrt.f32 %v833_v34  ;;  %vm842_vm0 = vmor %vm840_vm15, %vm841_vm14  ;;  %vm850_vm3 = vweird.f32 %v833_v34 }
 0x700   :  { %v836_v36 = vmul.f32 %v3928_v33, %v835_v35 }
 0x702   :  { %v837_v37 = vmul.f32 0.5, %v836_v36  ;;  %v1073_v16 = vpop.permute.xlu2 %1072 }
 0x703   :  { %v1078_v17 = vsel %vm290_vm10, %v1073_v16, 0 }
 0x704   :  { %v838_v38 = vsub.f32 1.5, %v837_v37  ;;  %1087 = vmatpush.bf16.xpose.msra.mxu2 %v1078_v17 }
 0x705   :  { %v3930_v39 = vpop.eup %3929 }
 0x706   :  { %v839_v40 = vmul.f32 %v3928_v33, %v838_v38  ;;  %v845_v41 = vmul.f32 %v3930_v39, %v833_v34  ;;  %vm851_vm1 = vweird.f32 %v3930_v39 }
 0x707   :  { %vm852_vm4 = vmor %vm850_vm3, %vm851_vm1 }
 0x708   :  { %v846_v42 = vmul.f32 %v3930_v39, %v845_v41  ;;  %v843_v43 = vsel %vm842_vm0, %v3928_v33, %v839_v40 }
 0x709   :  { %v854_v47 = vmul.f32 %v843_v43, %v820_v7 }
 0x70a   :  { %v847_v44 = vmul.f32 0.5, %v846_v42  ;;  %v1102_v18 = vpop.permute.xlu2 %1101  ;;  %v953_v42 = vpop.f32.mrf.mxu1 }
 0x70b   :  { %v859_v51 = vmul.f32 %v3871_v46, %v854_v47  ;;  %v1107_v20 = vsel %vm290_vm10, %v1102_v18, 0  ;;  %v962_v43 = vpack.c.bf16 %v953_v42, %v953_v42 }
 0x70c   :  { %v848_v45 = vsub.f32 1.5, %v847_v44 }
 0x70d   :  { %v864_v0 = vadd.f32 %v3872_v50, %v859_v51  ;;  %v1030_v44 = vsel %vm363_vm11, %v962_v43, 0 }
 0x70e   :  { %v849_v48 = vmul.f32 %v3930_v39, %v848_v45  ;;  %1039 = vmatpush.bf16.msra.mxu0 %v1030_v44 }
 0x710   :  { %v853_v49 = vsel %vm852_vm4, %v3930_v39, %v849_v48 }
 0x711   :  { %v855_v52 = vmul.f32 %v853_v49, %v821_v11 }
 0x712   :  { %v1197_v11 = vpop.permute.xlu2 %1196  ;;  %v955_v45 = vpop.f32.mrf.mxu1 }
 0x713   :  { %v860_v53 = vmul.f32 %v3871_v46, %v855_v52  ;;  %v1202_v21 = vsel %vm290_vm10, %v1197_v11, 0  ;;  %v963_v46 = vpack.c.bf16 %v955_v45, %v955_v45 }
 0x715   :  { %v865_v54 = vadd.f32 %v3872_v50, %v860_v53  ;;  %v1049_v47 = vsel %vm363_vm11, %v963_v46, 0 }
 0x716   :  { %1058 = vmatpush.bf16.msrb.mxu1 %v1049_v47 }
 0x717   :  { %v866_v8 = vpack.c.bf16 %v865_v54, %v864_v0 }
 0x719   :  { %3469 = vmatmul.msk.bf16.vlgmr.msrb.gmra.mxu3 %vm187_vm2, %v866_v8 }
 0x71a   :  { %1116 = vmatpush.bf16.xpose.msrb.mxu3 %v1107_v20  ;;  %v1220_v22 = vpop.permute.xlu2 %1219 }
 0x71b   :  { %v1225_v23 = vsel %vm290_vm10, %v1220_v22, 0 }
 0x79c   :  { %v891_v2 = vpop.f32.mrf.mxu3 }
 0x79d   :  { %v896_v3 = vmul.f32 0.35355338, %v891_v2 }
 0x79f   :  { %v958_v4 = vpack.c.bf16 %v896_v3, %v896_v3 }
 0x7a1   :  { %v1065_v6 = vunpack.c.l.b16 %v958_v4  ;;  %3492 = vmatmul.msk.bf16.vlgmr.msrb.gmra.mxu2 %vm290_vm10, %v958_v4  ;;  %v1171_v4 = vunpack.c.l.b16 %v963_v46 }
 0x7a2   :  { %1211 = vmatpush.bf16.xpose.msrb.mxu2 %v1202_v21 }
 0x7a3   :  { %v1066_v9 = vpack.c.b16 %v1065_v6, %v1065_v6 }
 0x7a4   :  { %v893_v10 = vpop.f32.mrf.mxu3 }
 0x7a5   :  { %v897_v13 = vmul.f32 0.35355338, %v893_v10  ;;  %1194 = vrot.lane.b32.xlu2 %v1066_v9, %s5176_s10  ;;  %1067 = vrot.lane.b32.xlu1 %v1066_v9, %s5145_s9 }
 0x7a7   :  { %v959_v14 = vpack.c.bf16 %v897_v13, %v897_v13  ;;  %v4493_v13 = vpack.c.b16 %v1171_v4, %v1171_v4 }
 0x7a9   :  { %v1094_v15 = vunpack.c.l.b16 %v959_v14  ;;  %3493 = vmatmul.msk.bf16.vlgmr.msra.gmra.mxu3 %vm290_vm10, %v959_v14 }
 0x7aa   :  { %1234 = vmatpush.bf16.xpose.msra.mxu3 %v1225_v23 }
 0x7ab   :  { %v1095_v7 = vpack.c.b16 %v1094_v15, %v1094_v15 }
 0x7ad   :  { %1331 = vrot.lane.b32.xlu2 %v1100_v63, %s5177_s1  ;;  %1308 = vrot.lane.b32.xlu1 %v1071_v59, %s5177_s1 }
 0x7ae   :  { %1096 = vrot.lane.b32.xlu0 %v1095_v7, %s5145_s9 }
 0x7b5   :  { %1329 = vrot.lane.b32.xlu1 %v1095_v7, %s5177_s1 }
 0x7b6   :  { %1217 = vrot.lane.b32.xlu0 %v1095_v7, %s5176_s10  ;;  %v1147_v7 = vunpack.c.l.b16 %v962_v43 }
 0x7b8   :  { %v1148_v16 = vpack.c.b16 %v1147_v7, %v1147_v7 }
 0x7be   :  { %1306 = vrot.lane.b32.xlu0 %v1066_v9, %s5177_s1 }
 0x7ff   :  { %v1195_v27 = vpop.permute.xlu2 %1194 }
 0x807   :  { %v1332_v29 = vpop.permute.xlu2 %1331 }
 0x808   :  { %v1337_v33 = vsel %vm290_vm10, %v1332_v29, 0 }
 0x817   :  { %v1068_v28 = vpop.permute.xlu1 %1067 }
 0x818   :  { %3496 = vmatmul.msk.bf16.vlgmr.msra.gmra.mxu2 %vm290_vm10, %v1068_v28 }
 0x81f   :  { %v1309_v30 = vpop.permute.xlu1 %1308 }
 0x820   :  { %v1314_v31 = vsel %vm290_vm10, %v1309_v30, 0  ;;  %v1097_v32 = vpop.permute.xlu0 %1096 }
 0x821   :  { %3497 = vmatmul.msk.bf16.vlgmr.msrb.gmra.mxu3 %vm290_vm10, %v1097_v32  ;;  %1323 = vmatpush.bf16.xpose.msra.mxu2 %v1314_v31 }
 0x822   :  { %1346 = vmatpush.bf16.xpose.msrb.mxu3 %v1337_v33 }
 0x824   :  { %v979_v34 = vpop.f32.mrf.mxu2 }
 0x825   :  { %v1002_v35 = vsel %vm290_vm10, %v979_v34, -inf }
 0x826   :  { %1003 = vmax.xlane.f32.xlu2 %v1002_v35 }
 0x827   :  { %v1330_v41 = vpop.permute.xlu1 %1329 }
 0x828   :  { %3500 = vmatmul.msk.bf16.vlgmr.msrb.gmra.mxu2 %vm290_vm10, %v1195_v27  ;;  %v1218_v37 = vpop.permute.xlu0 %1217 }
 0x82c   :  { %v981_v25 = vpop.f32.mrf.mxu2  ;;  %v998_v36 = vpop.f32.mrf.mxu3 }
 0x82d   :  { %v1005_v38 = vsel %vm290_vm10, %v998_v36, -inf }
 0x82e   :  { %1006 = vmax.xlane.f32.xlu0 %v1005_v38 }
 0x830   :  { %v1307_v40 = vpop.permute.xlu0 %1306 }
 0x831   :  { %3501 = vmatmul.msk.bf16.vlgmr.msra.gmra.mxu3 %vm290_vm10, %v1218_v37 }
 0x834   :  { %v1000_v39 = vpop.f32.mrf.mxu3 }
 0x838   :  { %3504 = vmatmul.msk.bf16.vlgmr.msra.gmra.mxu2 %vm290_vm10, %v1307_v40 }
 0x841   :  { %3505 = vmatmul.msk.bf16.vlgmr.msrb.gmra.mxu3 %vm290_vm10, %v1330_v41 }
 0x899   :  { %v1004_v48 = vpop.xlane.xlu2 %1003 }
 0x89a   :  { %v1008_v50 = vsub.f32 %v979_v34, %v1004_v48 }
 0x89b   :  { %v1089_v49 = vpop.f32.mrf.mxu2 }
 0x89c   :  { %v1122_v51 = vsel %vm290_vm10, %v1089_v49, -inf  ;;  %v1010_v52 = vmul.f32 1.442695, %v1008_v50 }
 0x89d   :  { %1123 = vmax.xlane.f32.xlu1 %v1122_v51 }
 0x89e   :  { %3931 = vpow2.f32 %v1010_v52 }
 0x8a1   :  { %v1007_v53 = vpop.xlane.xlu0 %1006 }
 0x8a2   :  { %v1009_v0 = vsub.f32 %v998_v36, %v1007_v53 }
 0x8a3   :  { %v1091_v54 = vpop.f32.mrf.mxu2 }
 0x8a4   :  { %v1012_v8 = vmul.f32 1.442695, %v1009_v0  ;;  %v1118_v55 = vpop.f32.mrf.mxu3  ;;  %v3932_v57 = vpop.eup %3931 }
 0x8a5   :  { %v1125_v56 = vsel %vm290_vm10, %v1118_v55, -inf  ;;  %v1014_v62 = vsel %vm290_vm10, %v3932_v57, 0.0 }
 0x8a6   :  { %3933 = vpow2.f32 %v1012_v8  ;;  %1126 = vmax.xlane.f32.xlu2 %v1125_v56 }
 0x8ab   :  { %v1213_v58 = vpop.f32.mrf.mxu2 }
 0x8ac   :  { %v3934_v59 = vpop.eup %3933  ;;  %v1120_v60 = vpop.f32.mrf.mxu3  ;;  %v1240_v61 = vsel %vm290_vm10, %v1213_v58, -inf }
 0x8ad   :  { %1241 = vmax.xlane.f32.xlu0 %v1240_v61  ;;  %v1017_v63 = vsel %vm290_vm10, %v3934_v59, 0.0 }
 0x8ae   :  { %1015 = vadd.xlane.f32.xlu2 %v1014_v62  ;;  %1018 = vadd.xlane.f32.xlu1 %v1017_v63 }
 0x8b3   :  { %v1215_v1 = vpop.f32.mrf.mxu2 }
 0x8b4   :  { %v1236_v2 = vpop.f32.mrf.mxu3 }
 0x8b5   :  { %v1243_v3 = vsel %vm290_vm10, %v1236_v2, -inf }
 0x8b6   :  { %1244 = vmax.xlane.f32.xlu2 %v1243_v3 }
 0x8bb   :  { %v1325_v6 = vpop.f32.mrf.mxu2 }
 0x8bc   :  { %v1238_v9 = vpop.f32.mrf.mxu3  ;;  %v1352_v10 = vsel %vm290_vm10, %v1325_v6, -inf }
 0x8bd   :  { %1353 = vmax.xlane.f32.xlu1 %v1352_v10 }
 0x8c1   :  { %1173 = vrot.lane.b32.xlu0 %v4493_v13, %s5145_s9 }
 0x8c3   :  { %v1327_v14 = vpop.f32.mrf.mxu2 }
 0x8c4   :  { %v4497_v15 = vpop.f32.mrf.mxu3 }
 0x8c5   :  { %v1355_v18 = vsel %vm290_vm10, %v4497_v15, -inf }
 0x8cc   :  { %v1350_v17 = vpop.f32.mrf.mxu3 }
 0x8ce   :  { %1264 = vrot.lane.b32.xlu2 %v1148_v16, %s5176_s10 }
 0x8d6   :  { %1149 = vrot.lane.b32.xlu1 %v1148_v16, %s5145_s9  ;;  %s5189_s9 = smov 40  }
 0x8eb   :  { %1356 = vmax.xlane.f32.xlu0 %v1355_v18 }
 0x910   :  { %v1124_v20 = vpop.xlane.xlu1 %1123 }
 0x911   :  { %v1128_v11 = vsub.f32 %v1089_v49, %v1124_v20 }
 0x913   :  { %v1130_v21 = vmul.f32 1.442695, %v1128_v11 }
 0x915   :  { %3935 = vpow2.f32 %v1130_v21 }
 0x919   :  { %v1127_v22 = vpop.xlane.xlu2 %1126 }
 0x91a   :  { %v1129_v23 = vsub.f32 %v1118_v55, %v1127_v22 }
 0x91b   :  { %v4503_v24 = vpop.eup %3935 }
 0x91c   :  { %v1132_v26 = vmul.f32 1.442695, %v1129_v23  ;;  %v1134_v27 = vsel %vm290_vm10, %v4503_v24, 0.0 }
 0x91d   :  { %1135 = vadd.xlane.f32.xlu0 %v1134_v27 }
 0x91e   :  { %3937 = vpow2.f32 %v1132_v26 }
 0x920   :  { %v1242_v28 = vpop.xlane.xlu0 %1241 }
 0x921   :  { %v1246_v29 = vsub.f32 %v1213_v58, %v1242_v28  ;;  %v1016_v30 = vpop.xlane.xlu2 %1015  ;;  %v1019_v31 = vpop.xlane.xlu1 %1018 }
 0x922   :  { %3939 = vrcp.f32 %v1016_v30 }
 0x923   :  { %v1248_v32 = vmul.f32 1.442695, %v1246_v29  ;;  %3941 = vrcp.f32 %v1019_v31 }
 0x924   :  { %v3938_v33 = vpop.eup %3937 }
 0x925   :  { %3943 = vpow2.f32 %v1248_v32  ;;  %v1137_v34 = vsel %vm290_vm10, %v3938_v33, 0.0 }
 0x926   :  { %1138 = vadd.xlane.f32.xlu2 %v1137_v34 }
 0x928   :  { %v3940_v35 = vpop.eup %3939 }
 0x929   :  { %v3942_v25 = vpop.eup %3941  ;;  %v1022_v36 = vmul.f32 %v3940_v35, %v3932_v57  ;;  %v1245_v37 = vpop.xlane.xlu2 %1244 }
 0x92a   :  { %v1023_v38 = vmul.f32 %v3942_v25, %v3934_v59  ;;  %v1247_v39 = vsub.f32 %v1236_v2, %v1245_v37 }
 0x92b   :  { %v3944_v40 = vpop.eup %3943  ;;  %v1024_v41 = vpack.c.bf16 %v1022_v36, %v1022_v36 }
 0x92c   :  { %v1025_v42 = vpack.c.bf16 %v1023_v38, %v1023_v38  ;;  %v1250_v43 = vmul.f32 1.442695, %v1247_v39  ;;  %v1252_v44 = vsel %vm290_vm10, %v3944_v40, 0.0 }
 0x92d   :  { %3494 = vmatmul.msk.bf16.vlgmr.msra.gmra.mxu0 %vm290_vm10, %v1024_v41 }
 0x92e   :  { %3945 = vpow2.f32 %v1250_v43  ;;  %3495 = vmatmul.msk.bf16.vlgmr.msrb.gmra.mxu1 %vm290_vm10, %v1025_v42  ;;  %1253 = vadd.xlane.f32.xlu2 %v1252_v44 }
 0x930   :  { %v1354_v45 = vpop.xlane.xlu1 %1353 }
 0x931   :  { %v1358_v46 = vsub.f32 %v1325_v6, %v1354_v45  ;;  %1285 = vrot.lane.b32.xlu0 %v4493_v13, %s5176_s10  ;;  %v1265_v0 = vpop.permute.xlu2 %1264 }
 0x932   :  { %v1270_v55 = vsel %vm363_vm11, %v1265_v0, 0 }
 0x933   :  { %v1360_v47 = vmul.f32 1.442695, %v1358_v46  ;;  %v1174_v48 = vpop.permute.xlu0 %1173 }
 0x934   :  { %v3946_v49 = vpop.eup %3945  ;;  %v1179_v50 = vsel %vm363_vm11, %v1174_v48, 0 }
 0x935   :  { %3947 = vpow2.f32 %v1360_v47  ;;  %1188 = vmatpush.bf16.msra.mxu1 %v1179_v50  ;;  %v1255_v51 = vsel %vm290_vm10, %v3946_v49, 0.0 }
 0x936   :  { %1256 = vadd.xlane.f32.xlu2 %v1255_v51  ;;  %v3757_v51 = vld [vmem:[%s5098_s15 + $0x8] sm:$0xff] }
 0x937   :  { %1470 = vmatpush.bf16.msrb.mxu2 %v3757_v51 }
 0x93b   :  { %v3948_v52 = vpop.eup %3947 }
 0x93c   :  { %v1364_v53 = vsel %vm290_vm10, %v3948_v52, 0.0 }
 0x93d   :  { %1365 = vadd.xlane.f32.xlu1 %v1364_v53 }
 0x948   :  { %v1150_v54 = vpop.permute.xlu1 %1149 }
 0x949   :  { %v1155_v8 = vsel %vm363_vm11, %v1150_v54, 0 }
 0x94a   :  { %1164 = vmatpush.bf16.msrb.mxu0 %v1155_v8 }
 0x94e   :  { %1279 = vmatpush.bf16.msra.mxu0 %v1270_v55  ;;  %1376 = vrot.lane.b32.xlu2 %v1148_v16, %s5177_s1 }
 0x956   :  { %1397 = vrot.lane.b32.xlu2 %v4493_v13, %s5177_s1 }
 0x95e   :  { %v1357_v56 = vpop.xlane.xlu0 %1356 }
 0x95f   :  { %v1359_v57 = vsub.f32 %v4497_v15, %v1357_v56 }
 0x961   :  { %v1362_v58 = vmul.f32 1.442695, %v1359_v57 }
 0x963   :  { %3949 = vpow2.f32 %v1362_v58 }
 0x969   :  { %v3950_v59 = vpop.eup %3949 }
 0x96a   :  { %v1367_v60 = vsel %vm290_vm10, %v3950_v59, 0.0 }
 0x96b   :  { %1368 = vadd.xlane.f32.xlu0 %v1367_v60 }
 0x990   :  { %v1136_v61 = vpop.xlane.xlu0 %1135 }
 0x991   :  { %3951 = vrcp.f32 %v1136_v61 }
 0x997   :  { %v3952_v62 = vpop.eup %3951 }
 0x998   :  { %v1142_v63 = vmul.f32 %v3952_v62, %v4503_v24 }
 0x999   :  { %v1139_v1 = vpop.xlane.xlu2 %1138 }
 0x99a   :  { %v1144_v2 = vpack.c.bf16 %v1142_v63, %v1142_v63  ;;  %3953 = vrcp.f32 %v1139_v1 }
 0x99c   :  { %3498 = vmatmul.msk.bf16.vlgmr.msrb.gmra.mxu0 %vm290_vm10, %v1144_v2 }
 0x9a0   :  { %v3954_v3 = vpop.eup %3953 }
 0x9a1   :  { %v1143_v4 = vmul.f32 %v3954_v3, %v3938_v33  ;;  %v1254_v6 = vpop.xlane.xlu2 %1253 }
 0x9a2   :  { %3955 = vrcp.f32 %v1254_v6 }
 0x9a3   :  { %v1145_v9 = vpack.c.bf16 %v1143_v4, %v1143_v4  ;;  %v1286_v10 = vpop.permute.xlu0 %1285  ;;  %v3873_v4 = vld [vmem:[%s5097_s16] ss:$0 sm:$0xff] }
 0x9a4   :  { %v1291_v13 = vsel %vm363_vm11, %v1286_v10, 0 }
 0x9a5   :  { %3499 = vmatmul.msk.bf16.vlgmr.msra.gmra.mxu1 %vm290_vm10, %v1145_v9 }
 0x9a6   :  { %1300 = vmatpush.bf16.msrb.mxu1 %v1291_v13 }
 0x9a8   :  { %v3956_v14 = vpop.eup %3955 }
 0x9a9   :  { %v1260_v15 = vmul.f32 %v3956_v14, %v3944_v40  ;;  %v1257_v7 = vpop.xlane.xlu2 %1256 }
 0x9aa   :  { %3957 = vrcp.f32 %v1257_v7  ;;  %v1041_v16 = vpop.f32.mrf.mxu0 }
 0x9ab   :  { %v1262_v17 = vpack.c.bf16 %v1260_v15, %v1260_v15  ;;  %v1060_v18 = vpop.f32.mrf.mxu1 }
 0x9ad   :  { %3502 = vmatmul.msk.bf16.vlgmr.msra.gmra.mxu0 %vm290_vm10, %v1262_v17 }
 0x9b0   :  { %v3958_v20 = vpop.eup %3957  ;;  %v1366_v11 = vpop.xlane.xlu1 %1365 }
 0x9b1   :  { %v1261_v21 = vmul.f32 %v3958_v20, %v3946_v49  ;;  %3959 = vrcp.f32 %v1366_v11  ;;  %v1377_v22 = vpop.permute.xlu2 %1376 }
 0x9b2   :  { %v1382_v23 = vsel %vm363_vm11, %v1377_v22, 0  ;;  %v1043_v24 = vpop.f32.mrf.mxu0 }
 0x9b3   :  { %v1263_v26 = vpack.c.bf16 %v1261_v21, %v1261_v21  ;;  %v1062_v27 = vpop.f32.mrf.mxu1  ;;  %1391 = vmatpush.bf16.msrb.mxu0 %v1382_v23 }
 0x9b4   :  { %v3759_v27 = vld [vmem:[%s5102_s19 + $0x8] sm:$0xff] }
 0x9b5   :  { %3503 = vmatmul.msk.bf16.vlgmr.msrb.gmra.mxu1 %vm290_vm10, %v1263_v26  ;;  %1564 = vmatpush.bf16.msra.mxu3 %v3759_v27  ;;  %v3762_v27 = vld [vmem:[%s5104_s21 + $0x10] sm:$0xff] }
 0x9b7   :  { %v3960_v28 = vpop.eup %3959 }
 0x9b8   :  { %v1372_v29 = vmul.f32 %v3960_v28, %v3948_v52  ;;  %v3756_v52 = vld [vmem:[%s5098_s15] sm:$0xff] }
 0x9b9   :  { %v1398_v30 = vpop.permute.xlu2 %1397  ;;  %1471 = vmatpush.bf16.msrb.mxu2 %v3756_v52 }
 0x9ba   :  { %v1374_v31 = vpack.c.bf16 %v1372_v29, %v1372_v29  ;;  %v1403_v32 = vsel %vm363_vm11, %v1398_v30, 0  ;;  %v3758_v30 = vld [vmem:[%s5102_s19] sm:$0xff] }
 0x9bb   :  { %1412 = vmatpush.bf16.msra.mxu1 %v1403_v32  ;;  %1565 = vmatpush.bf16.msra.mxu3 %v3758_v30 }
 0x9bd   :  { %3506 = vmatmul.msk.bf16.vlgmr.msrb.gmra.mxu0 %vm290_vm10, %v1374_v31 }
 0x9de   :  { %v1369_v33 = vpop.xlane.xlu0 %1368 }
 0x9df   :  { %3961 = vrcp.f32 %v1369_v33 }
 0x9e5   :  { %v3962_v34 = vpop.eup %3961 }
 0x9e6   :  { %v1373_v35 = vmul.f32 %v3962_v34, %v3950_v59 }
 0x9e8   :  { %v1375_v25 = vpack.c.bf16 %v1373_v35, %v1373_v35 }
 0x9ea   :  { %3507 = vmatmul.msk.bf16.vlgmr.msra.gmra.mxu1 %vm290_vm10, %v1375_v25 }
 0xa19   :  { %v1166_v36 = vpop.f32.mrf.mxu0 }
 0xa21   :  { %v1168_v37 = vpop.f32.mrf.mxu0 }
 0xa22   :  { %v1190_v38 = vpop.f32.mrf.mxu1 }
 0xa23   :  { %v3820_v39 = vpack.i.bf16 %v1190_v38, %v1166_v36 }
 0xa25   :  { %3821 = vrot.lane.b32.xlu2 %v3820_v39, %s5178_s4 }
 0xa2a   :  { %v1192_v40 = vpop.f32.mrf.mxu1  ;;  %v1281_v41 = vpop.f32.mrf.mxu0 }
 0xa32   :  { %v1283_v42 = vpop.f32.mrf.mxu0  ;;  %v1302_v43 = vpop.f32.mrf.mxu1 }
 0xa33   :  { %v3825_v44 = vpack.i.bf16 %v1302_v43, %v1281_v41 }
 0xa35   :  { %3826 = vrot.lane.b32.xlu1 %v3825_v44, %s5179_s8 }
 0xa3a   :  { %v1304_v45 = vpop.f32.mrf.mxu1  ;;  %v1393_v46 = vpop.f32.mrf.mxu0 }
 0xa3b   :  { %v3874_v45 = vld [vmem:[%s5099_s17] ss:$0 sm:$0xff] }
 0xa42   :  { %v1395_v47 = vpop.f32.mrf.mxu0 }
 0xa67   :  { %v1414_v48 = vpop.f32.mrf.mxu1 }
 0xa68   :  { %v3830_v49 = vpack.i.bf16 %v1414_v48, %v1393_v46 }
 0xa6a   :  { %3831 = vrot.lane.b32.xlu2 %v3830_v49, %s5180_s0  ;;  %v3875_v49 = vld [vmem:[%s5100_s18] ss:$0 sm:$0xff] }
 0xa6f   :  { %v1416_v50 = vpop.f32.mrf.mxu1 }
 0xa7f   :  { %v3822_v53 = vpop.permute.xlu2 %3821 }
 0xa80   :  { %v3824_v54 = vunpack.i.h.bf16 %v3822_v53  ;;  %v3823_v8 = vunpack.i.l.bf16 %v3822_v53 }
 0xa82   :  { %v1443_v58 = vsel %vm290_vm10, %v1060_v18, %v3824_v54  ;;  %v1442_v59 = vsel %vm290_vm10, %v1041_v16, %v3823_v8  ;;  %v3876_v8 = vld [vmem:[%s5101_s20] ss:$0 sm:$0xff] }
 0xaa7   :  { %v3827_v0 = vpop.permute.xlu1 %3826 }
 0xaa8   :  { %v3829_v55 = vunpack.i.h.bf16 %v3827_v0  ;;  %v3828_v56 = vunpack.i.l.bf16 %v3827_v0 }
 0xaaa   :  { %v1445_v62 = vsel %vm769_vm12, %v1443_v58, %v3829_v55  ;;  %v1444_v63 = vsel %vm769_vm12, %v1442_v59, %v3828_v56 }
 0xac4   :  { %v3832_v57 = vpop.permute.xlu2 %3831 }
 0xac5   :  { %v3834_v60 = vunpack.i.h.bf16 %v3832_v57  ;;  %v3833_v61 = vunpack.i.l.bf16 %v3832_v57  ;;  %v3767_v57 = vld [vmem:[%s5104_s21 + $0x38] sm:$0xff] }
 0xac6   :  { %1709 = vmatpush.bf16.msra.mxu0 %v3767_v57 }
 0xac7   :  { %v1447_v1 = vsel %vm772_vm13, %v1445_v62, %v3834_v60  ;;  %v1446_v2 = vsel %vm772_vm13, %v1444_v63, %v3833_v61  ;;  %v3766_v60 = vld [vmem:[%s5104_s21 + $0x30] sm:$0xff] }
 0xac8   :  { %v1448_v3 = vpack.c.bf16 %v1447_v1, %v1446_v2 }
 0xaca   :  { %3516 = vmatmul.msk.bf16.vlgmr.msrb.gmra.mxu2 %vm187_vm2, %v1448_v3  ;;  %1710 = vmatpush.bf16.msra.mxu0 %v3766_v60  ;;  %v3765_v3 = vld [vmem:[%s5104_s21 + $0x28] sm:$0xff] }
 0xace   :  { %1711 = vmatpush.bf16.msra.mxu0 %v3765_v3 }
 0xb4d   :  { %v1473_v6 = vpop.f32.mrf.mxu2 }
 0xb4e   :  { %v1478_v9 = vadd.f32 %v1473_v6, %v4403_v5 }
 0xb50   :  { %v4553_v10 = vadd.f32 %v3873_v4, %v1478_v9 }
 0xb52   :  { %v1485_v13 = vsel %vm187_vm2, %v4553_v10, 0.0 }
 0xb53   :  { %1486 = vadd.xlane.f32.xlu0 %v1485_v13 }
 0xb55   :  { %v1475_v14 = vpop.f32.mrf.mxu2 }
 0xb56   :  { %v1479_v15 = vadd.f32 %v1475_v14, %v4408_v12  ;;  %v3764_v14 = vld [vmem:[%s5104_s21 + $0x20] sm:$0xff] }
 0xb57   :  { %1712 = vmatpush.bf16.msra.mxu0 %v3764_v14 }
 0xb58   :  { %v4558_v7 = vadd.f32 %v3873_v4, %v1479_v15 }
 0xb5a   :  { %v1488_v16 = vsel %vm187_vm2, %v4558_v7, 0.0 }
 0xb5b   :  { %1489 = vadd.xlane.f32.xlu2 %v1488_v16 }
 0xbc6   :  { %v1487_v17 = vpop.xlane.xlu0 %1486 }
 0xbc7   :  { %v1491_v18 = vmul.f32 %v1487_v17, %v4234_v19 }
 0xbc9   :  { %v1493_v5 = vsub.f32 %v4553_v10, %v1491_v18 }
 0xbcb   :  { %v1495_v20 = vmul.f32 %v1493_v5, %v1493_v5 }
 0xbcd   :  { %v1497_v11 = vsel %vm187_vm2, %v1495_v20, 0.0  ;;  %v3763_v20 = vld [vmem:[%s5104_s21 + $0x18] sm:$0xff] }
 0xbce   :  { %1498 = vadd.xlane.f32.xlu0 %v1497_v11  ;;  %v1490_v21 = vpop.xlane.xlu2 %1489  ;;  %1713 = vmatpush.bf16.msra.mxu0 %v3763_v20 }
 0xbcf   :  { %v1492_v22 = vmul.f32 %v1490_v21, %v4234_v19 }
 0xbd1   :  { %v1494_v12 = vsub.f32 %v4558_v7, %v1492_v22 }
 0xbd2   :  { %1714 = vmatpush.bf16.msra.mxu0 %v3762_v27 }
 0xbd3   :  { %v1496_v23 = vmul.f32 %v1494_v12, %v1494_v12 }
 0xbd5   :  { %v1500_v24 = vsel %vm187_vm2, %v1496_v23, 0.0 }
 0xbd6   :  { %1501 = vadd.xlane.f32.xlu0 %v1500_v24 }
 0xc41   :  { %v1499_v26 = vpop.xlane.xlu0 %1498 }
 0xc42   :  { %v1503_v28 = vmul.f32 %v1499_v26, %v4234_v19 }
 0xc44   :  { %v1505_v29 = vadd.f32 1e-05, %v1503_v28 }
 0xc46   :  { %3963 = vrsqrt.f32 %v1505_v29  ;;  %vm1513_vm6 = vweird.f32 %v1505_v29 }
 0xc49   :  { %v1502_v31 = vpop.xlane.xlu0 %1501 }
 0xc4a   :  { %v1504_v32 = vmul.f32 %v1502_v31, %v4234_v19 }
 0xc4c   :  { %v3964_v33 = vpop.eup %3963  ;;  %v1506_v34 = vadd.f32 1e-05, %v1504_v32 }
 0xc4d   :  { %v1508_v35 = vmul.f32 %v3964_v33, %v1505_v29  ;;  %vm1514_vm5 = vweird.f32 %v3964_v33 }
 0xc4e   :  { %3965 = vrsqrt.f32 %v1506_v34  ;;  %vm1515_vm7 = vmor %vm1513_vm6, %vm1514_vm5  ;;  %vm1523_vm9 = vweird.f32 %v1506_v34 }
 0xc4f   :  { %v1509_v25 = vmul.f32 %v3964_v33, %v1508_v35  ;;  %v3761_v35 = vld [vmem:[%s5104_s21 + $0x8] sm:$0xff] }
 0xc50   :  { %1715 = vmatpush.bf16.msra.mxu0 %v3761_v35 }
 0xc51   :  { %v1510_v36 = vmul.f32 0.5, %v1509_v25 }
 0xc53   :  { %v1511_v37 = vsub.f32 1.5, %v1510_v36 }
 0xc54   :  { %v3966_v38 = vpop.eup %3965 }
 0xc55   :  { %v1512_v39 = vmul.f32 %v3964_v33, %v1511_v37  ;;  %v1518_v40 = vmul.f32 %v3966_v38, %v1506_v34  ;;  %vm1524_vm8 = vweird.f32 %v3966_v38 }
 0xc56   :  { %vm1525_vm14 = vmor %vm1523_vm9, %vm1524_vm8 }
 0xc57   :  { %v1519_v41 = vmul.f32 %v3966_v38, %v1518_v40  ;;  %v1516_v42 = vsel %vm1515_vm7, %v3964_v33, %v1512_v39  ;;  %v3760_v40 = vld [vmem:[%s5104_s21] sm:$0xff] }
 0xc58   :  { %v1527_v46 = vmul.f32 %v1516_v42, %v1493_v5  ;;  %1716 = vmatpush.bf16.msra.mxu0 %v3760_v40 }
 0xc59   :  { %v1520_v43 = vmul.f32 0.5, %v1519_v41 }
 0xc5a   :  { %v1532_v50 = vmul.f32 %v3874_v45, %v1527_v46 }
 0xc5b   :  { %v1521_v44 = vsub.f32 1.5, %v1520_v43 }
 0xc5c   :  { %v1537_v53 = vadd.f32 %v3875_v49, %v1532_v50 }
 0xc5d   :  { %v1522_v47 = vmul.f32 %v3966_v38, %v1521_v44 }
 0xc5f   :  { %v1526_v48 = vsel %vm1525_vm14, %v3966_v38, %v1522_v47 }
 0xc60   :  { %v1528_v51 = vmul.f32 %v1526_v48, %v1494_v12 }
 0xc62   :  { %v1533_v52 = vmul.f32 %v3874_v45, %v1528_v51 }
 0xc64   :  { %v1538_v0 = vadd.f32 %v3875_v49, %v1533_v52 }
 0xc66   :  { %v1539_v54 = vpack.c.bf16 %v1538_v0, %v1537_v53 }
 0xc68   :  { %3525 = vmatmul.msk.bf16.vlgmr.msra.gmra.mxu3 %vm187_vm2, %v1539_v54 }
 0xceb   :  { %v1567_v55 = vpop.f32.mrf.mxu3 }
 0xcec   :  { %v4586_v56 = vadd.f32 %v3876_v8, %v1567_v55 }
 0xcee   :  { %v4592_v58 = vmul.f32 0.70710677, %v4586_v56 }
 0xcf0   :  { %v1576_v59 = vmul.f32 %v4592_v58, %v4592_v58 }
 0xcf2   :  { %v1577_v61 = vmin.f32 %v1576_v59, 16.0 }
 0xcf3   :  { %v1569_v62 = vpop.f32.mrf.mxu3 }
 0xcf4   :  { %v1578_v63 = vmul.f32 2.1237322e-06, %v1577_v61  ;;  %v1589_v1 = vmul.f32 3.8918573e-05, %v1577_v61  ;;  %v4599_v2 = vadd.f32 %v3876_v8, %v1569_v62 }
 0xcf6   :  { %v1579_v4 = vadd.f32 0.00028619796, %v1578_v63  ;;  %v1590_v6 = vadd.f32 0.001143296, %v1589_v1  ;;  %v4605_v9 = vmul.f32 0.70710677, %v4599_v2 }
 0xcf8   :  { %v1591_v13 = vmul.f32 %v1590_v6, %v1577_v61  ;;  %v1616_v15 = vmul.f32 %v4605_v9, %v4605_v9  ;;  %v1580_v16 = vmul.f32 %v1579_v4, %v1577_v61 }
 0xcfa   :  { %v1592_v17 = vadd.f32 0.014752088, %v1591_v13  ;;  %v1617_v18 = vmin.f32 %v1616_v15, 16.0  ;;  %v1581_v22 = vadd.f32 0.0036580483, %v1580_v16 }
 0xcfc   :  { %v1593_v5 = vmul.f32 %v1592_v17, %v1577_v61  ;;  %v1618_v11 = vmul.f32 2.1237322e-06, %v1617_v18  ;;  %v1629_v21 = vmul.f32 3.8918573e-05, %v1617_v18  ;;  %v1582_v30 = vmul.f32 %v1581_v22, %v1577_v61 }
 0xcfe   :  { %v1594_v12 = vadd.f32 0.112945676, %v1593_v5  ;;  %v1619_v23 = vadd.f32 0.00028619796, %v1618_v11  ;;  %v1630_v24 = vadd.f32 0.001143296, %v1629_v21 }
 0xcff   :  { %v1583_v36 = vadd.f32 0.05243302, %v1582_v30  ;;  %v3877_v30 = vld [vmem:[%s5103_s22] ss:$0 sm:$0xff] }
 0xd00   :  { %v1595_v26 = vmul.f32 %v1594_v12, %v1577_v61  ;;  %v1620_v28 = vmul.f32 %v1619_v23, %v1617_v18  ;;  %v1631_v29 = vmul.f32 %v1630_v24, %v1617_v18  ;;  %v1572_v23 = vmul.f32 0.5, %v4586_v56 }
 0xd01   :  { %v1584_v42 = vmul.f32 %v1583_v36, %v1577_v61  ;;  %v1573_v24 = vmul.f32 0.5, %v4599_v2 }
 0xd02   :  { %v1596_v31 = vadd.f32 0.4994258, %v1595_v26  ;;  %v1621_v32 = vadd.f32 0.0036580483, %v1620_v28  ;;  %v1632_v33 = vadd.f32 0.014752088, %v1631_v29 }
 0xd03   :  { %v1585_v47 = vadd.f32 0.18741608, %v1584_v42 }
 0xd04   :  { %v1597_v34 = vmul.f32 %v1596_v31, %v1577_v61  ;;  %v1633_v25 = vmul.f32 %v1632_v33, %v1617_v18  ;;  %v1622_v38 = vmul.f32 %v1621_v32, %v1617_v18 }
 0xd05   :  { %v1586_v52 = vmul.f32 %v1585_v47, %v1577_v61  ;;  %v3768_v47 = vld [vmem:[%s5168_s5 + $0x10] sm:$0xff] }
 0xd06   :  { %v1598_v37 = vadd.f32 1.0, %v1597_v34  ;;  %v1634_v39 = vadd.f32 0.112945676, %v1633_v25  ;;  %v1623_v43 = vadd.f32 0.05243302, %v1622_v38 }
 0xd07   :  { %v1587_v57 = vadd.f32 1.1283791, %v1586_v52 }
 0xd08   :  { %3967 = vrcp.f32 %v1598_v37  ;;  %v1635_v41 = vmul.f32 %v1634_v39, %v1617_v18  ;;  %v1624_v49 = vmul.f32 %v1623_v43, %v1617_v18  ;;  %v1610_v0 = vand.u32 2147483648, %v1598_v37  ;;  %v3769_v43 = vld [vmem:[%s5168_s5 + $0x18] sm:$0xff]  ;;  %s5186_s5 = smov 64  }
 0xd09   :  { %v1608_v8 = vand.u32 2147483647, %v1598_v37  ;;  %vm1604_vm0 = vweird.f32 %v1598_v37  ;;  %v1588_v4 = vmul.f32 %v1587_v57, %v4592_v58  ;;  %1878 = vmatpush.bf16.msrb.mxu1 %v3769_v43 }
 0xd0a   :  { %v1636_v44 = vadd.f32 0.4994258, %v1635_v41  ;;  %v1625_v54 = vadd.f32 0.18741608, %v1624_v49  ;;  %v1611_v62 = vor.u32 1.1754944e-38, %v1610_v0 }
 0xd0b   :  { %vm1609_vm3 = vcmp.eq.f32.partialorder %v1608_v8, 8.507059e+37 }
 0xd0c   :  { %v1637_v45 = vmul.f32 %v1636_v44, %v1617_v18  ;;  %v1626_v63 = vmul.f32 %v1625_v54, %v1617_v18 }
 0xd0d   :  { %1879 = vmatpush.bf16.msrb.mxu1 %v3768_v47 }
 0xd0e   :  { %v3968_v46 = vpop.eup %3967  ;;  %v1638_v50 = vadd.f32 1.0, %v1637_v45  ;;  %v1627_v61 = vadd.f32 1.1283791, %v1626_v63 }
 0xd0f   :  { %v1600_v48 = vmul.f32 %v3968_v46, %v1598_v37  ;;  %vm1605_vm15 = vweird.f32 %v3968_v46 }
 0xd10   :  { %3969 = vrcp.f32 %v1638_v50  ;;  %vm1606_vm1 = vmor %vm1604_vm0, %vm1605_vm15  ;;  %v1650_v13 = vand.u32 2147483648, %v1638_v50  ;;  %v1648_v16 = vand.u32 2147483647, %v1638_v50  ;;  %vm1644_vm5 = vweird.f32 %v1638_v50 }
 0xd11   :  { %v1601_v51 = vsub.f32 1.0, %v1600_v48  ;;  %v1628_v11 = vmul.f32 %v1627_v61, %v4605_v9  ;;  %v3869_v61 = vld [vmem:[%s5170_s29 + $0x1] ss:$0 sm:$0xff]  ;;  %s5183_s29 = smov 72  }
 0xd12   :  { %v1651_v5 = vor.u32 1.1754944e-38, %v1650_v13  ;;  %vm1649_vm7 = vcmp.eq.f32.partialorder %v1648_v16, 8.507059e+37 }
 0xd13   :  { %v1602_v53 = vmul.f32 %v3968_v46, %v1601_v51 }
 0xd15   :  { %v1603_v55 = vadd.f32 %v3968_v46, %v1602_v53 }
 0xd16   :  { %v3970_v59 = vpop.eup %3969 }
 0xd17   :  { %v1607_v60 = vsel %vm1606_vm1, %v3968_v46, %v1603_v55  ;;  %v1640_v1 = vmul.f32 %v3970_v59, %v1638_v50  ;;  %vm1645_vm4 = vweird.f32 %v3970_v59 }
 0xd18   :  { %v1612_v3 = vsel %vm1609_vm3, %v1611_v62, %v1607_v60  ;;  %vm1646_vm6 = vmor %vm1644_vm5, %vm1645_vm4 }
 0xd19   :  { %v1641_v6 = vsub.f32 1.0, %v1640_v1  ;;  %v1613_v14 = vmul.f32 %v1612_v3, %v1588_v4  ;;  %v3868_v1 = vld [vmem:[%s5169_s28 + $0x1] ss:$0 sm:$0xff]  ;;  %s5181_s28 = smov 88  }
 0xd1b   :  { %v1642_v15 = vmul.f32 %v3970_v59, %v1641_v6  ;;  %v3526_v20 = vclamps-f32 %v1613_v14, 1.0 }
 0xd1d   :  { %v1643_v17 = vadd.f32 %v3970_v59, %v1642_v15  ;;  %v1656_v12 = vadd.f32 1.0, %v3526_v20 }
 0xd1f   :  { %v1647_v18 = vsel %vm1646_vm6, %v3970_v59, %v1643_v17  ;;  %v1658_v27 = vmul.f32 %v1656_v12, %v1572_v23 }
 0xd20   :  { %v1652_v21 = vsel %vm1649_vm7, %v1651_v5, %v1647_v18 }
 0xd21   :  { %v1653_v22 = vmul.f32 %v1652_v21, %v1628_v11 }
 0xd23   :  { %v3527_v58 = vclamps-f32 %v1653_v22, 1.0 }
 0xd25   :  { %v1657_v26 = vadd.f32 1.0, %v3527_v58 }
 0xd27   :  { %v1659_v28 = vmul.f32 %v1657_v26, %v1573_v24 }
 0xd29   :  { %v1660_v29 = vpack.c.bf16 %v1659_v28, %v1658_v27 }
 0xd2b   :  { %1717 = vmatmul.bf16.vlgmr.msra.gmra.mxu0 %v1660_v29 }
 0xda8   :  { %v1718_v9 = vpop.f32.mrf.mxu0 }
 0xda9   :  { %v1723_v31 = vadd.f32 %v1718_v9, %v4553_v10 }
 0xdab   :  { %v4632_v32 = vadd.f32 %v3877_v30, %v1723_v31 }
 0xdad   :  { %v1802_v33 = vsel %vm187_vm2, %v4632_v32, 0.0 }
 0xdae   :  { %1803 = vadd.xlane.f32.xlu1 %v1802_v33 }
 0xdb0   :  { %v1720_v56 = vpop.f32.mrf.mxu0 }
 0xdb1   :  { %v1724_v2 = vadd.f32 %v1720_v56, %v4558_v7 }
 0xdb3   :  { %v4637_v34 = vadd.f32 %v3877_v30, %v1724_v2 }
 0xdb5   :  { %v1805_v35 = vsel %vm187_vm2, %v4637_v34, 0.0 }
 0xdb6   :  { %1806 = vadd.xlane.f32.xlu0 %v1805_v35 }
 0xe21   :  { %v1804_v25 = vpop.xlane.xlu1 %1803 }
 0xe22   :  { %v1808_v36 = vmul.f32 %v1804_v25, %v4234_v19 }
 0xe24   :  { %v1810_v10 = vsub.f32 %v4632_v32, %v1808_v36 }
 0xe26   :  { %v1812_v37 = vmul.f32 %v1810_v10, %v1810_v10 }
 0xe28   :  { %v1814_v38 = vsel %vm187_vm2, %v1812_v37, 0.0 }
 0xe29   :  { %1815 = vadd.xlane.f32.xlu0 %v1814_v38  ;;  %v1807_v39 = vpop.xlane.xlu0 %1806 }
 0xe2a   :  { %v1809_v40 = vmul.f32 %v1807_v39, %v4234_v19 }
 0xe2c   :  { %v1811_v7 = vsub.f32 %v4637_v34, %v1809_v40 }
 0xe2e   :  { %v1813_v41 = vmul.f32 %v1811_v7, %v1811_v7 }
 0xe30   :  { %v1817_v42 = vsel %vm187_vm2, %v1813_v41, 0.0 }
 0xe31   :  { %1818 = vadd.xlane.f32.xlu0 %v1817_v42 }
 0xe9c   :  { %v1816_v44 = vpop.xlane.xlu0 %1815 }
 0xe9d   :  { %v1820_v45 = vmul.f32 %v1816_v44, %v4234_v19 }
 0xe9f   :  { %v1822_v46 = vadd.f32 1e-05, %v1820_v45 }
 0xea1   :  { %3971 = vrsqrt.f32 %v1822_v46  ;;  %vm1830_vm9 = vweird.f32 %v1822_v46 }
 0xea4   :  { %v1819_v48 = vpop.xlane.xlu0 %1818 }
 0xea5   :  { %v1821_v49 = vmul.f32 %v1819_v48, %v4234_v19 }
 0xea7   :  { %v3972_v50 = vpop.eup %3971  ;;  %v1823_v51 = vadd.f32 1e-05, %v1821_v49 }
 0xea8   :  { %v1825_v52 = vmul.f32 %v3972_v50, %v1822_v46  ;;  %vm1831_vm8 = vweird.f32 %v3972_v50 }
 0xea9   :  { %3973 = vrsqrt.f32 %v1823_v51  ;;  %vm1832_vm14 = vmor %vm1830_vm9, %vm1831_vm8  ;;  %vm1840_vm0 = vweird.f32 %v1823_v51 }
 0xeaa   :  { %v1826_v53 = vmul.f32 %v3972_v50, %v1825_v52 }
 0xeac   :  { %v1827_v0 = vmul.f32 0.5, %v1826_v53 }
 0xeae   :  { %v1828_v54 = vsub.f32 1.5, %v1827_v0 }
 0xeaf   :  { %v3974_v8 = vpop.eup %3973 }
 0xeb0   :  { %v1829_v55 = vmul.f32 %v3972_v50, %v1828_v54  ;;  %v1835_v57 = vmul.f32 %v3974_v8, %v1823_v51  ;;  %vm1841_vm15 = vweird.f32 %v3974_v8 }
 0xeb1   :  { %vm1842_vm1 = vmor %vm1840_vm0, %vm1841_vm15 }
 0xeb2   :  { %v1836_v59 = vmul.f32 %v3974_v8, %v1835_v57  ;;  %v1833_v60 = vsel %vm1832_vm14, %v3972_v50, %v1829_v55 }
 0xeb3   :  { %v1844_v3 = vmul.f32 %v1833_v60, %v1810_v10 }
 0xeb4   :  { %v1837_v62 = vmul.f32 0.5, %v1836_v59 }
 0xeb5   :  { %v1849_v13 = vmul.f32 %v3868_v1, %v1844_v3 }
 0xeb6   :  { %v1838_v63 = vsub.f32 1.5, %v1837_v62 }
 0xeb7   :  { %v1854_v16 = vadd.f32 %v3869_v61, %v1849_v13 }
 0xeb8   :  { %v1839_v4 = vmul.f32 %v3974_v8, %v1838_v63 }
 0xeba   :  { %v1843_v6 = vsel %vm1842_vm1, %v3974_v8, %v1839_v4 }
 0xebb   :  { %v1845_v14 = vmul.f32 %v1843_v6, %v1811_v7 }
 0xebd   :  { %v1850_v15 = vmul.f32 %v3868_v1, %v1845_v14 }
 0xebf   :  { %v1855_v17 = vadd.f32 %v3869_v61, %v1850_v15 }
 0xec1   :  { %v1856_v5 = vpack.c.bf16 %v1855_v17, %v1854_v16 }
 0xec3   :  { %3622 = vmatmul.msk.bf16.vlgmr.msrb.gmra.mxu1 %vm187_vm2, %v1856_v5 }
 0xf40   :  { %v1881_v20 = vpop.f32.mrf.mxu1 }
 0xf41   :  { %v1886_v11 = vmul.f32 0.35355338, %v1881_v20  ;;  %v1890_v18 = vpack.c.bf16 %v1881_v20, %v1881_v20 }
 0xf43   :  { %v1893_v21 = vunpack.c.l.b16 %v1890_v18  ;;  %v1888_v22 = vpack.c.bf16 %v1886_v11, %v1886_v11 }
 0xf45   :  { %v4662_v12 = vpack.c.b16 %v1893_v21, %v1893_v21  ;;  %v2007_v23 = vunpack.c.l.b16 %v1888_v22 }
 0xf47   :  { %2011 = vrot.lane.b32.xlu1 %v4662_v12, %s5181_s28  ;;  %1895 = vrot.lane.b32.xlu0 %v4662_v12, %s5182_s11  ;;  %v2008_v30 = vpack.c.b16 %v2007_v23, %v2007_v23 }
 0xf48   :  { %v1883_v58 = vpop.f32.mrf.mxu1 }
 0xf49   :  { %v1887_v24 = vmul.f32 0.35355338, %v1883_v58  ;;  %v1891_v26 = vpack.c.bf16 %v1883_v58, %v1883_v58 }
 0xf4b   :  { %v1917_v27 = vunpack.c.l.b16 %v1891_v26  ;;  %v1889_v28 = vpack.c.bf16 %v1887_v24, %v1887_v24 }
 0xf4d   :  { %v4668_v29 = vpack.c.b16 %v1917_v27, %v1917_v27  ;;  %v2033_v9 = vunpack.c.l.b16 %v1889_v28 }
 0xf4f   :  { %2124 = vrot.lane.b32.xlu1 %v2008_v30, %s5176_s10  ;;  %2037 = vrot.lane.b32.xlu0 %v4668_v29, %s5181_s28  ;;  %v2034_v31 = vpack.c.b16 %v2033_v9, %v2033_v9 }
 0xf50   :  { %1919 = vrot.lane.b32.xlu2 %v4668_v29, %s5182_s11 }
 0xf57   :  { %2261 = vrot.lane.b32.xlu1 %v4668_v29, %s5183_s29  ;;  %2035 = vrot.lane.b32.xlu0 %v2034_v31, %s5184_s26 }
 0xf58   :  { %2009 = vrot.lane.b32.xlu2 %v2008_v30, %s5184_s26 }
 0xf5f   :  { %2149 = vrot.lane.b32.xlu0 %v4668_v29, %s5185_s27 }
 0xf60   :  { %2126 = vrot.lane.b32.xlu2 %v4662_v12, %s5185_s27 }
 0xf67   :  { %2238 = vrot.lane.b32.xlu0 %v4662_v12, %s5183_s29  ;;  %s5190_s29 = sld [smem:[#allocation14_spill]] }
 0xf68   :  { %2147 = vrot.lane.b32.xlu2 %v2034_v31, %s5176_s10 }
 0xf6f   :  { %2259 = vrot.lane.b32.xlu0 %v2034_v31, %s5177_s1 }
 0xf70   :  { %2236 = vrot.lane.b32.xlu2 %v2008_v30, %s5177_s1 }
 0xf78   :  { %1985 = vrot.lane.b32.xlu2 %v4668_v29, %s5186_s5 }
 0xfaa   :  { %v1920_v33 = vpop.permute.xlu2 %1919 }
 0xfab   :  { %v1925_v56 = vsel %vm290_vm10, %v1920_v33, 0 }
 0xfac   :  { %1934 = vmatpush.bf16.xpose.msrb.mxu3 %v1925_v56 }
 0xfb2   :  { %v2010_v2 = vpop.permute.xlu2 %2009 }
 0xfb3   :  { %3624 = vmatmul.msk.bf16.vlgmr.msrb.gmra.mxu3 %vm290_vm10, %v1889_v28 }
 0xfb9   :  { %v2012_v35 = vpop.permute.xlu1 %2011  ;;  %v1896_v25 = vpop.permute.xlu0 %1895 }
 0xfba   :  { %v2017_v36 = vsel %vm290_vm10, %v2012_v35, 0  ;;  %v1901_v10 = vsel %vm290_vm10, %v1896_v25, 0  ;;  %v2127_v37 = vpop.permute.xlu2 %2126 }
 0xfbb   :  { %v2132_v38 = vsel %vm290_vm10, %v2127_v37, 0  ;;  %1910 = vmatpush.bf16.xpose.msra.mxu2 %v1901_v10  ;;  %2026 = vmatpush.bf16.xpose.msra.mxu3 %v2017_v36 }
 0xfc1   :  { %v2038_v39 = vpop.permute.xlu0 %2037  ;;  %v2125_v41 = vpop.permute.xlu1 %2124 }
 0xfc2   :  { %v2043_v40 = vsel %vm290_vm10, %v2038_v39, 0  ;;  %v2148_v7 = vpop.permute.xlu2 %2147  ;;  %3623 = vmatmul.msk.bf16.vlgmr.msra.gmra.mxu2 %vm290_vm10, %v1888_v22 }
 0xfc3   :  { %2141 = vmatpush.bf16.xpose.msrb.mxu3 %v2132_v38  ;;  %2052 = vmatpush.bf16.xpose.msrb.mxu0 %v2043_v40 }
 0xfc4   :  { %3627 = vmatmul.msk.bf16.vlgmr.msra.gmra.mxu3 %vm290_vm10, %v2010_v2 }
 0xfc9   :  { %v2036_v42 = vpop.permute.xlu0 %2035  ;;  %v2262_v44 = vpop.permute.xlu1 %2261 }
 0xfca   :  { %v2237_v43 = vpop.permute.xlu2 %2236  ;;  %3628 = vmatmul.msk.bf16.vlgmr.msrb.gmra.mxu0 %vm290_vm10, %v2036_v42  ;;  %v2267_v48 = vsel %vm290_vm10, %v2262_v44, 0 }
 0xfd1   :  { %v2150_v45 = vpop.permute.xlu0 %2149 }
 0xfd2   :  { %v1986_v46 = vpop.permute.xlu2 %1985  ;;  %v2155_v47 = vsel %vm290_vm10, %v2150_v45, 0 }
 0xfd3   :  { %v1991_v49 = vsel %vm363_vm11, %v1986_v46, 0  ;;  %2164 = vmatpush.bf16.xpose.msra.mxu0 %v2155_v47 }
 0xfd4   :  { %3631 = vmatmul.msk.bf16.vlgmr.msrb.gmra.mxu3 %vm290_vm10, %v2125_v41  ;;  %2000 = vmatpush.bf16.msrb.mxu2 %v1991_v49 }
 0xfd9   :  { %v2239_v50 = vpop.permute.xlu0 %2238 }
 0xfda   :  { %v2244_v51 = vsel %vm290_vm10, %v2239_v50, 0  ;;  %3632 = vmatmul.msk.bf16.vlgmr.msra.gmra.mxu0 %vm290_vm10, %v2148_v7 }
 0xfdb   :  { %2276 = vmatpush.bf16.xpose.msrb.mxu0 %v2267_v48  ;;  %2253 = vmatpush.bf16.xpose.msra.mxu3 %v2244_v51 }
 0xfe1   :  { %v2260_v52 = vpop.permute.xlu0 %2259 }
 0xfe4   :  { %3635 = vmatmul.msk.bf16.vlgmr.msra.gmra.mxu3 %vm290_vm10, %v2237_v43 }
 0xfea   :  { %3636 = vmatmul.msk.bf16.vlgmr.msrb.gmra.mxu0 %vm290_vm10, %v2260_v52 }
0x1036   :  { %v1936_v53 = vpop.f32.mrf.mxu3 }
0x1037   :  { %v1943_v0 = vsel %vm290_vm10, %v1936_v53, -inf }
0x1038   :  { %1944 = vmax.xlane.f32.xlu1 %v1943_v0 }
0x103e   :  { %v1938_v54 = vpop.f32.mrf.mxu3 }
0x1045   :  { %v1912_v8 = vpop.f32.mrf.mxu2 }
0x1046   :  { %v1940_v57 = vsel %vm290_vm10, %v1912_v8, -inf }
0x1047   :  { %v4708_v55 = vpop.f32.mrf.mxu3  ;;  %1941 = vmax.xlane.f32.xlu2 %v1940_v57  ;;  %v2054_v59 = vpop.f32.mrf.mxu0 }
0x1048   :  { %v2058_v60 = vsel %vm290_vm10, %v4708_v55, -inf  ;;  %v2061_v62 = vsel %vm290_vm10, %v2054_v59, -inf }
0x1049   :  { %2059 = vmax.xlane.f32.xlu1 %v2058_v60  ;;  %2062 = vmax.xlane.f32.xlu0 %v2061_v62 }
0x104d   :  { %v1914_v63 = vpop.f32.mrf.mxu2 }
0x104f   :  { %v2030_v1 = vpop.f32.mrf.mxu3  ;;  %v2056_v3 = vpop.f32.mrf.mxu0 }
0x1057   :  { %v2143_v4 = vpop.f32.mrf.mxu3  ;;  %v2166_v6 = vpop.f32.mrf.mxu0 }
0x1058   :  { %v2170_v61 = vsel %vm290_vm10, %v2143_v4, -inf  ;;  %v2173_v13 = vsel %vm290_vm10, %v2166_v6, -inf }
0x1059   :  { %2171 = vmax.xlane.f32.xlu0 %v2170_v61  ;;  %2174 = vmax.xlane.f32.xlu2 %v2173_v13 }
0x105f   :  { %v2145_v14 = vpop.f32.mrf.mxu3  ;;  %v2168_v15 = vpop.f32.mrf.mxu0 }
0x1067   :  { %v2255_v16 = vpop.f32.mrf.mxu3  ;;  %v4716_v17 = vpop.f32.mrf.mxu0 }
0x1068   :  { %v2282_v5 = vsel %vm290_vm10, %v2255_v16, -inf  ;;  %v2285_v20 = vsel %vm290_vm10, %v4716_v17, -inf }
0x1069   :  { %2283 = vmax.xlane.f32.xlu0 %v2282_v5  ;;  %2286 = vmax.xlane.f32.xlu1 %v2285_v20 }
0x106f   :  { %v2257_v11 = vpop.f32.mrf.mxu3  ;;  %v2280_v18 = vpop.f32.mrf.mxu0 }
0x107d   :  { %1964 = vrot.lane.b32.xlu0 %v4662_v12, %s5186_s5  ;;  %s5193_s5 = sld [smem:[#allocation17_spill]] }
0x1082   :  { %2103 = vrot.lane.b32.xlu1 %v4668_v29, %s5187_s23 }
0x10ab   :  { %v1945_v21 = vpop.xlane.xlu1 %1944 }
0x10ac   :  { %v1947_v22 = vsub.f32 %v1936_v53, %v1945_v21 }
0x10ae   :  { %v1950_v58 = vmul.f32 1.442695, %v1947_v22 }
0x10b0   :  { %3975 = vpow2.f32 %v1950_v58 }
0x10b6   :  { %v3976_v23 = vpop.eup %3975 }
0x10b7   :  { %v1955_v24 = vsel %vm290_vm10, %v3976_v23, 0.0 }
0x10b8   :  { %1956 = vadd.xlane.f32.xlu2 %v1955_v24 }
0x10ba   :  { %v1942_v26 = vpop.xlane.xlu2 %1941 }
0x10bb   :  { %v1946_v27 = vsub.f32 %v1912_v8, %v1942_v26 }
0x10bc   :  { %v2063_v28 = vpop.xlane.xlu0 %2062  ;;  %v2060_v42 = vpop.xlane.xlu1 %2059 }
0x10bd   :  { %v1948_v30 = vmul.f32 1.442695, %v1946_v27  ;;  %v2065_v9 = vsub.f32 %v2054_v59, %v2063_v28  ;;  %v2064_v0 = vsub.f32 %v4708_v55, %v2060_v42 }
0x10bf   :  { %3977 = vpow2.f32 %v1948_v30  ;;  %v2068_v31 = vmul.f32 1.442695, %v2065_v9  ;;  %v2066_v54 = vmul.f32 1.442695, %v2064_v0 }
0x10c1   :  { %3979 = vpow2.f32 %v2068_v31 }
0x10c5   :  { %v3978_v33 = vpop.eup %3977 }
0x10c6   :  { %v1952_v56 = vsel %vm290_vm10, %v3978_v33, 0.0 }
0x10c7   :  { %1953 = vadd.xlane.f32.xlu1 %v1952_v56  ;;  %v4727_v2 = vpop.eup %3979 }
0x10c8   :  { %v2073_v36 = vsel %vm290_vm10, %v4727_v2, 0.0 }
0x10cc   :  { %v2175_v35 = vpop.xlane.xlu2 %2174  ;;  %v2172_v37 = vpop.xlane.xlu0 %2171 }
0x10cd   :  { %v2177_v25 = vsub.f32 %v2166_v6, %v2175_v35  ;;  %v2176_v44 = vsub.f32 %v2143_v4, %v2172_v37 }
0x10cf   :  { %v2180_v10 = vmul.f32 1.442695, %v2177_v25  ;;  %2074 = vadd.xlane.f32.xlu1 %v2073_v36  ;;  %v2178_v46 = vmul.f32 1.442695, %v2176_v44 }
0x10d0   :  { %2082 = vrot.lane.b32.xlu2 %v4662_v12, %s5187_s23 }
0x10d1   :  { %3981 = vpow2.f32 %v2180_v10 }
0x10d7   :  { %v4733_v38 = vpop.eup %3981 }
0x10d8   :  { %v2185_v39 = vsel %vm290_vm10, %v4733_v38, 0.0 }
0x10d9   :  { %2186 = vadd.xlane.f32.xlu0 %v2185_v39 }
0x10dc   :  { %v2284_v40 = vpop.xlane.xlu0 %2283  ;;  %v2287_v47 = vpop.xlane.xlu1 %2286 }
0x10dd   :  { %v2288_v7 = vsub.f32 %v2255_v16, %v2284_v40  ;;  %v2289_v61 = vsub.f32 %v4716_v17, %v2287_v47 }
0x10df   :  { %v2290_v41 = vmul.f32 1.442695, %v2288_v7 }
0x10e1   :  { %3983 = vpow2.f32 %v2290_v41 }
0x10e2   :  { %3985 = vpow2.f32 %v2178_v46 }
0x10e3   :  { %3987 = vpow2.f32 %v2066_v54 }
0x10e7   :  { %v4737_v43 = vpop.eup %3983 }
0x10e8   :  { %v2294_v45 = vsel %vm290_vm10, %v4737_v43, 0.0  ;;  %2215 = vrot.lane.b32.xlu1 %v4668_v29, %s5188_s24  ;;  %v4744_v51 = vpop.eup %3985 }
0x10e9   :  { %2295 = vadd.xlane.f32.xlu0 %v2294_v45  ;;  %v2182_v53 = vsel %vm290_vm10, %v4744_v51, 0.0  ;;  %v3988_v8 = vpop.eup %3987 }
0x10ea   :  { %v2070_v57 = vsel %vm290_vm10, %v3988_v8, 0.0 }
0x10ef   :  { %v1965_v48 = vpop.permute.xlu0 %1964 }
0x10f0   :  { %v1970_v49 = vsel %vm363_vm11, %v1965_v48, 0 }
0x10f1   :  { %1979 = vmatpush.bf16.msra.mxu1 %v1970_v49 }
0x10f4   :  { %v2104_v50 = vpop.permute.xlu1 %2103 }
0x10f5   :  { %v2109_v52 = vsel %vm363_vm11, %v2104_v50, 0 }
0x10f6   :  { %2118 = vmatpush.bf16.msra.mxu2 %v2109_v52 }
0x10f9   :  { %2183 = vadd.xlane.f32.xlu2 %v2182_v53 }
0x10fd   :  { %2306 = vrot.lane.b32.xlu0 %v4662_v12, %s5189_s9 }
0x1111   :  { %2327 = vrot.lane.b32.xlu2 %v4668_v29, %s5189_s9 }
0x1112   :  { %2071 = vadd.xlane.f32.xlu1 %v2070_v57 }
0x112b   :  { %v1957_v59 = vpop.xlane.xlu2 %1956  ;;  %2194 = vrot.lane.b32.xlu1 %v4662_v12, %s5188_s24  ;;  %v2292_v12 = vmul.f32 1.442695, %v2289_v61 }
0x112c   :  { %3989 = vrcp.f32 %v1957_v59 }
0x1132   :  { %v3990_v60 = vpop.eup %3989 }
0x1133   :  { %v1961_v62 = vmul.f32 %v3990_v60, %v3976_v23  ;;  %v2083_v63 = vpop.permute.xlu2 %2082 }
0x1134   :  { %v2088_v1 = vsel %vm363_vm11, %v2083_v63, 0 }
0x1135   :  { %v1963_v55 = vpack.c.bf16 %v1961_v62, %v1961_v62  ;;  %2097 = vmatpush.bf16.msrb.mxu1 %v2088_v1  ;;  %v3771_v1 = vld [vmem:[%s5171_s13 + $0x18] sm:$0xff] }
0x1136   :  { %2400 = vmatpush.bf16.msrb.mxu3 %v3771_v1 }
0x1137   :  { %3626 = vmatmul.msk.bf16.vlgmr.msrb.gmra.mxu2 %vm290_vm10, %v1963_v55  ;;  %v3770_v55 = vld [vmem:[%s5171_s13 + $0x10] sm:$0xff] }
0x113a   :  { %v1954_v3 = vpop.xlane.xlu1 %1953  ;;  %2401 = vmatpush.bf16.msrb.mxu3 %v3770_v55  ;;  %v3880_v55 = vld [vmem:[%s5175_s7 + $0x1] ss:$0 sm:$0xff] }
0x113b   :  { %3991 = vrcp.f32 %v1954_v3 }
0x1141   :  { %v3992_v29 = vpop.eup %3991 }
0x1142   :  { %v1960_v4 = vmul.f32 %v3992_v29, %v3978_v33  ;;  %v2075_v6 = vpop.xlane.xlu1 %2074 }
0x1143   :  { %3993 = vrcp.f32 %v2075_v6 }
0x1144   :  { %v1962_v13 = vpack.c.bf16 %v1960_v4, %v1960_v4  ;;  %3995 = vpow2.f32 %v2292_v12 }
0x1146   :  { %3625 = vmatmul.msk.bf16.vlgmr.msra.gmra.mxu1 %vm290_vm10, %v1962_v13 }
0x1149   :  { %v3994_v14 = vpop.eup %3993 }
0x114a   :  { %v2079_v15 = vmul.f32 %v3994_v14, %v4727_v2  ;;  %v3996_v20 = vpop.eup %3995 }
0x114b   :  { %v2297_v11 = vsel %vm290_vm10, %v3996_v20, 0.0 }
0x114c   :  { %v2081_v16 = vpack.c.bf16 %v2079_v15, %v2079_v15  ;;  %v2187_v5 = vpop.xlane.xlu0 %2186 }
0x114d   :  { %3997 = vrcp.f32 %v2187_v5 }
0x114e   :  { %3630 = vmatmul.msk.bf16.vlgmr.msra.gmra.mxu2 %vm290_vm10, %v2081_v16 }
0x1153   :  { %v3998_v18 = vpop.eup %3997 }
0x1154   :  { %v2191_v17 = vmul.f32 %v3998_v18, %v4733_v38 }
0x1155   :  { %2298 = vadd.xlane.f32.xlu1 %v2297_v11 }
0x1156   :  { %v2193_v58 = vpack.c.bf16 %v2191_v17, %v2191_v17 }
0x115a   :  { %v2216_v21 = vpop.permute.xlu1 %2215 }
0x115b   :  { %v2221_v22 = vsel %vm363_vm11, %v2216_v21, 0 }
0x115c   :  { %2230 = vmatpush.bf16.msrb.mxu2 %v2221_v22  ;;  %v2296_v31 = vpop.xlane.xlu0 %2295  ;;  %v3878_v22 = vld [vmem:[%s5172_s30 + $0x1] ss:$0 sm:$0xff] }
0x115f   :  { %3634 = vmatmul.msk.bf16.vlgmr.msrb.gmra.mxu2 %vm290_vm10, %v2193_v58 }
0x116c   :  { %v2184_v23 = vpop.xlane.xlu2 %2183 }
0x116f   :  { %v2307_v2 = vpop.permute.xlu0 %2306 }
0x1170   :  { %v2312_v36 = vsel %vm363_vm11, %v2307_v2, 0 }
0x1174   :  { %v2328_v24 = vpop.permute.xlu2 %2327 }
0x1175   :  { %v2333_v26 = vsel %vm363_vm11, %v2328_v24, 0 }
0x1176   :  { %2342 = vmatpush.bf16.msra.mxu2 %v2333_v26 }
0x1185   :  { %v2072_v27 = vpop.xlane.xlu1 %2071 }
0x1186   :  { %3999 = vrcp.f32 %v2072_v27 }
0x1187   :  { %4001 = vrcp.f32 %v2184_v23 }
0x1188   :  { %4003 = vrcp.f32 %v2296_v31 }
0x118c   :  { %v4000_v28 = vpop.eup %3999 }
0x118d   :  { %v2078_v30 = vmul.f32 %v4000_v28, %v3988_v8  ;;  %v4002_v33 = vpop.eup %4001 }
0x118e   :  { %v2190_v56 = vmul.f32 %v4002_v33, %v4744_v51  ;;  %v4004_v37 = vpop.eup %4003 }
0x118f   :  { %v2080_v9 = vpack.c.bf16 %v2078_v30, %v2078_v30  ;;  %v2302_v38 = vmul.f32 %v4004_v37, %v4737_v43  ;;  %v3775_v37 = vld [vmem:[%s5173_s3 + $0x18] sm:$0xff] }
0x1190   :  { %v2192_v10 = vpack.c.bf16 %v2190_v56, %v2190_v56 }
0x1191   :  { %3629 = vmatmul.msk.bf16.vlgmr.msrb.gmra.mxu1 %vm290_vm10, %v2080_v9  ;;  %v2304_v39 = vpack.c.bf16 %v2302_v38, %v2302_v38  ;;  %v3774_v38 = vld [vmem:[%s5173_s3 + $0x10] sm:$0xff] }
0x119d   :  { %v2195_v35 = vpop.permute.xlu1 %2194 }
0x119e   :  { %v2200_v25 = vsel %vm363_vm11, %v2195_v35, 0 }
0x119f   :  { %2209 = vmatpush.bf16.msra.mxu1 %v2200_v25 }
0x11a2   :  { %3633 = vmatmul.msk.bf16.vlgmr.msra.gmra.mxu1 %vm290_vm10, %v2192_v10 }
0x11a3   :  { %2321 = vmatpush.bf16.msrb.mxu1 %v2312_v36 }
0x11a7   :  { %2519 = vmatpush.bf16.msra.mxu1 %v3775_v37 }
0x11ab   :  { %2520 = vmatpush.bf16.msra.mxu1 %v3774_v38 }
0x11b2   :  { %3637 = vmatmul.msk.bf16.vlgmr.msrb.gmra.mxu1 %vm290_vm10, %v2304_v39  ;;  %v4820_v39 = vld [vmem:[%s5094_s2] sm:$0xff]  ;;  %s5192_s2 = sld [smem:[#allocation16_spill]] }
0x11ba   :  { %v2002_v40 = vpop.f32.mrf.mxu2 }
0x11c2   :  { %v2004_v7 = vpop.f32.mrf.mxu2  ;;  %3665 = vmatmul.msk.bf16.vlgmr.msra.gmra.mxu1 %vm187_vm2, %v4820_v39 }
0x11c3   :  { %v1981_v41 = vpop.f32.mrf.mxu1 }
0x11c8   :  { %v2299_v42 = vpop.xlane.xlu1 %2298 }
0x11c9   :  { %4005 = vrcp.f32 %v2299_v42 }
0x11cb   :  { %v1983_v44 = vpop.f32.mrf.mxu1 }
0x11cc   :  { %v3772_v44 = vld [vmem:[%s5095_s12 + $0x10] sm:$0xff] }
0x11cf   :  { %v4006_v45 = vpop.eup %4005 }
0x11d0   :  { %v2303_v46 = vmul.f32 %v4006_v45, %v3996_v20 }
0x11d1   :  { %v2120_v47 = vpop.f32.mrf.mxu2 }
0x11d2   :  { %v2305_v48 = vpack.c.bf16 %v2303_v46, %v2303_v46 }
0x11d4   :  { %3638 = vmatmul.msk.bf16.vlgmr.msra.gmra.mxu2 %vm290_vm10, %v2305_v48 }
0x11d9   :  { %v2122_v49 = vpop.f32.mrf.mxu2 }
0x11e2   :  { %v2232_v50 = vpop.f32.mrf.mxu2 }
0x11ea   :  { %v2234_v51 = vpop.f32.mrf.mxu2 }
0x120e   :  { %v2099_v52 = vpop.f32.mrf.mxu1 }
0x120f   :  { %v3835_v43 = vpack.i.bf16 %v2120_v47, %v2099_v52 }
0x1211   :  { %3836 = vrot.lane.b32.xlu0 %v3835_v43, %s5178_s4 }
0x1216   :  { %v2101_v53 = vpop.f32.mrf.mxu1 }
0x121f   :  { %v2211_v0 = vpop.f32.mrf.mxu1 }
0x1220   :  { %v3840_v54 = vpack.i.bf16 %v2232_v50, %v2211_v0 }
0x1222   :  { %3841 = vrot.lane.b32.xlu2 %v3840_v54, %s5179_s8 }
0x1227   :  { %v2213_v8 = vpop.f32.mrf.mxu1 }
0x122f   :  { %v2323_v57 = vpop.f32.mrf.mxu1 }
0x1237   :  { %v2325_v59 = vpop.f32.mrf.mxu1 }
0x1257   :  { %v2344_v60 = vpop.f32.mrf.mxu2 }
0x1258   :  { %v3845_v62 = vpack.i.bf16 %v2344_v60, %v2323_v57  ;;  %v3879_v60 = vld [vmem:[%s5174_s6 + $0x1] ss:$0 sm:$0xff] }
0x125a   :  { %3846 = vrot.lane.b32.xlu0 %v3845_v62, %s5180_s0 }
0x125f   :  { %v2346_v63 = vpop.f32.mrf.mxu2 }
0x127c   :  { %v3842_v6 = vpop.permute.xlu2 %3841 }
0x127d   :  { %v3844_v12 = vunpack.i.h.bf16 %v3842_v6  ;;  %v3843_v14 = vunpack.i.l.bf16 %v3842_v6 }
0x1283   :  { %v3837_v3 = vpop.permute.xlu0 %3836 }
0x1284   :  { %v3839_v29 = vunpack.i.h.bf16 %v3837_v3  ;;  %v3838_v4 = vunpack.i.l.bf16 %v3837_v3 }
0x1286   :  { %v2373_v61 = vsel %vm290_vm10, %v2002_v40, %v3839_v29  ;;  %v2372_v13 = vsel %vm290_vm10, %v1981_v41, %v3838_v4  ;;  %v3773_v40 = vld [vmem:[%s5095_s12 + $0x18] sm:$0xff] }
0x1287   :  { %v2374_v20 = vsel %vm769_vm12, %v2372_v13, %v3843_v14  ;;  %v2375_v11 = vsel %vm769_vm12, %v2373_v61, %v3844_v12  ;;  %2491 = vmatpush.bf16.msra.mxu0 %v3773_v40  ;;  %v2522_v12 = vpop.f32.mrf.mxu1 }
0x1288   :  { %v2555_v14 = vpack.c.bf16 %v2522_v12, %v2522_v12 }
0x128b   :  { %2492 = vmatpush.bf16.msra.mxu0 %v3772_v44 }
0x12cc   :  { %v3847_v15 = vpop.permute.xlu0 %3846 }
0x12cd   :  { %v3849_v16 = vunpack.i.h.bf16 %v3847_v15  ;;  %v3848_v5 = vunpack.i.l.bf16 %v3847_v15  ;;  %v2563_v15 = vsel %vm290_vm10, %v2555_v14, 0 }
0x12ce   :  { %2572 = vmatpush.bf16.xpose.msra.mxu3 %v2563_v15 }
0x12cf   :  { %v2376_v18 = vsel %vm772_vm13, %v2374_v20, %v3848_v5  ;;  %v2377_v17 = vsel %vm772_vm13, %v2375_v11, %v3849_v16  ;;  %v2665_v16 = vunpack.c.l.b16 %v2555_v14  ;;  %v2524_v20 = vpop.f32.mrf.mxu1 }
0x12d0   :  { %v2378_v21 = vpack.c.bf16 %v2377_v17, %v2376_v18  ;;  %v2556_v11 = vpack.c.bf16 %v2524_v20, %v2524_v20 }
0x12d1   :  { %v2666_v5 = vpack.c.b16 %v2665_v16, %v2665_v16 }
0x12d2   :  { %3647 = vmatmul.msk.bf16.vlgmr.msrb.gmra.mxu3 %vm187_vm2, %v2378_v21  ;;  %v2582_v18 = vsel %vm290_vm10, %v2556_v11, 0  ;;  %v2694_v17 = vunpack.c.l.b16 %v2556_v11 }
0x12d3   :  { %2591 = vmatpush.bf16.xpose.msrb.mxu0 %v2582_v18 }
0x12d4   :  { %v2695_v21 = vpack.c.b16 %v2694_v17, %v2694_v17 }
0x1355   :  { %v2403_v58 = vpop.f32.mrf.mxu3 }
0x1356   :  { %v2408_v23 = vadd.f32 %v2403_v58, %v4632_v32 }
0x1358   :  { %v4796_v24 = vadd.f32 %v3878_v22, %v2408_v23 }
0x135a   :  { %v2415_v26 = vsel %vm187_vm2, %v4796_v24, 0.0 }
0x135b   :  { %2416 = vadd.xlane.f32.xlu2 %v2415_v26 }
0x135d   :  { %v2405_v27 = vpop.f32.mrf.mxu3 }
0x135e   :  { %v2409_v28 = vadd.f32 %v2405_v27, %v4637_v34 }
0x1360   :  { %v4801_v30 = vadd.f32 %v3878_v22, %v2409_v28 }
0x1362   :  { %v2418_v9 = vsel %vm187_vm2, %v4801_v30, 0.0 }
0x1363   :  { %2419 = vadd.xlane.f32.xlu1 %v2418_v9 }
0x1373   :  { %2696 = vrot.lane.b32.xlu2 %v2695_v21, %s5184_s26 }
0x13ce   :  { %v2417_v31 = vpop.xlane.xlu2 %2416 }
0x13cf   :  { %v2421_v33 = vmul.f32 %v2417_v31, %v4234_v19 }
0x13d1   :  { %v2423_v32 = vsub.f32 %v4796_v24, %v2421_v33 }
0x13d3   :  { %v2425_v56 = vmul.f32 %v2423_v32, %v2423_v32 }
0x13d5   :  { %v2427_v2 = vsel %vm187_vm2, %v2425_v56, 0.0 }
0x13d6   :  { %2428 = vadd.xlane.f32.xlu0 %v2427_v2  ;;  %v2420_v35 = vpop.xlane.xlu1 %2419  ;;  %v2697_v56 = vpop.permute.xlu2 %2696 }
0x13d7   :  { %v2422_v25 = vmul.f32 %v2420_v35, %v4234_v19  ;;  %v2702_v2 = vsel %vm290_vm10, %v2697_v56, 0 }
0x13d9   :  { %v2424_v34 = vsub.f32 %v4801_v30, %v2422_v25 }
0x13db   :  { %v2426_v36 = vmul.f32 %v2424_v34, %v2424_v34 }
0x13dd   :  { %v2430_v10 = vsel %vm187_vm2, %v2426_v36, 0.0  ;;  %v3776_v36 = vld [vmem:[%s5096_s14 + $0x10] sm:$0xff] }
0x13de   :  { %2431 = vadd.xlane.f32.xlu1 %v2430_v10 }
0x13f7   :  { %2667 = vrot.lane.b32.xlu1 %v2666_v5, %s5184_s26 }
0x1449   :  { %v2429_v7 = vpop.xlane.xlu0 %2428 }
0x144a   :  { %v2433_v41 = vmul.f32 %v2429_v7, %v4234_v19 }
0x144c   :  { %v2435_v42 = vadd.f32 1e-05, %v2433_v41 }
0x144e   :  { %4007 = vrsqrt.f32 %v2435_v42  ;;  %vm2443_vm4 = vweird.f32 %v2435_v42 }
0x1451   :  { %v2432_v45 = vpop.xlane.xlu1 %2431 }
0x1452   :  { %v2434_v46 = vmul.f32 %v2432_v45, %v4234_v19 }
0x1454   :  { %v4008_v47 = vpop.eup %4007  ;;  %v2436_v48 = vadd.f32 1e-05, %v2434_v46 }
0x1455   :  { %v2438_v49 = vmul.f32 %v4008_v47, %v2435_v42  ;;  %vm2444_vm3 = vweird.f32 %v4008_v47 }
0x1456   :  { %4009 = vrsqrt.f32 %v2436_v48  ;;  %vm2445_vm5 = vmor %vm2443_vm4, %vm2444_vm3  ;;  %vm2453_vm7 = vweird.f32 %v2436_v48 }
0x1457   :  { %v2439_v50 = vmul.f32 %v4008_v47, %v2438_v49 }
0x1459   :  { %v2440_v51 = vmul.f32 0.5, %v2439_v50 }
0x145b   :  { %v2441_v52 = vsub.f32 1.5, %v2440_v51 }
0x145c   :  { %v4010_v43 = vpop.eup %4009 }
0x145d   :  { %v2442_v53 = vmul.f32 %v4008_v47, %v2441_v52  ;;  %v2448_v0 = vmul.f32 %v4010_v43, %v2436_v48  ;;  %vm2454_vm6 = vweird.f32 %v4010_v43 }
0x145e   :  { %vm2455_vm8 = vmor %vm2453_vm7, %vm2454_vm6 }
0x145f   :  { %v2449_v54 = vmul.f32 %v4010_v43, %v2448_v0  ;;  %v2446_v8 = vsel %vm2445_vm5, %v4008_v47, %v2442_v53 }
0x1460   :  { %v2457_v62 = vmul.f32 %v2446_v8, %v2423_v32 }
0x1461   :  { %v2450_v57 = vmul.f32 0.5, %v2449_v54 }
0x1462   :  { %v2462_v3 = vmul.f32 %v3879_v60, %v2457_v62 }
0x1463   :  { %v2451_v59 = vsub.f32 1.5, %v2450_v57 }
0x1464   :  { %v2467_v6 = vadd.f32 %v3880_v55, %v2462_v3 }
0x1465   :  { %v2452_v63 = vmul.f32 %v4010_v43, %v2451_v59 }
0x1467   :  { %v2456_v1 = vsel %vm2455_vm8, %v4010_v43, %v2452_v63 }
0x1468   :  { %v2458_v29 = vmul.f32 %v2456_v1, %v2424_v34  ;;  %v3777_v34 = vld [vmem:[%s5096_s14 + $0x18] sm:$0xff] }
0x1469   :  { %v2668_v35 = vpop.permute.xlu1 %2667  ;;  %2545 = vmatpush.bf16.msrb.mxu2 %v3777_v34 }
0x146a   :  { %v2463_v4 = vmul.f32 %v3879_v60, %v2458_v29  ;;  %v2673_v25 = vsel %vm290_vm10, %v2668_v35, 0 }
0x146b   :  { %2682 = vmatpush.bf16.xpose.msrb.mxu3 %v2673_v25 }
0x146c   :  { %v2468_v61 = vadd.f32 %v3880_v55, %v2463_v4 }
0x146d   :  { %2546 = vmatpush.bf16.msrb.mxu2 %v3776_v36 }
0x146e   :  { %v2469_v13 = vpack.c.bf16 %v2468_v61, %v2467_v6 }
0x1470   :  { %3656 = vmatmul.msk.bf16.vlgmr.msra.gmra.mxu0 %vm187_vm2, %v2469_v13  ;;  %3674 = vmatmul.msk.bf16.vlgmr.msrb.gmra.mxu2 %vm187_vm2, %v4820_v39 }
0x1471   :  { %2711 = vmatpush.bf16.xpose.msra.mxu0 %v2702_v2 }
0x14ed   :  { %v2494_v22 = vpop.f32.mrf.mxu0 }
0x14ee   :  { %v2499_v58 = vmul.f32 0.35355338, %v2494_v22 }
0x14f0   :  { %v2553_v23 = vpack.c.bf16 %v2499_v58, %v2499_v58 }
0x14f2   :  { %v2660_v26 = vunpack.c.l.b16 %v2553_v23  ;;  %3675 = vmatmul.msk.bf16.vlgmr.msra.gmra.mxu3 %vm290_vm10, %v2553_v23 }
0x14f3   :  { %v2548_v54 = vpop.f32.mrf.mxu2 }
0x14f4   :  { %v2661_v27 = vpack.c.b16 %v2660_v26, %v2660_v26  ;;  %v2557_v8 = vpack.c.bf16 %v2548_v54, %v2548_v54 }
0x14f5   :  { %v2496_v28 = vpop.f32.mrf.mxu0 }
0x14f6   :  { %v2500_v9 = vmul.f32 0.35355338, %v2496_v28  ;;  %2789 = vrot.lane.b32.xlu2 %v2661_v27, %s5176_s10  ;;  %2662 = vrot.lane.b32.xlu1 %v2661_v27, %s5184_s26  ;;  %v2625_v57 = vsel %vm363_vm11, %v2557_v8, 0  ;;  %v2742_v2 = vunpack.c.l.b16 %v2557_v8 }
0x14f7   :  { %2634 = vmatpush.bf16.msrb.mxu1 %v2625_v57 }
0x14f8   :  { %v2554_v31 = vpack.c.bf16 %v2500_v9, %v2500_v9  ;;  %v2743_v35 = vpack.c.b16 %v2742_v2, %v2742_v2 }
0x14fa   :  { %v2689_v33 = vunpack.c.l.b16 %v2554_v31  ;;  %3676 = vmatmul.msk.bf16.vlgmr.msrb.gmra.mxu0 %vm290_vm10, %v2554_v31 }
0x14fb   :  { %v2550_v59 = vpop.f32.mrf.mxu2 }
0x14fc   :  { %v2690_v32 = vpack.c.b16 %v2689_v33, %v2689_v33  ;;  %v2558_v60 = vpack.c.bf16 %v2550_v59, %v2550_v59 }
0x14fe   :  { %2926 = vrot.lane.b32.xlu2 %v2695_v21, %s5177_s1  ;;  %2791 = vrot.lane.b32.xlu1 %v2666_v5, %s5176_s10  ;;  %v2644_v62 = vsel %vm363_vm11, %v2558_v60, 0 }
0x14ff   :  { %2691 = vrot.lane.b32.xlu0 %v2690_v32, %s5184_s26  ;;  %2653 = vmatpush.bf16.msra.mxu2 %v2644_v62 }
0x1506   :  { %2814 = vrot.lane.b32.xlu1 %v2695_v21, %s5176_s10 }
0x1507   :  { %2903 = vrot.lane.b32.xlu0 %v2666_v5, %s5177_s1  ;;  %v2766_v5 = vunpack.c.l.b16 %v2558_v60 }
0x1509   :  { %v4893_v18 = vpack.c.b16 %v2766_v5, %v2766_v5 }
0x150e   :  { %2812 = vrot.lane.b32.xlu1 %v2690_v32, %s5176_s10 }
0x150f   :  { %2924 = vrot.lane.b32.xlu0 %v2690_v32, %s5177_s1 }
0x1516   :  { %2901 = vrot.lane.b32.xlu1 %v2661_v27, %s5177_s1 }
0x1550   :  { %v2790_v37 = vpop.permute.xlu2 %2789 }
0x1558   :  { %v2927_v44 = vpop.permute.xlu2 %2926 }
0x1559   :  { %v2932_v49 = vsel %vm290_vm10, %v2927_v44, 0 }
0x1568   :  { %v2663_v10 = vpop.permute.xlu1 %2662 }
0x1569   :  { %3679 = vmatmul.msk.bf16.vlgmr.msrb.gmra.mxu3 %vm290_vm10, %v2663_v10 }
0x1570   :  { %v2792_v38 = vpop.permute.xlu1 %2791 }
0x1571   :  { %v2692_v40 = vpop.permute.xlu0 %2691  ;;  %v2797_v7 = vsel %vm290_vm10, %v2792_v38, 0 }
0x1572   :  { %3680 = vmatmul.msk.bf16.vlgmr.msra.gmra.mxu0 %vm290_vm10, %v2692_v40  ;;  %2806 = vmatpush.bf16.xpose.msra.mxu3 %v2797_v7 }
0x1575   :  { %v4868_v41 = vpop.f32.mrf.mxu3 }
0x1576   :  { %v2597_v42 = vsel %vm290_vm10, %v4868_v41, -inf }
0x1577   :  { %2598 = vmax.xlane.f32.xlu1 %v2597_v42  ;;  %v2593_v45 = vpop.f32.mrf.mxu0 }
0x1578   :  { %v2815_v39 = vpop.permute.xlu1 %2814  ;;  %v2600_v46 = vsel %vm290_vm10, %v2593_v45, -inf }
0x1579   :  { %v2904_v47 = vpop.permute.xlu0 %2903  ;;  %v2820_v48 = vsel %vm290_vm10, %v2815_v39, 0  ;;  %2601 = vmax.xlane.f32.xlu2 %v2600_v46  ;;  %3683 = vmatmul.msk.bf16.vlgmr.msra.gmra.mxu3 %vm290_vm10, %v2790_v37 }
0x157a   :  { %v2909_v50 = vsel %vm290_vm10, %v2904_v47, 0  ;;  %2829 = vmatpush.bf16.xpose.msrb.mxu0 %v2820_v48 }
0x157b   :  { %2918 = vmatpush.bf16.xpose.msrb.mxu3 %v2909_v50 }
0x157d   :  { %v2576_v51 = vpop.f32.mrf.mxu3 }
0x157f   :  { %v2595_v52 = vpop.f32.mrf.mxu0 }
0x1580   :  { %v2813_v43 = vpop.permute.xlu1 %2812 }
0x1581   :  { %v2925_v0 = vpop.permute.xlu0 %2924 }
0x1582   :  { %2941 = vmatpush.bf16.xpose.msra.mxu0 %v2932_v49 }
0x1583   :  { %3684 = vmatmul.msk.bf16.vlgmr.msrb.gmra.mxu0 %vm290_vm10, %v2813_v43 }
0x1588   :  { %v2902_v53 = vpop.permute.xlu1 %2901 }
0x1589   :  { %3687 = vmatmul.msk.bf16.vlgmr.msrb.gmra.mxu3 %vm290_vm10, %v2902_v53 }
0x1593   :  { %3688 = vmatmul.msk.bf16.vlgmr.msra.gmra.mxu0 %vm290_vm10, %v2925_v0 }
0x15ea   :  { %v2599_v28 = vpop.xlane.xlu1 %2598 }
0x15eb   :  { %v2603_v9 = vsub.f32 %v4868_v41, %v2599_v28 }
0x15ec   :  { %v2602_v63 = vpop.xlane.xlu2 %2601  ;;  %v2684_v1 = vpop.f32.mrf.mxu3 }
0x15ed   :  { %v2604_v55 = vsub.f32 %v2593_v45, %v2602_v63  ;;  %v2717_v3 = vsel %vm290_vm10, %v2684_v1, -inf  ;;  %v2605_v31 = vmul.f32 1.442695, %v2603_v9 }
0x15ee   :  { %2718 = vmax.xlane.f32.xlu2 %v2717_v3 }
0x15ef   :  { %v2607_v29 = vmul.f32 1.442695, %v2604_v55  ;;  %v2713_v4 = vpop.f32.mrf.mxu0 }
0x15f0   :  { %v2720_v6 = vsel %vm290_vm10, %v2713_v4, -inf }
0x15f1   :  { %4011 = vpow2.f32 %v2607_v29  ;;  %2721 = vmax.xlane.f32.xlu0 %v2720_v6 }
0x15f2   :  { %4013 = vpow2.f32 %v2605_v31 }
0x15f4   :  { %v2686_v61 = vpop.f32.mrf.mxu3 }
0x15f7   :  { %v4012_v13 = vpop.eup %4011  ;;  %v2715_v12 = vpop.f32.mrf.mxu0 }
0x15f8   :  { %v2612_v14 = vsel %vm290_vm10, %v4012_v13, 0.0  ;;  %v4014_v33 = vpop.eup %4013 }
0x15f9   :  { %2613 = vadd.xlane.f32.xlu1 %v2612_v14  ;;  %v2609_v32 = vsel %vm290_vm10, %v4014_v33, 0.0 }
0x15fc   :  { %v4885_v15 = vpop.f32.mrf.mxu3 }
0x15fd   :  { %v2835_v16 = vsel %vm290_vm10, %v4885_v15, -inf }
0x15fe   :  { %2836 = vmax.xlane.f32.xlu0 %v2835_v16 }
0x1600   :  { %v4889_v20 = vpop.f32.mrf.mxu0 }
0x1601   :  { %v2838_v11 = vsel %vm290_vm10, %v4889_v20, -inf }
0x1602   :  { %2839 = vmax.xlane.f32.xlu1 %v2838_v11 }
0x1604   :  { %v2810_v17 = vpop.f32.mrf.mxu3 }
0x1606   :  { %2768 = vrot.lane.b32.xlu2 %v4893_v18, %s5184_s26 }
0x1608   :  { %v2833_v21 = vpop.f32.mrf.mxu0 }
0x160c   :  { %v2920_v22 = vpop.f32.mrf.mxu3 }
0x160d   :  { %v2947_v58 = vsel %vm290_vm10, %v2920_v22, -inf }
0x160e   :  { %2948 = vmax.xlane.f32.xlu0 %v2947_v58 }
0x1610   :  { %v4898_v23 = vpop.f32.mrf.mxu0 }
0x1611   :  { %v2950_v56 = vsel %vm290_vm10, %v4898_v23, -inf }
0x1614   :  { %v2922_v26 = vpop.f32.mrf.mxu3 }
0x1618   :  { %v2945_v27 = vpop.f32.mrf.mxu0 }
0x162f   :  { %2610 = vadd.xlane.f32.xlu2 %v2609_v32 }
0x1637   :  { %2951 = vmax.xlane.f32.xlu2 %v2950_v56 }
0x164f   :  { %2859 = vrot.lane.b32.xlu2 %v2743_v35, %s5176_s10 }
0x1661   :  { %v2719_v25 = vpop.xlane.xlu2 %2718 }
0x1662   :  { %v2723_v34 = vsub.f32 %v2684_v1, %v2719_v25 }
0x1664   :  { %v2725_v36 = vmul.f32 1.442695, %v2723_v34  ;;  %v2722_v10 = vpop.xlane.xlu0 %2721 }
0x1665   :  { %v2724_v37 = vsub.f32 %v2713_v4, %v2722_v10 }
0x1666   :  { %4015 = vpow2.f32 %v2725_v36 }
0x1667   :  { %v2727_v38 = vmul.f32 1.442695, %v2724_v37 }
0x1669   :  { %4017 = vpow2.f32 %v2727_v38  ;;  %v2769_v40 = vpop.permute.xlu2 %2768 }
0x166a   :  { %v2774_v7 = vsel %vm363_vm11, %v2769_v40, 0 }
0x166b   :  { %2783 = vmatpush.bf16.msrb.mxu2 %v2774_v7 }
0x166c   :  { %v4906_v41 = vpop.eup %4015  ;;  %v2614_v42 = vpop.xlane.xlu1 %2613 }
0x166d   :  { %4019 = vrcp.f32 %v2614_v42  ;;  %v2729_v44 = vsel %vm290_vm10, %v4906_v41, 0.0 }
0x166e   :  { %2730 = vadd.xlane.f32.xlu0 %v2729_v44 }
0x166f   :  { %v4018_v45 = vpop.eup %4017 }
0x1670   :  { %v2732_v39 = vsel %vm290_vm10, %v4018_v45, 0.0 }
0x1671   :  { %2733 = vadd.xlane.f32.xlu1 %v2732_v39  ;;  %v2837_v49 = vpop.xlane.xlu0 %2836 }
0x1672   :  { %v2841_v0 = vsub.f32 %v4885_v15, %v2837_v49 }
0x1673   :  { %v4020_v46 = vpop.eup %4019 }
0x1674   :  { %v2618_v47 = vmul.f32 %v4020_v46, %v4012_v13  ;;  %v2843_v54 = vmul.f32 1.442695, %v2841_v0 }
0x1675   :  { %v2840_v8 = vpop.xlane.xlu1 %2839 }
0x1676   :  { %v2620_v48 = vpack.c.bf16 %v2618_v47, %v2618_v47  ;;  %v2842_v57 = vsub.f32 %v4889_v20, %v2840_v8 }
0x1678   :  { %3678 = vmatmul.msk.bf16.vlgmr.msra.gmra.mxu2 %vm290_vm10, %v2620_v48  ;;  %v2845_v60 = vmul.f32 1.442695, %v2842_v57 }
0x1681   :  { %v2949_v50 = vpop.xlane.xlu0 %2948 }
0x1682   :  { %v2953_v51 = vsub.f32 %v2920_v22, %v2949_v50  ;;  %2880 = vrot.lane.b32.xlu0 %v4893_v18, %s5176_s10 }
0x1684   :  { %v2955_v52 = vmul.f32 1.442695, %v2953_v51 }
0x1686   :  { %4021 = vpow2.f32 %v2955_v52 }
0x1687   :  { %4023 = vpow2.f32 %v2843_v54 }
0x168a   :  { %2744 = vrot.lane.b32.xlu1 %v2743_v35, %s5184_s26 }
0x168c   :  { %v4915_v43 = vpop.eup %4021 }
0x168d   :  { %v2959_v53 = vsel %vm290_vm10, %v4915_v43, 0.0  ;;  %v4024_v62 = vpop.eup %4023 }
0x168e   :  { %2960 = vadd.xlane.f32.xlu2 %v2959_v53  ;;  %v2847_v29 = vsel %vm290_vm10, %v4024_v62, 0.0 }
0x16a2   :  { %v2611_v59 = vpop.xlane.xlu2 %2610 }
0x16a3   :  { %4025 = vrcp.f32 %v2611_v59 }
0x16a4   :  { %4027 = vpow2.f32 %v2845_v60 }
0x16a9   :  { %v4026_v63 = vpop.eup %4025 }
0x16aa   :  { %v2617_v1 = vmul.f32 %v4026_v63, %v4014_v33  ;;  %v2952_v55 = vpop.xlane.xlu2 %2951  ;;  %v4028_v61 = vpop.eup %4027 }
0x16ab   :  { %v2954_v3 = vsub.f32 %v4898_v23, %v2952_v55  ;;  %v2850_v13 = vsel %vm290_vm10, %v4028_v61, 0.0 }
0x16ac   :  { %v2619_v4 = vpack.c.bf16 %v2617_v1, %v2617_v1  ;;  %2848 = vadd.xlane.f32.xlu0 %v2847_v29  ;;  %v3778_v29 = vld [vmem:[%s5098_s15 + $0x10] sm:$0xff] }
0x16ad   :  { %v2957_v6 = vmul.f32 1.442695, %v2954_v3  ;;  %v3779_v3 = vld [vmem:[%s5098_s15 + $0x18] sm:$0xff] }
0x16ae   :  { %3677 = vmatmul.msk.bf16.vlgmr.msrb.gmra.mxu1 %vm290_vm10, %v2619_v4  ;;  %3065 = vmatpush.bf16.msra.mxu3 %v3779_v3 }
0x16af   :  { %4029 = vpow2.f32 %v2957_v6 }
0x16b2   :  { %v2860_v58 = vpop.permute.xlu2 %2859  ;;  %3066 = vmatpush.bf16.msra.mxu3 %v3778_v29 }
0x16b3   :  { %v2865_v28 = vsel %vm363_vm11, %v2860_v58, 0 }
0x16b4   :  { %2851 = vadd.xlane.f32.xlu0 %v2850_v13 }
0x16b5   :  { %v4030_v12 = vpop.eup %4029 }
0x16b6   :  { %v2962_v14 = vsel %vm290_vm10, %v4030_v12, 0.0 }
0x16b7   :  { %2963 = vadd.xlane.f32.xlu1 %v2962_v14 }
0x16c8   :  { %2992 = vrot.lane.b32.xlu0 %v4893_v18, %s5177_s1 }
0x16d0   :  { %2971 = vrot.lane.b32.xlu0 %v2743_v35, %s5177_s1 }
0x16e1   :  { %v2731_v5 = vpop.xlane.xlu0 %2730 }
0x16e4   :  { %v2734_v15 = vpop.xlane.xlu1 %2733 }
0x16e5   :  { %4031 = vrcp.f32 %v2734_v15 }
0x16e6   :  { %4033 = vrcp.f32 %v2731_v5 }
0x16eb   :  { %v4032_v16 = vpop.eup %4031 }
0x16ec   :  { %v2738_v20 = vmul.f32 %v4032_v16, %v4018_v45  ;;  %v4034_v22 = vpop.eup %4033 }
0x16ed   :  { %v2737_v23 = vmul.f32 %v4034_v22, %v4906_v41 }
0x16ee   :  { %v2740_v11 = vpack.c.bf16 %v2738_v20, %v2738_v20 }
0x16ef   :  { %v2739_v9 = vpack.c.bf16 %v2737_v23, %v2737_v23 }
0x16f0   :  { %3682 = vmatmul.msk.bf16.vlgmr.msrb.gmra.mxu2 %vm290_vm10, %v2740_v11 }
0x16f4   :  { %v2881_v17 = vpop.permute.xlu0 %2880 }
0x16f5   :  { %v2886_v21 = vsel %vm363_vm11, %v2881_v17, 0 }
0x16f6   :  { %2895 = vmatpush.bf16.msra.mxu2 %v2886_v21 }
0x16fb   :  { %v4932_v18 = vpop.f32.mrf.mxu2 }
0x16fc   :  { %v2745_v26 = vpop.permute.xlu1 %2744 }
0x16fd   :  { %v2750_v27 = vsel %vm363_vm11, %v2745_v26, 0  ;;  %v3881_v26 = vld [vmem:[%s5097_s16 + $0x1] ss:$0 sm:$0xff] }
0x16fe   :  { %2759 = vmatpush.bf16.msra.mxu1 %v2750_v27 }
0x1701   :  { %3681 = vmatmul.msk.bf16.vlgmr.msra.gmra.mxu1 %vm290_vm10, %v2739_v9  ;;  %v2961_v40 = vpop.xlane.xlu2 %2960 }
0x1702   :  { %2874 = vmatpush.bf16.msrb.mxu1 %v2865_v28 }
0x1703   :  { %v2657_v31 = vpop.f32.mrf.mxu2 }
0x171f   :  { %v2849_v33 = vpop.xlane.xlu0 %2848 }
0x1720   :  { %4035 = vrcp.f32 %v2849_v33 }
0x1726   :  { %v4036_v32 = vpop.eup %4035 }
0x1727   :  { %v2855_v56 = vmul.f32 %v4036_v32, %v4024_v62  ;;  %v2852_v2 = vpop.xlane.xlu0 %2851 }
0x1728   :  { %4037 = vrcp.f32 %v2852_v2 }
0x1729   :  { %v2857_v35 = vpack.c.bf16 %v2855_v56, %v2855_v56 }
0x172a   :  { %v2964_v37 = vpop.xlane.xlu1 %2963 }
0x172b   :  { %v2636_v25 = vpop.f32.mrf.mxu1  ;;  %3685 = vmatmul.msk.bf16.vlgmr.msrb.gmra.mxu1 %vm290_vm10, %v2857_v35  ;;  %4039 = vrcp.f32 %v2964_v37 }
0x172c   :  { %4041 = vrcp.f32 %v2961_v40  ;;  %v3781_v40 = vld [vmem:[%s5102_s19 + $0x18] sm:$0xff] }
0x172d   :  { %3159 = vmatpush.bf16.msrb.mxu0 %v3781_v40 }
0x172e   :  { %v4038_v34 = vpop.eup %4037 }
0x172f   :  { %v2856_v36 = vmul.f32 %v4038_v34, %v4028_v61 }
0x1731   :  { %v2858_v10 = vpack.c.bf16 %v2856_v36, %v2856_v36  ;;  %v4040_v7 = vpop.eup %4039 }
0x1732   :  { %v2968_v44 = vmul.f32 %v4040_v7, %v4030_v12  ;;  %v4042_v45 = vpop.eup %4041 }
0x1733   :  { %v2638_v38 = vpop.f32.mrf.mxu1  ;;  %3686 = vmatmul.msk.bf16.vlgmr.msra.gmra.mxu2 %vm290_vm10, %v2858_v10  ;;  %v2967_v39 = vmul.f32 %v4042_v45, %v4915_v43 }
0x1734   :  { %v2970_v46 = vpack.c.bf16 %v2968_v44, %v2968_v44  ;;  %v3780_v44 = vld [vmem:[%s5102_s19 + $0x10] sm:$0xff] }
0x1735   :  { %v2969_v49 = vpack.c.bf16 %v2967_v39, %v2967_v39  ;;  %3160 = vmatpush.bf16.msrb.mxu0 %v3780_v44 }
0x173a   :  { %v2993_v41 = vpop.permute.xlu0 %2992 }
0x173b   :  { %v2998_v42 = vsel %vm363_vm11, %v2993_v41, 0 }
0x173c   :  { %3007 = vmatpush.bf16.msrb.mxu2 %v2998_v42 }
0x1742   :  { %v2972_v47 = vpop.permute.xlu0 %2971 }
0x1743   :  { %v2977_v48 = vsel %vm363_vm11, %v2972_v47, 0  ;;  %3690 = vmatmul.msk.bf16.vlgmr.msrb.gmra.mxu2 %vm290_vm10, %v2970_v46 }
0x1744   :  { %2986 = vmatpush.bf16.msra.mxu1 %v2977_v48 }
0x1747   :  { %3689 = vmatmul.msk.bf16.vlgmr.msra.gmra.mxu1 %vm290_vm10, %v2969_v49 }
0x1773   :  { %v2785_v50 = vpop.f32.mrf.mxu2 }
0x177b   :  { %v2787_v51 = vpop.f32.mrf.mxu2 }
0x177e   :  { %v2761_v52 = vpop.f32.mrf.mxu1 }
0x177f   :  { %v3850_v53 = vpack.i.bf16 %v2785_v50, %v2761_v52 }
0x1781   :  { %3851 = vrot.lane.b32.xlu0 %v3850_v53, %s5178_s4 }
0x1786   :  { %v2763_v0 = vpop.f32.mrf.mxu1 }
0x17a8   :  { %v2876_v54 = vpop.f32.mrf.mxu1 }
0x17b0   :  { %v2878_v8 = vpop.f32.mrf.mxu1 }
0x17b6   :  { %v2897_v43 = vpop.f32.mrf.mxu2 }
0x17b7   :  { %v3855_v57 = vpack.i.bf16 %v2897_v43, %v2876_v54 }
0x17b9   :  { %3856 = vrot.lane.b32.xlu0 %v3855_v57, %s5179_s8 }
0x17be   :  { %v2899_v59 = vpop.f32.mrf.mxu2 }
0x17bf   :  { %v3882_v59 = vld [vmem:[%s5099_s17 + $0x1] ss:$0 sm:$0xff]  ;;  %s5191_s17 = sld [smem:[#allocation15_spill]] }
0x17c4   :  { %v2988_v60 = vpop.f32.mrf.mxu1 }
0x17c6   :  { %v3009_v62 = vpop.f32.mrf.mxu2 }
0x17c7   :  { %v3860_v63 = vpack.i.bf16 %v3009_v62, %v2988_v60 }
0x17c9   :  { %3861 = vrot.lane.b32.xlu1 %v3860_v63, %s5180_s0 }
0x17cc   :  { %v2990_v1 = vpop.f32.mrf.mxu1 }
0x17cd   :  { %v3883_v1 = vld [vmem:[%s5100_s18 + $0x1] ss:$0 sm:$0xff] }
0x17ce   :  { %v3011_v55 = vpop.f32.mrf.mxu2 }
0x17f3   :  { %v3852_v4 = vpop.permute.xlu0 %3851 }
0x17f4   :  { %v3854_v61 = vunpack.i.h.bf16 %v3852_v4  ;;  %v3853_v13 = vunpack.i.l.bf16 %v3852_v4 }
0x17f6   :  { %v3038_v16 = vsel %vm290_vm10, %v4932_v18, %v3854_v61  ;;  %v3037_v5 = vsel %vm290_vm10, %v2636_v25, %v3853_v13  ;;  %v3884_v13 = vld [vmem:[%s5101_s20 + $0x1] ss:$0 sm:$0xff] }
0x182b   :  { %v3857_v6 = vpop.permute.xlu0 %3856 }
0x182c   :  { %v3859_v12 = vunpack.i.h.bf16 %v3857_v6  ;;  %v3858_v14 = vunpack.i.l.bf16 %v3857_v6 }
0x182e   :  { %v3040_v17 = vsel %vm769_vm12, %v3038_v16, %v3859_v12  ;;  %v3039_v21 = vsel %vm769_vm12, %v3037_v5, %v3858_v14 }
0x183b   :  { %v3862_v15 = vpop.permute.xlu1 %3861 }
0x183c   :  { %v3864_v20 = vunpack.i.h.bf16 %v3862_v15  ;;  %v3863_v11 = vunpack.i.l.bf16 %v3862_v15  ;;  %v3789_v15 = vld [vmem:[%s5104_s21 + $0x78] sm:$0xff] }
0x183d   :  { %3304 = vmatpush.bf16.msrb.mxu1 %v3789_v15 }
0x183e   :  { %v3042_v22 = vsel %vm772_vm13, %v3040_v17, %v3864_v20  ;;  %v3041_v58 = vsel %vm772_vm13, %v3039_v21, %v3863_v11  ;;  %v3788_v20 = vld [vmem:[%s5104_s21 + $0x70] sm:$0xff] }
0x183f   :  { %v3043_v23 = vpack.c.bf16 %v3042_v22, %v3041_v58 }
0x1841   :  { %3699 = vmatmul.msk.bf16.vlgmr.msra.gmra.mxu3 %vm187_vm2, %v3043_v23  ;;  %3305 = vmatpush.bf16.msrb.mxu1 %v3788_v20  ;;  %v3787_v23 = vld [vmem:[%s5104_s21 + $0x68] sm:$0xff] }
0x1845   :  { %3306 = vmatpush.bf16.msrb.mxu1 %v3787_v23 }
0x18c4   :  { %v3068_v18 = vpop.f32.mrf.mxu3 }
0x18c5   :  { %v3073_v27 = vadd.f32 %v3068_v18, %v4796_v24 }
0x18c7   :  { %v4965_v28 = vadd.f32 %v3881_v26, %v3073_v27 }
0x18c9   :  { %v3080_v9 = vsel %vm187_vm2, %v4965_v28, 0.0 }
0x18ca   :  { %3081 = vadd.xlane.f32.xlu2 %v3080_v9 }
0x18cc   :  { %v3070_v31 = vpop.f32.mrf.mxu3 }
0x18cd   :  { %v3074_v33 = vadd.f32 %v3070_v31, %v4801_v30  ;;  %v3786_v31 = vld [vmem:[%s5104_s21 + $0x60] sm:$0xff] }
0x18ce   :  { %3307 = vmatpush.bf16.msrb.mxu1 %v3786_v31 }
0x18cf   :  { %v4970_v32 = vadd.f32 %v3881_v26, %v3074_v33 }
0x18d1   :  { %v3083_v56 = vsel %vm187_vm2, %v4970_v32, 0.0 }
0x18d2   :  { %3084 = vadd.xlane.f32.xlu0 %v3083_v56 }
0x193d   :  { %v3082_v2 = vpop.xlane.xlu2 %3081 }
0x193e   :  { %v3086_v35 = vmul.f32 %v3082_v2, %v4234_v19 }
0x1940   :  { %v3088_v24 = vsub.f32 %v4965_v28, %v3086_v35 }
0x1942   :  { %v3090_v25 = vmul.f32 %v3088_v24, %v3088_v24 }
0x1944   :  { %v3092_v34 = vsel %vm187_vm2, %v3090_v25, 0.0  ;;  %v3785_v25 = vld [vmem:[%s5104_s21 + $0x58] sm:$0xff] }
0x1945   :  { %3093 = vadd.xlane.f32.xlu2 %v3092_v34  ;;  %v3085_v36 = vpop.xlane.xlu0 %3084  ;;  %3308 = vmatpush.bf16.msrb.mxu1 %v3785_v25 }
0x1946   :  { %v3087_v10 = vmul.f32 %v3085_v36, %v4234_v19 }
0x1948   :  { %v3089_v30 = vsub.f32 %v4970_v32, %v3087_v10 }
0x194a   :  { %v3091_v37 = vmul.f32 %v3089_v30, %v3089_v30 }
0x194c   :  { %v3095_v38 = vsel %vm187_vm2, %v3091_v37, 0.0 }
0x194d   :  { %3096 = vadd.xlane.f32.xlu2 %v3095_v38 }
0x19b8   :  { %v3094_v7 = vpop.xlane.xlu2 %3093 }
0x19b9   :  { %v3098_v41 = vmul.f32 %v3094_v7, %v4234_v19  ;;  %v3784_v7 = vld [vmem:[%s5104_s21 + $0x50] sm:$0xff] }
0x19ba   :  { %3309 = vmatpush.bf16.msrb.mxu1 %v3784_v7 }
0x19bb   :  { %v3100_v42 = vadd.f32 1e-05, %v3098_v41 }
0x19bd   :  { %4043 = vrsqrt.f32 %v3100_v42  ;;  %vm3108_vm11 = vweird.f32 %v3100_v42 }
0x19c0   :  { %v3097_v45 = vpop.xlane.xlu2 %3096 }
0x19c1   :  { %v3099_v39 = vmul.f32 %v3097_v45, %v4234_v19 }
0x19c3   :  { %v4044_v46 = vpop.eup %4043  ;;  %v3101_v47 = vadd.f32 1e-05, %v3099_v39 }
0x19c4   :  { %v3103_v48 = vmul.f32 %v4044_v46, %v3100_v42  ;;  %vm3109_vm10 = vweird.f32 %v4044_v46 }
0x19c5   :  { %4045 = vrsqrt.f32 %v3101_v47  ;;  %vm3110_vm12 = vmor %vm3108_vm11, %vm3109_vm10  ;;  %vm3118_vm9 = vweird.f32 %v3101_v47 }
0x19c6   :  { %v3104_v49 = vmul.f32 %v4044_v46, %v3103_v48  ;;  %v3783_v48 = vld [vmem:[%s5104_s21 + $0x48] sm:$0xff] }
0x19c7   :  { %3310 = vmatpush.bf16.msrb.mxu1 %v3783_v48 }
0x19c8   :  { %v3105_v50 = vmul.f32 0.5, %v3104_v49 }
0x19ca   :  { %v3106_v51 = vsub.f32 1.5, %v3105_v50 }
0x19cb   :  { %v4046_v52 = vpop.eup %4045 }
0x19cc   :  { %v3107_v53 = vmul.f32 %v4044_v46, %v3106_v51  ;;  %v3113_v0 = vmul.f32 %v4046_v52, %v3101_v47  ;;  %vm3119_vm13 = vweird.f32 %v4046_v52 }
0x19cd   :  { %vm3120_vm14 = vmor %vm3118_vm9, %vm3119_vm13 }
0x19ce   :  { %v3114_v54 = vmul.f32 %v4046_v52, %v3113_v0  ;;  %v3111_v8 = vsel %vm3110_vm12, %v4044_v46, %v3107_v53  ;;  %v3782_v0 = vld [vmem:[%s5104_s21 + $0x40] sm:$0xff] }
0x19cf   :  { %v3122_v60 = vmul.f32 %v3111_v8, %v3088_v24  ;;  %3311 = vmatpush.bf16.msrb.mxu1 %v3782_v0 }
0x19d0   :  { %v3115_v43 = vmul.f32 0.5, %v3114_v54 }
0x19d1   :  { %v3127_v55 = vmul.f32 %v3882_v59, %v3122_v60 }
0x19d2   :  { %v3116_v57 = vsub.f32 1.5, %v3115_v43 }
0x19d3   :  { %v3132_v4 = vadd.f32 %v3883_v1, %v3127_v55 }
0x19d4   :  { %v3117_v62 = vmul.f32 %v4046_v52, %v3116_v57 }
0x19d6   :  { %v3121_v63 = vsel %vm3120_vm14, %v4046_v52, %v3117_v62 }
0x19d7   :  { %v3123_v3 = vmul.f32 %v3121_v63, %v3089_v30 }
0x19d9   :  { %v3128_v29 = vmul.f32 %v3882_v59, %v3123_v3 }
0x19db   :  { %v3133_v6 = vadd.f32 %v3883_v1, %v3128_v29 }
0x19dd   :  { %v3134_v61 = vpack.c.bf16 %v3133_v6, %v3132_v4 }
0x19df   :  { %3708 = vmatmul.msk.bf16.vlgmr.msrb.gmra.mxu0 %vm187_vm2, %v3134_v61 }
0x1a5c   :  { %v3162_v12 = vpop.f32.mrf.mxu0 }
0x1a5d   :  { %v4998_v14 = vadd.f32 %v3884_v13, %v3162_v12 }
0x1a5f   :  { %v5004_v16 = vmul.f32 0.70710677, %v4998_v14 }
0x1a61   :  { %v3171_v5 = vmul.f32 %v5004_v16, %v5004_v16 }
0x1a63   :  { %v3172_v11 = vmin.f32 %v3171_v5, 16.0 }
0x1a64   :  { %v3164_v17 = vpop.f32.mrf.mxu0 }
0x1a65   :  { %v3173_v21 = vmul.f32 2.1237322e-06, %v3172_v11  ;;  %v3184_v22 = vmul.f32 3.8918573e-05, %v3172_v11  ;;  %v5011_v58 = vadd.f32 %v3884_v13, %v3164_v17 }
0x1a67   :  { %v3174_v26 = vadd.f32 0.00028619796, %v3173_v21  ;;  %v3185_v18 = vadd.f32 0.001143296, %v3184_v22  ;;  %v5017_v27 = vmul.f32 0.70710677, %v5011_v58 }
0x1a69   :  { %v3186_v9 = vmul.f32 %v3185_v18, %v3172_v11  ;;  %v3211_v33 = vmul.f32 %v5017_v27, %v5017_v27  ;;  %v3175_v56 = vmul.f32 %v3174_v26, %v3172_v11 }
0x1a6b   :  { %v3187_v2 = vadd.f32 0.014752088, %v3186_v9  ;;  %v3212_v35 = vmin.f32 %v3211_v33, 16.0  ;;  %v3176_v10 = vadd.f32 0.0036580483, %v3175_v56 }
0x1a6d   :  { %v3188_v24 = vmul.f32 %v3187_v2, %v3172_v11  ;;  %v3213_v34 = vmul.f32 2.1237322e-06, %v3212_v35  ;;  %v3224_v36 = vmul.f32 3.8918573e-05, %v3212_v35  ;;  %v3177_v44 = vmul.f32 %v3176_v10, %v3172_v11 }
0x1a6f   :  { %v3189_v30 = vadd.f32 0.112945676, %v3188_v24  ;;  %v3214_v37 = vadd.f32 0.00028619796, %v3213_v34  ;;  %v3225_v38 = vadd.f32 0.001143296, %v3224_v36 }
0x1a70   :  { %v3178_v50 = vadd.f32 0.05243302, %v3177_v44  ;;  %v3885_v44 = vld [vmem:[%s5103_s22 + $0x1] ss:$0 sm:$0xff] }
0x1a71   :  { %v3190_v40 = vmul.f32 %v3189_v30, %v3172_v11  ;;  %v3215_v41 = vmul.f32 %v3214_v37, %v3212_v35  ;;  %v3226_v42 = vmul.f32 %v3225_v38, %v3212_v35  ;;  %v3167_v37 = vmul.f32 0.5, %v4998_v14 }
0x1a72   :  { %v3179_v8 = vmul.f32 %v3178_v50, %v3172_v11  ;;  %v3168_v38 = vmul.f32 0.5, %v5011_v58 }
0x1a73   :  { %v3191_v45 = vadd.f32 0.4994258, %v3190_v40  ;;  %v3216_v39 = vadd.f32 0.0036580483, %v3215_v41  ;;  %v3227_v46 = vadd.f32 0.014752088, %v3226_v42 }
0x1a74   :  { %v3180_v62 = vadd.f32 0.18741608, %v3179_v8 }
0x1a75   :  { %v3192_v47 = vmul.f32 %v3191_v45, %v3172_v11  ;;  %v3228_v49 = vmul.f32 %v3227_v46, %v3212_v35  ;;  %v3217_v52 = vmul.f32 %v3216_v39, %v3212_v35 }
0x1a76   :  { %v3181_v29 = vmul.f32 %v3180_v62, %v3172_v11 }
0x1a77   :  { %v3193_v51 = vadd.f32 1.0, %v3192_v47  ;;  %v3229_v53 = vadd.f32 0.112945676, %v3228_v49  ;;  %v3218_v43 = vadd.f32 0.05243302, %v3217_v52 }
0x1a78   :  { %v3182_v15 = vadd.f32 1.1283791, %v3181_v29 }
0x1a79   :  { %4047 = vrcp.f32 %v3193_v51  ;;  %v3230_v54 = vmul.f32 %v3229_v53, %v3212_v35  ;;  %v3219_v1 = vmul.f32 %v3218_v43, %v3212_v35  ;;  %v3205_v6 = vand.u32 2147483648, %v3193_v51 }
0x1a7a   :  { %v3203_v13 = vand.u32 2147483647, %v3193_v51  ;;  %vm3199_vm0 = vweird.f32 %v3193_v51  ;;  %v3183_v26 = vmul.f32 %v3182_v15, %v5004_v16 }
0x1a7b   :  { %v3231_v57 = vadd.f32 0.4994258, %v3230_v54  ;;  %v3220_v61 = vadd.f32 0.18741608, %v3219_v1  ;;  %v3206_v17 = vor.u32 1.1754944e-38, %v3205_v6 }
0x1a7c   :  { %vm3204_vm3 = vcmp.eq.f32.partialorder %v3203_v13, 8.507059e+37 }
0x1a7d   :  { %v3232_v59 = vmul.f32 %v3231_v57, %v3212_v35  ;;  %v3221_v21 = vmul.f32 %v3220_v61, %v3212_v35  ;;  %v3383_v57 = vld [vmem:[%s5108_s25 + $0x10] sm:$0xff] }
0x1a7f   :  { %v4048_v60 = vpop.eup %4047  ;;  %v3233_v55 = vadd.f32 1.0, %v3232_v59  ;;  %v3222_v11 = vadd.f32 1.1283791, %v3221_v21  ;;  %v3382_v59 = vld [vmem:[%s5108_s25 + $0x8] sm:$0xff] }
0x1a80   :  { %v3195_v63 = vmul.f32 %v4048_v60, %v3193_v51  ;;  %vm3200_vm15 = vweird.f32 %v4048_v60 }
0x1a81   :  { %4049 = vrcp.f32 %v3233_v55  ;;  %vm3201_vm1 = vmor %vm3199_vm0, %vm3200_vm15  ;;  %v3245_v9 = vand.u32 2147483648, %v3233_v55  ;;  %v3243_v56 = vand.u32 2147483647, %v3233_v55  ;;  %vm3239_vm5 = vweird.f32 %v3233_v55 }
0x1a82   :  { %v3196_v3 = vsub.f32 1.0, %v3195_v63  ;;  %v3223_v34 = vmul.f32 %v3222_v11, %v5017_v27 }
0x1a83   :  { %v3246_v24 = vor.u32 1.1754944e-38, %v3245_v9  ;;  %vm3244_vm7 = vcmp.eq.f32.partialorder %v3243_v56, 8.507059e+37 }
0x1a84   :  { %v3197_v4 = vmul.f32 %v4048_v60, %v3196_v3 }
0x1a86   :  { %v3198_v12 = vadd.f32 %v4048_v60, %v3197_v4 }
0x1a87   :  { %v4050_v5 = vpop.eup %4049 }
0x1a88   :  { %v3202_v20 = vsel %vm3201_vm1, %v4048_v60, %v3198_v12  ;;  %v3235_v22 = vmul.f32 %v4050_v5, %v3233_v55  ;;  %vm3240_vm4 = vweird.f32 %v4050_v5  ;;  %v3381_v60 = vld [vmem:[%s5108_s25] sm:$0xff] }
0x1a89   :  { %v3207_v23 = vsel %vm3204_vm3, %v3206_v17, %v3202_v20  ;;  %vm3241_vm6 = vmor %vm3239_vm5, %vm3240_vm4  ;;  %v3886_v17 = vld [vmem:[%s5190_s29] ss:$0 sm:$0xff] }
0x1a8a   :  { %v3236_v18 = vsub.f32 1.0, %v3235_v22  ;;  %v3208_v31 = vmul.f32 %v3207_v23, %v3183_v26 }
0x1a8c   :  { %v3237_v33 = vmul.f32 %v4050_v5, %v3236_v18  ;;  %v3709_v25 = vclamps-f32 %v3208_v31, 1.0 }
0x1a8e   :  { %v3238_v2 = vadd.f32 %v4050_v5, %v3237_v33  ;;  %v3251_v30 = vadd.f32 1.0, %v3709_v25  ;;  %v3888_v25 = vld [vmem:[%s5192_s2] ss:$0 sm:$0xff] }
0x1a90   :  { %v3242_v35 = vsel %vm3241_vm6, %v4050_v5, %v3238_v2  ;;  %v3253_v7 = vmul.f32 %v3251_v30, %v3167_v37 }
0x1a91   :  { %v3247_v36 = vsel %vm3244_vm7, %v3246_v24, %v3242_v35 }
0x1a92   :  { %v3248_v10 = vmul.f32 %v3247_v36, %v3223_v34 }
0x1a94   :  { %v3710_v16 = vclamps-f32 %v3248_v10, 1.0 }
0x1a96   :  { %v3252_v40 = vadd.f32 1.0, %v3710_v16 }
0x1a98   :  { %v3254_v41 = vmul.f32 %v3252_v40, %v3168_v38 }
0x1a9a   :  { %v3255_v42 = vpack.c.bf16 %v3254_v41, %v3253_v7 }
0x1a9c   :  { %3312 = vmatmul.bf16.vlgmr.msrb.gmra.mxu1 %v3255_v42 }
0x1b19   :  { %v3313_v27 = vpop.f32.mrf.mxu1 }
0x1b1a   :  { %v3318_v45 = vadd.f32 %v3313_v27, %v4965_v28 }
0x1b1c   :  { %v3323_v39 = vadd.f32 %v3885_v44, %v3318_v45 }
0x1b1e   :  { %v3327_v46 = vsel %vm187_vm2, %v3323_v39, 0.0 }
0x1b1f   :  { %3328 = vadd.xlane.f32.xlu1 %v3327_v46 }
0x1b21   :  { %v3315_v47 = vpop.f32.mrf.mxu1 }
0x1b22   :  { %v3319_v14 = vadd.f32 %v3315_v47, %v4970_v32  ;;  %v3384_v32 = vld [vmem:[%s5108_s25 + $0x18] sm:$0xff] }
0x1b23   :  { %3407 = vmatpush.msra.mxu2 %v3384_v32 }
0x1b24   :  { %v3324_v58 = vadd.f32 %v3885_v44, %v3319_v14 }
0x1b25   :  { %3408 = vmatpush.msra.mxu2 %v3383_v57 }
0x1b26   :  { %v3330_v48 = vsel %vm187_vm2, %v3324_v58, 0.0 }
0x1b27   :  { %3331 = vadd.xlane.f32.xlu2 %v3330_v48  ;;  %3409 = vmatpush.msra.mxu2 %v3382_v59 }
0x1b29   :  { %3410 = vmatpush.msra.mxu2 %v3381_v60 }
0x1b92   :  { %v3329_v49 = vpop.xlane.xlu1 %3328 }
0x1b93   :  { %v3333_v50 = vmul.f32 %v3329_v49, %v4234_v19 }
0x1b95   :  { %v3335_v51 = vsub.f32 %v3323_v39, %v3333_v50 }
0x1b97   :  { %v3337_v52 = vmul.f32 %v3335_v51, %v3335_v51 }
0x1b99   :  { %v3339_v53 = vsel %vm187_vm2, %v3337_v52, 0.0 }
0x1b9a   :  { %3340 = vadd.xlane.f32.xlu2 %v3339_v53  ;;  %v3332_v28 = vpop.xlane.xlu2 %3331 }
0x1b9b   :  { %v3334_v0 = vmul.f32 %v3332_v28, %v4234_v19 }
0x1b9d   :  { %v3336_v54 = vsub.f32 %v3324_v58, %v3334_v0 }
0x1b9f   :  { %v3338_v8 = vmul.f32 %v3336_v54, %v3336_v54 }
0x1ba1   :  { %v3342_v43 = vsel %vm187_vm2, %v3338_v8, 0.0 }
0x1ba2   :  { %3343 = vadd.xlane.f32.xlu2 %v3342_v43 }
0x1c0d   :  { %v3341_v62 = vpop.xlane.xlu2 %3340 }
0x1c0e   :  { %v3345_v63 = vmul.f32 %v3341_v62, %v4234_v19 }
0x1c10   :  { %v3347_v1 = vadd.f32 1e-05, %v3345_v63 }
0x1c12   :  { %4051 = vrsqrt.f32 %v3347_v1  ;;  %vm3355_vm10 = vweird.f32 %v3347_v1 }
0x1c15   :  { %v3344_v55 = vpop.xlane.xlu2 %3343 }
0x1c16   :  { %v3346_v3 = vmul.f32 %v3344_v55, %v4234_v19  ;;  %v3887_v19 = vld [vmem:[%s5191_s17] ss:$0 sm:$0xff] }
0x1c18   :  { %v4052_v29 = vpop.eup %4051  ;;  %v3348_v4 = vadd.f32 1e-05, %v3346_v3 }
0x1c19   :  { %v3350_v6 = vmul.f32 %v4052_v29, %v3347_v1  ;;  %vm3356_vm8 = vweird.f32 %v4052_v29 }
0x1c1a   :  { %4053 = vrsqrt.f32 %v3348_v4  ;;  %vm3357_vm11 = vmor %vm3355_vm10, %vm3356_vm8  ;;  %vm3365_vm13 = vweird.f32 %v3348_v4 }
0x1c1b   :  { %v3351_v61 = vmul.f32 %v4052_v29, %v3350_v6 }
0x1c1d   :  { %v3352_v13 = vmul.f32 0.5, %v3351_v61 }
0x1c1f   :  { %v3353_v12 = vsub.f32 1.5, %v3352_v13 }
0x1c20   :  { %v4054_v15 = vpop.eup %4053 }
0x1c21   :  { %v3354_v5 = vmul.f32 %v4052_v29, %v3353_v12  ;;  %v3360_v20 = vmul.f32 %v4054_v15, %v3348_v4  ;;  %vm3366_vm12 = vweird.f32 %v4054_v15 }
0x1c22   :  { %vm3367_vm9 = vmor %vm3365_vm13, %vm3366_vm12 }
0x1c23   :  { %v3358_v21 = vsel %vm3357_vm11, %v4052_v29, %v3354_v5  ;;  %v3361_v22 = vmul.f32 %v4054_v15, %v3360_v20 }
0x1c24   :  { %v3369_v23 = vmul.f32 %v3358_v21, %v3335_v51 }
0x1c25   :  { %v3362_v26 = vmul.f32 0.5, %v3361_v22 }
0x1c26   :  { %v3374_v18 = vmul.f32 %v3886_v17, %v3369_v23 }
0x1c27   :  { %v3363_v11 = vsub.f32 1.5, %v3362_v26 }
0x1c28   :  { %v3379_v9 = vadd.f32 %v3887_v19, %v3374_v18 }
0x1c29   :  { %v3364_v31 = vmul.f32 %v4054_v15, %v3363_v11 }
0x1c2a   :  { %3743 = vmatmul.msk.f32.vlgmr.msra.gmra.mxu2 %vm187_vm2, %v3379_v9 }
0x1c2b   :  { %v3368_v33 = vsel %vm3367_vm9, %v4054_v15, %v3364_v31 }
0x1c2c   :  { %v3370_v56 = vmul.f32 %v3368_v33, %v3336_v54 }
0x1c2e   :  { %v3375_v2 = vmul.f32 %v3886_v17, %v3370_v56 }
0x1c30   :  { %v3380_v24 = vadd.f32 %v3887_v19, %v3375_v2 }
0x1c32   :  { %3744 = vmatmul.msk.f32.gmra.mxu2 %vm187_vm2, %v3380_v24 }
0x1cad   :  { %v3412_v34 = vpop.f32.mrf.mxu2 }
0x1cae   :  { %v3413_v35 = vadd.f32 %v3888_v25, %v3412_v34 }
0x1cb0   :  { %3418 = vst [vmem:[%s5193_s5] sm:$0xff] %v3413_v35 }
0x1cb5   :  { %v3415_v36 = vpop.f32.mrf.mxu2 }
0x1cb6   :  { %v3416_v10 = vadd.f32 %v3888_v25, %v3415_v36 }
0x1cb8   :  { %3419 = vst [vmem:[%s5193_s5 + $0x8] sm:$0xff] %v3416_v10 }

</bundles_post_ra>
